<compile_context>
chip_gen: v6e
topology: v6e:2x2x1
jax: 0.10.0
libtpu: 0.0.40
codegen_flags: <defaults>
</compile_context>

<pallas_src>
import functools

import jax
import jax.numpy as jnp
from jax import lax
from jax.experimental import pallas as pl
from jax.experimental.pallas import tpu as pltpu


def _basic_block_kernel(stride, B_blk, Ho, Wo, C,
                        x_ref, w1_ref, w2_ref,
                        s1_ref, b1_ref, s2_ref, b2_ref, s3_ref, b3_ref,
                        out_ref,
                        xpar, xp2, a1, a2):
    """One grid step processes B_blk batch elements (folded into matmul M)."""
    f32 = jnp.float32
    bf16 = jnp.bfloat16
    s = stride
    ss = s * s
    M = B_blk * Ho * Wo

    # -- zero only the halo edges of the padded scratches; interiors are fully
    #    rewritten below.  Done every step so megacore grid sharding is safe. --
    row0 = jnp.zeros((B_blk, 1, Wo + 2, C), f32)
    col0 = jnp.zeros((B_blk, Ho + 2, 1, C), f32)
    for p in range(ss):
        xpar[p, :, 0:1, :, :] = row0
        xpar[p, :, :, 0:1, :] = col0
        if s == 1:  # back halos are only read by the stride-1 tap pattern
            xpar[p, :, Ho + 1:Ho + 2, :, :] = row0
            xpar[p, :, :, Wo + 1:Wo + 2, :] = col0
    xp2[:, 0:1, :, :] = row0
    xp2[:, Ho + 1:Ho + 2, :, :] = row0
    xp2[:, :, 0:1, :] = col0
    xp2[:, :, Wo + 1:Wo + 2, :] = col0

    # -- BN1 (f32) into the padded parity planes; accumulate raw planes for the
    #    shortcut (mean over the s*s parity planes == 2x2 average pool). --
    s1 = s1_ref[...]
    b1 = b1_ref[...]
    sc = None
    for p in range(ss):
        xp = x_ref[p]                                    # (B_blk, Ho, Wo, C) f32
        sc = xp if sc is None else sc + xp
        xpar[p, :, 1:1 + Ho, 1:1 + Wo, :] = xp * s1 + b1
    if ss > 1:
        sc = sc * (1.0 / ss)

    # -- conv1: im2col slab (M, 9*C) from 9 static contiguous slices, 1 MXU dot --
    for kh in range(3):
        pr = (kh - 1) % s
        r0 = 1 + (kh - 1) // s
        for kw in range(3):
            pc = (kw - 1) % s
            c0 = 1 + (kw - 1) // s
            t = kh * 3 + kw
            tap = xpar[pr * s + pc, :, r0:r0 + Ho, c0:c0 + Wo, :]
            a1[:, t * C:(t + 1) * C] = tap.reshape(M, C).astype(bf16)

    h = jnp.dot(a1[...], w1_ref[...], preferred_element_type=f32)     # (M, C)
    h = jnp.maximum(h * s2_ref[...] + b2_ref[...], 0.0)               # BN2 + ReLU
    xp2[:, 1:1 + Ho, 1:1 + Wo, :] = h.reshape(B_blk, Ho, Wo, C)

    # -- conv2 (stride 1): im2col + 1 MXU dot + BN3 --
    for kh in range(3):
        for kw in range(3):
            t = kh * 3 + kw
            tap = xp2[:, kh:kh + Ho, kw:kw + Wo, :]
            a2[:, t * C:(t + 1) * C] = tap.reshape(M, C).astype(bf16)

    h2 = jnp.dot(a2[...], w2_ref[...], preferred_element_type=f32)
    h2 = h2 * s3_ref[...] + b3_ref[...]

    # -- residual add (channels already zero-padded in the wrapper); one store --
    out_ref[...] = (h2 + sc.reshape(M, C)).astype(out_ref.dtype)


def basic_block_forward(x_nchw, params, stride):
    """NCHW -> NCHW forward of the PyramidNet BasicBlock (inference-mode BN)."""
    B, Cin, H, W = x_nchw.shape
    Cout = params['w1'].shape[0]
    assert stride in (1, 2)
    assert H % stride == 0 and W % stride == 0, \
        "stride-2 blocks assume even spatial dims (CIFAR PyramidNet)"
    Ho, Wo = H // stride, W // stride
    s, ss = stride, stride * stride
    C = Cout
    eps = 1e-5

    def bn_affine(g, b, m, v, pad):
        scale = (g / jnp.sqrt(v + eps)).astype(jnp.float32)
        shift = (b - m * scale).astype(jnp.float32)
        if pad:
            scale = jnp.pad(scale, (0, pad))
            shift = jnp.pad(shift, (0, pad))
        return scale.reshape(1, C), shift.reshape(1, C)

    s1, sh1 = bn_affine(*params['bn1'], Cout - Cin)
    s2, sh2 = bn_affine(*params['bn2'], 0)
    s3, sh3 = bn_affine(*params['bn3'], 0)

    # NCHW -> NHWC; zero-pad channels to Cout (shortcut pad becomes free; the
    # padded channels feed conv1 through zero weight rows).
    x = jnp.transpose(x_nchw, (0, 2, 3, 1)).astype(jnp.float32)
    if Cout > Cin:
        x = jnp.pad(x, ((0, 0), (0, 0), (0, 0), (0, Cout - Cin)))

    # spatial de-interleave into s*s parity planes:
    #   x_dei[pr*s + pc, b, r, c, :] == x[b, s*r + pr, s*c + pc, :]
    x_dei = (x.reshape(B, Ho, s, Wo, s, C)
              .transpose(2, 4, 0, 1, 3, 5)
              .reshape(ss, B, Ho, Wo, C))

    # conv weights: torch OIHW -> (9*C, C), bf16 operands for the MXU.
    w1 = jnp.transpose(params['w1'], (2, 3, 1, 0))            # (3,3,Cin,Cout)
    if Cout > Cin:
        w1 = jnp.pad(w1, ((0, 0), (0, 0), (0, Cout - Cin), (0, 0)))
    w1 = w1.reshape(9 * C, C).astype(jnp.bfloat16)
    w2 = jnp.transpose(params['w2'], (2, 3, 1, 0)).reshape(9 * C, C).astype(jnp.bfloat16)

    # batch block: fold B_blk batch elements into the matmul M dimension while
    # staying inside a conservative VMEM budget (safe on v7x's smaller VMEM).
    def _ru(n, m):
        return ((n + m - 1) // m) * m

    lane_c = _ru(C, 128)

    def vmem_bytes(bb):
        m = bb * Ho * Wo
        tot = 2 * ss * bb * Ho * _ru(Wo, 8) * lane_c * 4                  # input block x2
        tot += 2 * _ru(m, 8) * lane_c * 4                                 # output block x2
        tot += (ss + 1) * bb * (Ho + 2) * _ru(Wo + 2, 8) * lane_c * 4     # xpar + xp2
        tot += 2 * _ru(m, 16) * _ru(9 * C, 128) * 2                       # a1 + a2 (bf16)
        tot += 2 * _ru(9 * C, 8) * lane_c * 2                             # w1 + w2
        return tot

    B_blk = 1
    for d in range(1, B + 1):
        if B % d != 0:
            continue
        if d * Ho * Wo > 4096 or vmem_bytes(d) > 20 * 1024 * 1024:
            continue
        if (d * Ho * Wo) % 8 != 0 and d != B:
            continue
        B_blk = d
    M_blk = B_blk * Ho * Wo

    kernel = functools.partial(_basic_block_kernel, stride, B_blk, Ho, Wo, C)

    def rep(shape):
        return pl.BlockSpec(shape, lambda i, _n=len(shape): (0,) * _n)

    out = pl.pallas_call(
        kernel,
        out_shape=jax.ShapeDtypeStruct((B * Ho * Wo, C), jnp.float32),
        grid=(B // B_blk,),
        in_specs=[
            pl.BlockSpec((ss, B_blk, Ho, Wo, C), lambda i: (0, i, 0, 0, 0)),
            rep((9 * C, C)),
            rep((9 * C, C)),
            rep((1, C)), rep((1, C)),
            rep((1, C)), rep((1, C)),
            rep((1, C)), rep((1, C)),
        ],
        out_specs=pl.BlockSpec((M_blk, C), lambda i: (i, 0)),
        scratch_shapes=[
            pltpu.VMEM((ss, B_blk, Ho + 2, Wo + 2, C), jnp.float32),  # padded BN1(x) parity planes
            pltpu.VMEM((B_blk, Ho + 2, Wo + 2, C), jnp.float32),      # padded relu(BN2(conv1))
            pltpu.VMEM((M_blk, 9 * C), jnp.bfloat16),                 # conv1 im2col slab
            pltpu.VMEM((M_blk, 9 * C), jnp.bfloat16),                 # conv2 im2col slab
        ],
        compiler_params=pltpu.CompilerParams(
            dimension_semantics=("parallel",),
            vmem_limit_bytes=32 * 1024 * 1024),
    )(x_dei, w1, w2, s1, sh1, s2, sh2, s3, sh3)

    out = out.reshape(B, Ho, Wo, C)
    return jnp.transpose(out, (0, 3, 1, 2))                    # back to NCHW


def reference_forward(x_nchw, params, stride):
    """Pure-JAX reference (NCHW, matches PyTorch eval-mode semantics)."""
    eps = 1e-5

    def bn(x, g, b, m, v):
        inv = 1.0 / jnp.sqrt(v + eps)
        return (x - m[None, :, None, None]) * (g * inv)[None, :, None, None] \
            + b[None, :, None, None]

    h = bn(x_nchw, *params['bn1'])
    h = lax.conv_general_dilated(h, params['w1'], (stride, stride),
                                 ((1, 1), (1, 1)),
                                 dimension_numbers=('NCHW', 'OIHW', 'NCHW'))
    h = jax.nn.relu(bn(h, *params['bn2']))
    h = lax.conv_general_dilated(h, params['w2'], (1, 1), ((1, 1), (1, 1)),
                                 dimension_numbers=('NCHW', 'OIHW', 'NCHW'))
    h = bn(h, *params['bn3'])

    sc = x_nchw
    if stride == 2:
        sc = lax.reduce_window(sc, 0.0, lax.add, (1, 1, 2, 2), (1, 1, 2, 2),
                               'VALID') / 4.0
    cin = x_nchw.shape[1]
    cout = params['w1'].shape[0]
    if cout != cin:
        sc = jnp.pad(sc, ((0, 0), (0, cout - cin), (0, 0), (0, 0)))
    return h + sc


if __name__ == "__main__":
    def bn_params(k, c):
        k1, k2, k3, k4 = jax.random.split(k, 4)
        gamma = 1.0 + 0.1 * jax.random.normal(k1, (c,), jnp.float32)
        beta = 0.1 * jax.random.normal(k2, (c,), jnp.float32)
        mean = 0.1 * jax.random.normal(k3, (c,), jnp.float32)
        var = 1.0 + 0.1 * jax.random.uniform(k4, (c,), jnp.float32)
        return (gamma, beta, mean, var)

    key = jax.random.PRNGKey(0)
    for (B, Cin, Cout, H, W, stride) in [(2, 4, 8, 16, 16, 2),    # downsampling block
                                         (2, 4, 6, 16, 16, 1)]:   # channel-widening block
        key, *ks = jax.random.split(key, 7)
        x = jax.random.normal(ks[0], (B, Cin, H, W), jnp.float32)
        params = {
            'bn1': bn_params(ks[1], Cin),
            'w1': 0.1 * jax.random.normal(ks[2], (Cout, Cin, 3, 3), jnp.float32),
            'bn2': bn_params(ks[3], Cout),
            'w2': 0.1 * jax.random.normal(ks[4], (Cout, Cout, 3, 3), jnp.float32),
            'bn3': bn_params(ks[5], Cout),
        }
        out = jax.block_until_ready(basic_block_forward(x, params, stride))
        ref = reference_forward(x, params, stride)
        assert out.shape == ref.shape == (B, Cout, H // stride, W // stride), out.shape
        err = float(jnp.max(jnp.abs(out - ref)))
        assert jnp.allclose(out, ref, atol=2e-2, rtol=2e-2), err
    print("KERNEL_OK")
</pallas_src>

<mosaic_0001>
module attributes {stable_mosaic.version = 11 : i64} {
  func.func @_basic_block_kernel(%arg0: i32, %arg1: memref<4x2x8x8x8xf32, #tpu.memory_space<vmem>>, %arg2: memref<72x8xbf16, #tpu.memory_space<vmem>>, %arg3: memref<72x8xbf16, #tpu.memory_space<vmem>>, %arg4: memref<1x8xf32, #tpu.memory_space<vmem>>, %arg5: memref<1x8xf32, #tpu.memory_space<vmem>>, %arg6: memref<1x8xf32, #tpu.memory_space<vmem>>, %arg7: memref<1x8xf32, #tpu.memory_space<vmem>>, %arg8: memref<1x8xf32, #tpu.memory_space<vmem>>, %arg9: memref<1x8xf32, #tpu.memory_space<vmem>>, %arg10: memref<128x8xf32, #tpu.memory_space<vmem>>, %arg11: memref<4x2x10x10x8xf32, #tpu.memory_space<vmem>>, %arg12: memref<2x10x10x8xf32, #tpu.memory_space<vmem>>, %arg13: memref<128x72xbf16, #tpu.memory_space<vmem>>, %arg14: memref<128x72xbf16, #tpu.memory_space<vmem>>) attributes {dimension_semantics = [#tpu.dimension_semantics<parallel>], iteration_bounds = array<i64: 1>, scalar_prefetch = 0 : i64, scratch_operands = 4 : i64, tpu.core_type = #tpu.core_type<tc>, window_params = [{transform_indices = @transform_0, window_bounds = array<i64: 4, 2, 8, 8, 8>}, {pipeline_mode = #tpu.pipeline_mode<synchronous>, transform_indices = @transform_1, window_bounds = array<i64: 72, 8>}, {pipeline_mode = #tpu.pipeline_mode<synchronous>, transform_indices = @transform_2, window_bounds = array<i64: 72, 8>}, {pipeline_mode = #tpu.pipeline_mode<synchronous>, transform_indices = @transform_3, window_bounds = array<i64: 1, 8>}, {pipeline_mode = #tpu.pipeline_mode<synchronous>, transform_indices = @transform_4, window_bounds = array<i64: 1, 8>}, {pipeline_mode = #tpu.pipeline_mode<synchronous>, transform_indices = @transform_5, window_bounds = array<i64: 1, 8>}, {pipeline_mode = #tpu.pipeline_mode<synchronous>, transform_indices = @transform_6, window_bounds = array<i64: 1, 8>}, {pipeline_mode = #tpu.pipeline_mode<synchronous>, transform_indices = @transform_7, window_bounds = array<i64: 1, 8>}, {pipeline_mode = #tpu.pipeline_mode<synchronous>, transform_indices = @transform_8, window_bounds = array<i64: 1, 8>}, {transform_indices = @transform_9, window_bounds = array<i64: 128, 8>}]} {
    %cst = arith.constant 0.000000e+00 : f32
    %0 = vector.broadcast %cst : f32 to vector<2x1x10x8xf32>
    %cst_0 = arith.constant 0.000000e+00 : f32
    %1 = vector.broadcast %cst_0 : f32 to vector<2x10x1x8xf32>
    %c0 = arith.constant 0 : index
    %c0_1 = arith.constant 0 : index
    %c0_2 = arith.constant 0 : index
    %c0_3 = arith.constant 0 : index
    %c0_4 = arith.constant 0 : index
    %2 = vector.load %arg11[%c0, %c0_1, %c0_2, %c0_3, %c0_4] : memref<4x2x10x10x8xf32, #tpu.memory_space<vmem>>, vector<1x2x1x10x8xf32>
    %3 = vector.shape_cast %2 : vector<1x2x1x10x8xf32> to vector<2x1x10x8xf32>
    %4 = vector.shape_cast %0 : vector<2x1x10x8xf32> to vector<1x2x1x10x8xf32>
    tpu.vector_store %arg11[%c0, %c0_1, %c0_2, %c0_3, %c0_4], %4 {strides = array<i32>} : memref<4x2x10x10x8xf32, #tpu.memory_space<vmem>>, vector<1x2x1x10x8xf32>,
    %c0_5 = arith.constant 0 : index
    %c0_6 = arith.constant 0 : index
    %c0_7 = arith.constant 0 : index
    %c0_8 = arith.constant 0 : index
    %c0_9 = arith.constant 0 : index
    %5 = vector.load %arg11[%c0_5, %c0_6, %c0_7, %c0_8, %c0_9] : memref<4x2x10x10x8xf32, #tpu.memory_space<vmem>>, vector<1x2x10x1x8xf32>
    %6 = vector.shape_cast %5 : vector<1x2x10x1x8xf32> to vector<2x10x1x8xf32>
    %7 = vector.shape_cast %1 : vector<2x10x1x8xf32> to vector<1x2x10x1x8xf32>
    tpu.vector_store %arg11[%c0_5, %c0_6, %c0_7, %c0_8, %c0_9], %7 {strides = array<i32>} : memref<4x2x10x10x8xf32, #tpu.memory_space<vmem>>, vector<1x2x10x1x8xf32>,
    %c1 = arith.constant 1 : index
    %c0_10 = arith.constant 0 : index
    %c0_11 = arith.constant 0 : index
    %c0_12 = arith.constant 0 : index
    %c0_13 = arith.constant 0 : index
    %8 = vector.load %arg11[%c1, %c0_10, %c0_11, %c0_12, %c0_13] : memref<4x2x10x10x8xf32, #tpu.memory_space<vmem>>, vector<1x2x1x10x8xf32>
    %9 = vector.shape_cast %8 : vector<1x2x1x10x8xf32> to vector<2x1x10x8xf32>
    %10 = vector.shape_cast %0 : vector<2x1x10x8xf32> to vector<1x2x1x10x8xf32>
    tpu.vector_store %arg11[%c1, %c0_10, %c0_11, %c0_12, %c0_13], %10 {strides = array<i32>} : memref<4x2x10x10x8xf32, #tpu.memory_space<vmem>>, vector<1x2x1x10x8xf32>,
    %c1_14 = arith.constant 1 : index
    %c0_15 = arith.constant 0 : index
    %c0_16 = arith.constant 0 : index
    %c0_17 = arith.constant 0 : index
    %c0_18 = arith.constant 0 : index
    %11 = vector.load %arg11[%c1_14, %c0_15, %c0_16, %c0_17, %c0_18] : memref<4x2x10x10x8xf32, #tpu.memory_space<vmem>>, vector<1x2x10x1x8xf32>
    %12 = vector.shape_cast %11 : vector<1x2x10x1x8xf32> to vector<2x10x1x8xf32>
    %13 = vector.shape_cast %1 : vector<2x10x1x8xf32> to vector<1x2x10x1x8xf32>
    tpu.vector_store %arg11[%c1_14, %c0_15, %c0_16, %c0_17, %c0_18], %13 {strides = array<i32>} : memref<4x2x10x10x8xf32, #tpu.memory_space<vmem>>, vector<1x2x10x1x8xf32>,
    %c2 = arith.constant 2 : index
    %c0_19 = arith.constant 0 : index
    %c0_20 = arith.constant 0 : index
    %c0_21 = arith.constant 0 : index
    %c0_22 = arith.constant 0 : index
    %14 = vector.load %arg11[%c2, %c0_19, %c0_20, %c0_21, %c0_22] : memref<4x2x10x10x8xf32, #tpu.memory_space<vmem>>, vector<1x2x1x10x8xf32>
    %15 = vector.shape_cast %14 : vector<1x2x1x10x8xf32> to vector<2x1x10x8xf32>
    %16 = vector.shape_cast %0 : vector<2x1x10x8xf32> to vector<1x2x1x10x8xf32>
    tpu.vector_store %arg11[%c2, %c0_19, %c0_20, %c0_21, %c0_22], %16 {strides = array<i32>} : memref<4x2x10x10x8xf32, #tpu.memory_space<vmem>>, vector<1x2x1x10x8xf32>,
    %c2_23 = arith.constant 2 : index
    %c0_24 = arith.constant 0 : index
    %c0_25 = arith.constant 0 : index
    %c0_26 = arith.constant 0 : index
    %c0_27 = arith.constant 0 : index
    %17 = vector.load %arg11[%c2_23, %c0_24, %c0_25, %c0_26, %c0_27] : memref<4x2x10x10x8xf32, #tpu.memory_space<vmem>>, vector<1x2x10x1x8xf32>
    %18 = vector.shape_cast %17 : vector<1x2x10x1x8xf32> to vector<2x10x1x8xf32>
    %19 = vector.shape_cast %1 : vector<2x10x1x8xf32> to vector<1x2x10x1x8xf32>
    tpu.vector_store %arg11[%c2_23, %c0_24, %c0_25, %c0_26, %c0_27], %19 {strides = array<i32>} : memref<4x2x10x10x8xf32, #tpu.memory_space<vmem>>, vector<1x2x10x1x8xf32>,
    %c3 = arith.constant 3 : index
    %c0_28 = arith.constant 0 : index
    %c0_29 = arith.constant 0 : index
    %c0_30 = arith.constant 0 : index
    %c0_31 = arith.constant 0 : index
    %20 = vector.load %arg11[%c3, %c0_28, %c0_29, %c0_30, %c0_31] : memref<4x2x10x10x8xf32, #tpu.memory_space<vmem>>, vector<1x2x1x10x8xf32>
    %21 = vector.shape_cast %20 : vector<1x2x1x10x8xf32> to vector<2x1x10x8xf32>
    %22 = vector.shape_cast %0 : vector<2x1x10x8xf32> to vector<1x2x1x10x8xf32>
    tpu.vector_store %arg11[%c3, %c0_28, %c0_29, %c0_30, %c0_31], %22 {strides = array<i32>} : memref<4x2x10x10x8xf32, #tpu.memory_space<vmem>>, vector<1x2x1x10x8xf32>,
    %c3_32 = arith.constant 3 : index
    %c0_33 = arith.constant 0 : index
    %c0_34 = arith.constant 0 : index
    %c0_35 = arith.constant 0 : index
    %c0_36 = arith.constant 0 : index
    %23 = vector.load %arg11[%c3_32, %c0_33, %c0_34, %c0_35, %c0_36] : memref<4x2x10x10x8xf32, #tpu.memory_space<vmem>>, vector<1x2x10x1x8xf32>
    %24 = vector.shape_cast %23 : vector<1x2x10x1x8xf32> to vector<2x10x1x8xf32>
    %25 = vector.shape_cast %1 : vector<2x10x1x8xf32> to vector<1x2x10x1x8xf32>
    tpu.vector_store %arg11[%c3_32, %c0_33, %c0_34, %c0_35, %c0_36], %25 {strides = array<i32>} : memref<4x2x10x10x8xf32, #tpu.memory_space<vmem>>, vector<1x2x10x1x8xf32>,
    %c0_37 = arith.constant 0 : index
    %c0_38 = arith.constant 0 : index
    %c0_39 = arith.constant 0 : index
    %c0_40 = arith.constant 0 : index
    %26 = vector.load %arg12[%c0_37, %c0_38, %c0_39, %c0_40] : memref<2x10x10x8xf32, #tpu.memory_space<vmem>>, vector<2x1x10x8xf32>
    tpu.vector_store %arg12[%c0_37, %c0_38, %c0_39, %c0_40], %0 {strides = array<i32>} : memref<2x10x10x8xf32, #tpu.memory_space<vmem>>, vector<2x1x10x8xf32>,
    %c0_41 = arith.constant 0 : index
    %c9 = arith.constant 9 : index
    %c0_42 = arith.constant 0 : index
    %c0_43 = arith.constant 0 : index
    %27 = vector.load %arg12[%c0_41, %c9, %c0_42, %c0_43] : memref<2x10x10x8xf32, #tpu.memory_space<vmem>>, vector<2x1x10x8xf32>
    tpu.vector_store %arg12[%c0_41, %c9, %c0_42, %c0_43], %0 {strides = array<i32>} : memref<2x10x10x8xf32, #tpu.memory_space<vmem>>, vector<2x1x10x8xf32>,
    %c0_44 = arith.constant 0 : index
    %c0_45 = arith.constant 0 : index
    %c0_46 = arith.constant 0 : index
    %c0_47 = arith.constant 0 : index
    %28 = vector.load %arg12[%c0_44, %c0_45, %c0_46, %c0_47] : memref<2x10x10x8xf32, #tpu.memory_space<vmem>>, vector<2x10x1x8xf32>
    tpu.vector_store %arg12[%c0_44, %c0_45, %c0_46, %c0_47], %1 {strides = array<i32>} : memref<2x10x10x8xf32, #tpu.memory_space<vmem>>, vector<2x10x1x8xf32>,
    %c0_48 = arith.constant 0 : index
    %c0_49 = arith.constant 0 : index
    %c9_50 = arith.constant 9 : index
    %c0_51 = arith.constant 0 : index
    %29 = vector.load %arg12[%c0_48, %c0_49, %c9_50, %c0_51] : memref<2x10x10x8xf32, #tpu.memory_space<vmem>>, vector<2x10x1x8xf32>
    tpu.vector_store %arg12[%c0_48, %c0_49, %c9_50, %c0_51], %1 {strides = array<i32>} : memref<2x10x10x8xf32, #tpu.memory_space<vmem>>, vector<2x10x1x8xf32>,
    %c0_52 = arith.constant 0 : index
    %c0_53 = arith.constant 0 : index
    %30 = vector.load %arg4[%c0_52, %c0_53] : memref<1x8xf32, #tpu.memory_space<vmem>>, vector<1x8xf32>
    %c0_54 = arith.constant 0 : index
    %c0_55 = arith.constant 0 : index
    %31 = vector.load %arg5[%c0_54, %c0_55] : memref<1x8xf32, #tpu.memory_space<vmem>>, vector<1x8xf32>
    %c0_56 = arith.constant 0 : index
    %c0_57 = arith.constant 0 : index
    %c0_58 = arith.constant 0 : index
    %c0_59 = arith.constant 0 : index
    %c0_60 = arith.constant 0 : index
    %32 = vector.load %arg1[%c0_56, %c0_57, %c0_58, %c0_59, %c0_60] : memref<4x2x8x8x8xf32, #tpu.memory_space<vmem>>, vector<1x2x8x8x8xf32>
    %33 = vector.shape_cast %32 : vector<1x2x8x8x8xf32> to vector<2x8x8x8xf32>
    %34 = vector.shape_cast %30 : vector<1x8xf32> to vector<1x1x1x8xf32>
    %35 = vector.broadcast %34 : vector<1x1x1x8xf32> to vector<2x8x8x8xf32>
    %36 = arith.mulf %33, %35 : vector<2x8x8x8xf32>
    %37 = vector.shape_cast %31 : vector<1x8xf32> to vector<1x1x1x8xf32>
    %38 = vector.broadcast %37 : vector<1x1x1x8xf32> to vector<2x8x8x8xf32>
    %39 = arith.addf %36, %38 : vector<2x8x8x8xf32>
    %c0_61 = arith.constant 0 : index
    %c0_62 = arith.constant 0 : index
    %c1_63 = arith.constant 1 : index
    %c1_64 = arith.constant 1 : index
    %c0_65 = arith.constant 0 : index
    %40 = vector.load %arg11[%c0_61, %c0_62, %c1_63, %c1_64, %c0_65] : memref<4x2x10x10x8xf32, #tpu.memory_space<vmem>>, vector<1x2x8x8x8xf32>
    %41 = vector.shape_cast %40 : vector<1x2x8x8x8xf32> to vector<2x8x8x8xf32>
    %42 = vector.shape_cast %39 : vector<2x8x8x8xf32> to vector<1x2x8x8x8xf32>
    tpu.vector_store %arg11[%c0_61, %c0_62, %c1_63, %c1_64, %c0_65], %42 {strides = array<i32>} : memref<4x2x10x10x8xf32, #tpu.memory_space<vmem>>, vector<1x2x8x8x8xf32>,
    %c1_66 = arith.constant 1 : index
    %c0_67 = arith.constant 0 : index
    %c0_68 = arith.constant 0 : index
    %c0_69 = arith.constant 0 : index
    %c0_70 = arith.constant 0 : index
    %43 = vector.load %arg1[%c1_66, %c0_67, %c0_68, %c0_69, %c0_70] : memref<4x2x8x8x8xf32, #tpu.memory_space<vmem>>, vector<1x2x8x8x8xf32>
    %44 = vector.shape_cast %43 : vector<1x2x8x8x8xf32> to vector<2x8x8x8xf32>
    %45 = arith.addf %33, %44 : vector<2x8x8x8xf32>
    %46 = vector.shape_cast %30 : vector<1x8xf32> to vector<1x1x1x8xf32>
    %47 = vector.broadcast %46 : vector<1x1x1x8xf32> to vector<2x8x8x8xf32>
    %48 = arith.mulf %44, %47 : vector<2x8x8x8xf32>
    %49 = vector.shape_cast %31 : vector<1x8xf32> to vector<1x1x1x8xf32>
    %50 = vector.broadcast %49 : vector<1x1x1x8xf32> to vector<2x8x8x8xf32>
    %51 = arith.addf %48, %50 : vector<2x8x8x8xf32>
    %c1_71 = arith.constant 1 : index
    %c0_72 = arith.constant 0 : index
    %c1_73 = arith.constant 1 : index
    %c1_74 = arith.constant 1 : index
    %c0_75 = arith.constant 0 : index
    %52 = vector.load %arg11[%c1_71, %c0_72, %c1_73, %c1_74, %c0_75] : memref<4x2x10x10x8xf32, #tpu.memory_space<vmem>>, vector<1x2x8x8x8xf32>
    %53 = vector.shape_cast %52 : vector<1x2x8x8x8xf32> to vector<2x8x8x8xf32>
    %54 = vector.shape_cast %51 : vector<2x8x8x8xf32> to vector<1x2x8x8x8xf32>
    tpu.vector_store %arg11[%c1_71, %c0_72, %c1_73, %c1_74, %c0_75], %54 {strides = array<i32>} : memref<4x2x10x10x8xf32, #tpu.memory_space<vmem>>, vector<1x2x8x8x8xf32>,
    %c2_76 = arith.constant 2 : index
    %c0_77 = arith.constant 0 : index
    %c0_78 = arith.constant 0 : index
    %c0_79 = arith.constant 0 : index
    %c0_80 = arith.constant 0 : index
    %55 = vector.load %arg1[%c2_76, %c0_77, %c0_78, %c0_79, %c0_80] : memref<4x2x8x8x8xf32, #tpu.memory_space<vmem>>, vector<1x2x8x8x8xf32>
    %56 = vector.shape_cast %55 : vector<1x2x8x8x8xf32> to vector<2x8x8x8xf32>
    %57 = arith.addf %45, %56 : vector<2x8x8x8xf32>
    %58 = vector.shape_cast %30 : vector<1x8xf32> to vector<1x1x1x8xf32>
    %59 = vector.broadcast %58 : vector<1x1x1x8xf32> to vector<2x8x8x8xf32>
    %60 = arith.mulf %56, %59 : vector<2x8x8x8xf32>
    %61 = vector.shape_cast %31 : vector<1x8xf32> to vector<1x1x1x8xf32>
    %62 = vector.broadcast %61 : vector<1x1x1x8xf32> to vector<2x8x8x8xf32>
    %63 = arith.addf %60, %62 : vector<2x8x8x8xf32>
    %c2_81 = arith.constant 2 : index
    %c0_82 = arith.constant 0 : index
    %c1_83 = arith.constant 1 : index
    %c1_84 = arith.constant 1 : index
    %c0_85 = arith.constant 0 : index
    %64 = vector.load %arg11[%c2_81, %c0_82, %c1_83, %c1_84, %c0_85] : memref<4x2x10x10x8xf32, #tpu.memory_space<vmem>>, vector<1x2x8x8x8xf32>
    %65 = vector.shape_cast %64 : vector<1x2x8x8x8xf32> to vector<2x8x8x8xf32>
    %66 = vector.shape_cast %63 : vector<2x8x8x8xf32> to vector<1x2x8x8x8xf32>
    tpu.vector_store %arg11[%c2_81, %c0_82, %c1_83, %c1_84, %c0_85], %66 {strides = array<i32>} : memref<4x2x10x10x8xf32, #tpu.memory_space<vmem>>, vector<1x2x8x8x8xf32>,
    %c3_86 = arith.constant 3 : index
    %c0_87 = arith.constant 0 : index
    %c0_88 = arith.constant 0 : index
    %c0_89 = arith.constant 0 : index
    %c0_90 = arith.constant 0 : index
    %67 = vector.load %arg1[%c3_86, %c0_87, %c0_88, %c0_89, %c0_90] : memref<4x2x8x8x8xf32, #tpu.memory_space<vmem>>, vector<1x2x8x8x8xf32>
    %68 = vector.shape_cast %67 : vector<1x2x8x8x8xf32> to vector<2x8x8x8xf32>
    %69 = arith.addf %57, %68 : vector<2x8x8x8xf32>
    %70 = vector.shape_cast %30 : vector<1x8xf32> to vector<1x1x1x8xf32>
    %71 = vector.broadcast %70 : vector<1x1x1x8xf32> to vector<2x8x8x8xf32>
    %72 = arith.mulf %68, %71 : vector<2x8x8x8xf32>
    %73 = vector.shape_cast %31 : vector<1x8xf32> to vector<1x1x1x8xf32>
    %74 = vector.broadcast %73 : vector<1x1x1x8xf32> to vector<2x8x8x8xf32>
    %75 = arith.addf %72, %74 : vector<2x8x8x8xf32>
    %c3_91 = arith.constant 3 : index
    %c0_92 = arith.constant 0 : index
    %c1_93 = arith.constant 1 : index
    %c1_94 = arith.constant 1 : index
    %c0_95 = arith.constant 0 : index
    %76 = vector.load %arg11[%c3_91, %c0_92, %c1_93, %c1_94, %c0_95] : memref<4x2x10x10x8xf32, #tpu.memory_space<vmem>>, vector<1x2x8x8x8xf32>
    %77 = vector.shape_cast %76 : vector<1x2x8x8x8xf32> to vector<2x8x8x8xf32>
    %78 = vector.shape_cast %75 : vector<2x8x8x8xf32> to vector<1x2x8x8x8xf32>
    tpu.vector_store %arg11[%c3_91, %c0_92, %c1_93, %c1_94, %c0_95], %78 {strides = array<i32>} : memref<4x2x10x10x8xf32, #tpu.memory_space<vmem>>, vector<1x2x8x8x8xf32>,
    %cst_96 = arith.constant 2.500000e-01 : f32
    %79 = vector.broadcast %cst_96 : f32 to vector<2x8x8x8xf32>
    %80 = arith.mulf %69, %79 : vector<2x8x8x8xf32>
    %c3_97 = arith.constant 3 : index
    %c0_98 = arith.constant 0 : index
    %c0_99 = arith.constant 0 : index
    %c0_100 = arith.constant 0 : index
    %c0_101 = arith.constant 0 : index
    %81 = vector.load %arg11[%c3_97, %c0_98, %c0_99, %c0_100, %c0_101] : memref<4x2x10x10x8xf32, #tpu.memory_space<vmem>>, vector<1x2x8x8x8xf32>
    %82 = vector.shape_cast %81 : vector<1x2x8x8x8xf32> to vector<2x8x8x8xf32>
    %83 = vector.shape_cast %82 : vector<2x8x8x8xf32> to vector<128x8xf32>
    %84 = arith.truncf %83 : vector<128x8xf32> to vector<128x8xbf16>
    %c0_102 = arith.constant 0 : index
    %c0_103 = arith.constant 0 : index
    %85 = vector.load %arg13[%c0_102, %c0_103] : memref<128x72xbf16, #tpu.memory_space<vmem>>, vector<128x8xbf16>
    tpu.vector_store %arg13[%c0_102, %c0_103], %84 {strides = array<i32>} : memref<128x72xbf16, #tpu.memory_space<vmem>>, vector<128x8xbf16>,
    %c2_104 = arith.constant 2 : index
    %c0_105 = arith.constant 0 : index
    %c0_106 = arith.constant 0 : index
    %c1_107 = arith.constant 1 : index
    %c0_108 = arith.constant 0 : index
    %86 = vector.load %arg11[%c2_104, %c0_105, %c0_106, %c1_107, %c0_108] : memref<4x2x10x10x8xf32, #tpu.memory_space<vmem>>, vector<1x2x8x8x8xf32>
    %87 = vector.shape_cast %86 : vector<1x2x8x8x8xf32> to vector<2x8x8x8xf32>
    %88 = vector.shape_cast %87 : vector<2x8x8x8xf32> to vector<128x8xf32>
    %89 = arith.truncf %88 : vector<128x8xf32> to vector<128x8xbf16>
    %c0_109 = arith.constant 0 : index
    %c8 = arith.constant 8 : index
    %90 = vector.load %arg13[%c0_109, %c8] : memref<128x72xbf16, #tpu.memory_space<vmem>>, vector<128x8xbf16>
    tpu.vector_store %arg13[%c0_109, %c8], %89 {strides = array<i32>} : memref<128x72xbf16, #tpu.memory_space<vmem>>, vector<128x8xbf16>,
    %c3_110 = arith.constant 3 : index
    %c0_111 = arith.constant 0 : index
    %c0_112 = arith.constant 0 : index
    %c1_113 = arith.constant 1 : index
    %c0_114 = arith.constant 0 : index
    %91 = vector.load %arg11[%c3_110, %c0_111, %c0_112, %c1_113, %c0_114] : memref<4x2x10x10x8xf32, #tpu.memory_space<vmem>>, vector<1x2x8x8x8xf32>
    %92 = vector.shape_cast %91 : vector<1x2x8x8x8xf32> to vector<2x8x8x8xf32>
    %93 = vector.shape_cast %92 : vector<2x8x8x8xf32> to vector<128x8xf32>
    %94 = arith.truncf %93 : vector<128x8xf32> to vector<128x8xbf16>
    %c0_115 = arith.constant 0 : index
    %c16 = arith.constant 16 : index
    %95 = vector.load %arg13[%c0_115, %c16] : memref<128x72xbf16, #tpu.memory_space<vmem>>, vector<128x8xbf16>
    tpu.vector_store %arg13[%c0_115, %c16], %94 {strides = array<i32>} : memref<128x72xbf16, #tpu.memory_space<vmem>>, vector<128x8xbf16>,
    %c1_116 = arith.constant 1 : index
    %c0_117 = arith.constant 0 : index
    %c1_118 = arith.constant 1 : index
    %c0_119 = arith.constant 0 : index
    %c0_120 = arith.constant 0 : index
    %96 = vector.load %arg11[%c1_116, %c0_117, %c1_118, %c0_119, %c0_120] : memref<4x2x10x10x8xf32, #tpu.memory_space<vmem>>, vector<1x2x8x8x8xf32>
    %97 = vector.shape_cast %96 : vector<1x2x8x8x8xf32> to vector<2x8x8x8xf32>
    %98 = vector.shape_cast %97 : vector<2x8x8x8xf32> to vector<128x8xf32>
    %99 = arith.truncf %98 : vector<128x8xf32> to vector<128x8xbf16>
    %c0_121 = arith.constant 0 : index
    %c24 = arith.constant 24 : index
    %100 = vector.load %arg13[%c0_121, %c24] : memref<128x72xbf16, #tpu.memory_space<vmem>>, vector<128x8xbf16>
    tpu.vector_store %arg13[%c0_121, %c24], %99 {strides = array<i32>} : memref<128x72xbf16, #tpu.memory_space<vmem>>, vector<128x8xbf16>,
    %c0_122 = arith.constant 0 : index
    %c0_123 = arith.constant 0 : index
    %c1_124 = arith.constant 1 : index
    %c1_125 = arith.constant 1 : index
    %c0_126 = arith.constant 0 : index
    %101 = vector.load %arg11[%c0_122, %c0_123, %c1_124, %c1_125, %c0_126] : memref<4x2x10x10x8xf32, #tpu.memory_space<vmem>>, vector<1x2x8x8x8xf32>
    %102 = vector.shape_cast %101 : vector<1x2x8x8x8xf32> to vector<2x8x8x8xf32>
    %103 = vector.shape_cast %102 : vector<2x8x8x8xf32> to vector<128x8xf32>
    %104 = arith.truncf %103 : vector<128x8xf32> to vector<128x8xbf16>
    %c0_127 = arith.constant 0 : index
    %c32 = arith.constant 32 : index
    %105 = vector.load %arg13[%c0_127, %c32] : memref<128x72xbf16, #tpu.memory_space<vmem>>, vector<128x8xbf16>
    tpu.vector_store %arg13[%c0_127, %c32], %104 {strides = array<i32>} : memref<128x72xbf16, #tpu.memory_space<vmem>>, vector<128x8xbf16>,
    %c1_128 = arith.constant 1 : index
    %c0_129 = arith.constant 0 : index
    %c1_130 = arith.constant 1 : index
    %c1_131 = arith.constant 1 : index
    %c0_132 = arith.constant 0 : index
    %106 = vector.load %arg11[%c1_128, %c0_129, %c1_130, %c1_131, %c0_132] : memref<4x2x10x10x8xf32, #tpu.memory_space<vmem>>, vector<1x2x8x8x8xf32>
    %107 = vector.shape_cast %106 : vector<1x2x8x8x8xf32> to vector<2x8x8x8xf32>
    %108 = vector.shape_cast %107 : vector<2x8x8x8xf32> to vector<128x8xf32>
    %109 = arith.truncf %108 : vector<128x8xf32> to vector<128x8xbf16>
    %c0_133 = arith.constant 0 : index
    %c40 = arith.constant 40 : index
    %110 = vector.load %arg13[%c0_133, %c40] : memref<128x72xbf16, #tpu.memory_space<vmem>>, vector<128x8xbf16>
    tpu.vector_store %arg13[%c0_133, %c40], %109 {strides = array<i32>} : memref<128x72xbf16, #tpu.memory_space<vmem>>, vector<128x8xbf16>,
    %c3_134 = arith.constant 3 : index
    %c0_135 = arith.constant 0 : index
    %c1_136 = arith.constant 1 : index
    %c0_137 = arith.constant 0 : index
    %c0_138 = arith.constant 0 : index
    %111 = vector.load %arg11[%c3_134, %c0_135, %c1_136, %c0_137, %c0_138] : memref<4x2x10x10x8xf32, #tpu.memory_space<vmem>>, vector<1x2x8x8x8xf32>
    %112 = vector.shape_cast %111 : vector<1x2x8x8x8xf32> to vector<2x8x8x8xf32>
    %113 = vector.shape_cast %112 : vector<2x8x8x8xf32> to vector<128x8xf32>
    %114 = arith.truncf %113 : vector<128x8xf32> to vector<128x8xbf16>
    %c0_139 = arith.constant 0 : index
    %c48 = arith.constant 48 : index
    %115 = vector.load %arg13[%c0_139, %c48] : memref<128x72xbf16, #tpu.memory_space<vmem>>, vector<128x8xbf16>
    tpu.vector_store %arg13[%c0_139, %c48], %114 {strides = array<i32>} : memref<128x72xbf16, #tpu.memory_space<vmem>>, vector<128x8xbf16>,
    %c2_140 = arith.constant 2 : index
    %c0_141 = arith.constant 0 : index
    %c1_142 = arith.constant 1 : index
    %c1_143 = arith.constant 1 : index
    %c0_144 = arith.constant 0 : index
    %116 = vector.load %arg11[%c2_140, %c0_141, %c1_142, %c1_143, %c0_144] : memref<4x2x10x10x8xf32, #tpu.memory_space<vmem>>, vector<1x2x8x8x8xf32>
    %117 = vector.shape_cast %116 : vector<1x2x8x8x8xf32> to vector<2x8x8x8xf32>
    %118 = vector.shape_cast %117 : vector<2x8x8x8xf32> to vector<128x8xf32>
    %119 = arith.truncf %118 : vector<128x8xf32> to vector<128x8xbf16>
    %c0_145 = arith.constant 0 : index
    %c56 = arith.constant 56 : index
    %120 = vector.load %arg13[%c0_145, %c56] : memref<128x72xbf16, #tpu.memory_space<vmem>>, vector<128x8xbf16>
    tpu.vector_store %arg13[%c0_145, %c56], %119 {strides = array<i32>} : memref<128x72xbf16, #tpu.memory_space<vmem>>, vector<128x8xbf16>,
    %c3_146 = arith.constant 3 : index
    %c0_147 = arith.constant 0 : index
    %c1_148 = arith.constant 1 : index
    %c1_149 = arith.constant 1 : index
    %c0_150 = arith.constant 0 : index
    %121 = vector.load %arg11[%c3_146, %c0_147, %c1_148, %c1_149, %c0_150] : memref<4x2x10x10x8xf32, #tpu.memory_space<vmem>>, vector<1x2x8x8x8xf32>
    %122 = vector.shape_cast %121 : vector<1x2x8x8x8xf32> to vector<2x8x8x8xf32>
    %123 = vector.shape_cast %122 : vector<2x8x8x8xf32> to vector<128x8xf32>
    %124 = arith.truncf %123 : vector<128x8xf32> to vector<128x8xbf16>
    %c0_151 = arith.constant 0 : index
    %c64 = arith.constant 64 : index
    %125 = vector.load %arg13[%c0_151, %c64] : memref<128x72xbf16, #tpu.memory_space<vmem>>, vector<128x8xbf16>
    tpu.vector_store %arg13[%c0_151, %c64], %124 {strides = array<i32>} : memref<128x72xbf16, #tpu.memory_space<vmem>>, vector<128x8xbf16>,
    %c0_152 = arith.constant 0 : index
    %c0_153 = arith.constant 0 : index
    %126 = vector.load %arg13[%c0_152, %c0_153] : memref<128x72xbf16, #tpu.memory_space<vmem>>, vector<128x72xbf16>
    %c0_154 = arith.constant 0 : index
    %c0_155 = arith.constant 0 : index
    %127 = vector.load %arg2[%c0_154, %c0_155] : memref<72x8xbf16, #tpu.memory_space<vmem>>, vector<72x8xbf16>
    %cst_156 = arith.constant dense<0.000000e+00> : vector<128x8xf32>
    %128 = tpu.matmul %126, %127, %cst_156 {dimension_numbers = #tpu.dot_dimension_numbers<[1], [0], [0], [1], [0, 0, 1, 1], [], []>} : vector<128x72xbf16>, vector<72x8xbf16>, vector<128x8xf32> -> vector<128x8xf32>
    %c0_157 = arith.constant 0 : index
    %c0_158 = arith.constant 0 : index
    %129 = vector.load %arg6[%c0_157, %c0_158] : memref<1x8xf32, #tpu.memory_space<vmem>>, vector<1x8xf32>
    %130 = vector.broadcast %129 : vector<1x8xf32> to vector<128x8xf32>
    %131 = arith.mulf %128, %130 : vector<128x8xf32>
    %c0_159 = arith.constant 0 : index
    %c0_160 = arith.constant 0 : index
    %132 = vector.load %arg7[%c0_159, %c0_160] : memref<1x8xf32, #tpu.memory_space<vmem>>, vector<1x8xf32>
    %133 = vector.broadcast %132 : vector<1x8xf32> to vector<128x8xf32>
    %134 = arith.addf %131, %133 : vector<128x8xf32>
    %cst_161 = arith.constant 0.000000e+00 : f32
    %135 = vector.broadcast %cst_161 : f32 to vector<128x8xf32>
    %136 = arith.maximumf %134, %135 : vector<128x8xf32>
    %137 = vector.shape_cast %136 : vector<128x8xf32> to vector<2x8x8x8xf32>
    %c0_162 = arith.constant 0 : index
    %c1_163 = arith.constant 1 : index
    %c1_164 = arith.constant 1 : index
    %c0_165 = arith.constant 0 : index
    %138 = vector.load %arg12[%c0_162, %c1_163, %c1_164, %c0_165] : memref<2x10x10x8xf32, #tpu.memory_space<vmem>>, vector<2x8x8x8xf32>
    tpu.vector_store %arg12[%c0_162, %c1_163, %c1_164, %c0_165], %137 {strides = array<i32>} : memref<2x10x10x8xf32, #tpu.memory_space<vmem>>, vector<2x8x8x8xf32>,
    %c0_166 = arith.constant 0 : index
    %c0_167 = arith.constant 0 : index
    %c0_168 = arith.constant 0 : index
    %c0_169 = arith.constant 0 : index
    %139 = vector.load %arg12[%c0_166, %c0_167, %c0_168, %c0_169] : memref<2x10x10x8xf32, #tpu.memory_space<vmem>>, vector<2x8x8x8xf32>
    %140 = vector.shape_cast %139 : vector<2x8x8x8xf32> to vector<128x8xf32>
    %141 = arith.truncf %140 : vector<128x8xf32> to vector<128x8xbf16>
    %c0_170 = arith.constant 0 : index
    %c0_171 = arith.constant 0 : index
    %142 = vector.load %arg14[%c0_170, %c0_171] : memref<128x72xbf16, #tpu.memory_space<vmem>>, vector<128x8xbf16>
    tpu.vector_store %arg14[%c0_170, %c0_171], %141 {strides = array<i32>} : memref<128x72xbf16, #tpu.memory_space<vmem>>, vector<128x8xbf16>,
    %c0_172 = arith.constant 0 : index
    %c0_173 = arith.constant 0 : index
    %c1_174 = arith.constant 1 : index
    %c0_175 = arith.constant 0 : index
    %143 = vector.load %arg12[%c0_172, %c0_173, %c1_174, %c0_175] : memref<2x10x10x8xf32, #tpu.memory_space<vmem>>, vector<2x8x8x8xf32>
    %144 = vector.shape_cast %143 : vector<2x8x8x8xf32> to vector<128x8xf32>
    %145 = arith.truncf %144 : vector<128x8xf32> to vector<128x8xbf16>
    %c0_176 = arith.constant 0 : index
    %c8_177 = arith.constant 8 : index
    %146 = vector.load %arg14[%c0_176, %c8_177] : memref<128x72xbf16, #tpu.memory_space<vmem>>, vector<128x8xbf16>
    tpu.vector_store %arg14[%c0_176, %c8_177], %145 {strides = array<i32>} : memref<128x72xbf16, #tpu.memory_space<vmem>>, vector<128x8xbf16>,
    %c0_178 = arith.constant 0 : index
    %c0_179 = arith.constant 0 : index
    %c2_180 = arith.constant 2 : index
    %c0_181 = arith.constant 0 : index
    %147 = vector.load %arg12[%c0_178, %c0_179, %c2_180, %c0_181] : memref<2x10x10x8xf32, #tpu.memory_space<vmem>>, vector<2x8x8x8xf32>
    %148 = vector.shape_cast %147 : vector<2x8x8x8xf32> to vector<128x8xf32>
    %149 = arith.truncf %148 : vector<128x8xf32> to vector<128x8xbf16>
    %c0_182 = arith.constant 0 : index
    %c16_183 = arith.constant 16 : index
    %150 = vector.load %arg14[%c0_182, %c16_183] : memref<128x72xbf16, #tpu.memory_space<vmem>>, vector<128x8xbf16>
    tpu.vector_store %arg14[%c0_182, %c16_183], %149 {strides = array<i32>} : memref<128x72xbf16, #tpu.memory_space<vmem>>, vector<128x8xbf16>,
    %c0_184 = arith.constant 0 : index
    %c1_185 = arith.constant 1 : index
    %c0_186 = arith.constant 0 : index
    %c0_187 = arith.constant 0 : index
    %151 = vector.load %arg12[%c0_184, %c1_185, %c0_186, %c0_187] : memref<2x10x10x8xf32, #tpu.memory_space<vmem>>, vector<2x8x8x8xf32>
    %152 = vector.shape_cast %151 : vector<2x8x8x8xf32> to vector<128x8xf32>
    %153 = arith.truncf %152 : vector<128x8xf32> to vector<128x8xbf16>
    %c0_188 = arith.constant 0 : index
    %c24_189 = arith.constant 24 : index
    %154 = vector.load %arg14[%c0_188, %c24_189] : memref<128x72xbf16, #tpu.memory_space<vmem>>, vector<128x8xbf16>
    tpu.vector_store %arg14[%c0_188, %c24_189], %153 {strides = array<i32>} : memref<128x72xbf16, #tpu.memory_space<vmem>>, vector<128x8xbf16>,
    %c0_190 = arith.constant 0 : index
    %c1_191 = arith.constant 1 : index
    %c1_192 = arith.constant 1 : index
    %c0_193 = arith.constant 0 : index
    %155 = vector.load %arg12[%c0_190, %c1_191, %c1_192, %c0_193] : memref<2x10x10x8xf32, #tpu.memory_space<vmem>>, vector<2x8x8x8xf32>
    %156 = vector.shape_cast %155 : vector<2x8x8x8xf32> to vector<128x8xf32>
    %157 = arith.truncf %156 : vector<128x8xf32> to vector<128x8xbf16>
    %c0_194 = arith.constant 0 : index
    %c32_195 = arith.constant 32 : index
    %158 = vector.load %arg14[%c0_194, %c32_195] : memref<128x72xbf16, #tpu.memory_space<vmem>>, vector<128x8xbf16>
    tpu.vector_store %arg14[%c0_194, %c32_195], %157 {strides = array<i32>} : memref<128x72xbf16, #tpu.memory_space<vmem>>, vector<128x8xbf16>,
    %c0_196 = arith.constant 0 : index
    %c1_197 = arith.constant 1 : index
    %c2_198 = arith.constant 2 : index
    %c0_199 = arith.constant 0 : index
    %159 = vector.load %arg12[%c0_196, %c1_197, %c2_198, %c0_199] : memref<2x10x10x8xf32, #tpu.memory_space<vmem>>, vector<2x8x8x8xf32>
    %160 = vector.shape_cast %159 : vector<2x8x8x8xf32> to vector<128x8xf32>
    %161 = arith.truncf %160 : vector<128x8xf32> to vector<128x8xbf16>
    %c0_200 = arith.constant 0 : index
    %c40_201 = arith.constant 40 : index
    %162 = vector.load %arg14[%c0_200, %c40_201] : memref<128x72xbf16, #tpu.memory_space<vmem>>, vector<128x8xbf16>
    tpu.vector_store %arg14[%c0_200, %c40_201], %161 {strides = array<i32>} : memref<128x72xbf16, #tpu.memory_space<vmem>>, vector<128x8xbf16>,
    %c0_202 = arith.constant 0 : index
    %c2_203 = arith.constant 2 : index
    %c0_204 = arith.constant 0 : index
    %c0_205 = arith.constant 0 : index
    %163 = vector.load %arg12[%c0_202, %c2_203, %c0_204, %c0_205] : memref<2x10x10x8xf32, #tpu.memory_space<vmem>>, vector<2x8x8x8xf32>
    %164 = vector.shape_cast %163 : vector<2x8x8x8xf32> to vector<128x8xf32>
    %165 = arith.truncf %164 : vector<128x8xf32> to vector<128x8xbf16>
    %c0_206 = arith.constant 0 : index
    %c48_207 = arith.constant 48 : index
    %166 = vector.load %arg14[%c0_206, %c48_207] : memref<128x72xbf16, #tpu.memory_space<vmem>>, vector<128x8xbf16>
    tpu.vector_store %arg14[%c0_206, %c48_207], %165 {strides = array<i32>} : memref<128x72xbf16, #tpu.memory_space<vmem>>, vector<128x8xbf16>,
    %c0_208 = arith.constant 0 : index
    %c2_209 = arith.constant 2 : index
    %c1_210 = arith.constant 1 : index
    %c0_211 = arith.constant 0 : index
    %167 = vector.load %arg12[%c0_208, %c2_209, %c1_210, %c0_211] : memref<2x10x10x8xf32, #tpu.memory_space<vmem>>, vector<2x8x8x8xf32>
    %168 = vector.shape_cast %167 : vector<2x8x8x8xf32> to vector<128x8xf32>
    %169 = arith.truncf %168 : vector<128x8xf32> to vector<128x8xbf16>
    %c0_212 = arith.constant 0 : index
    %c56_213 = arith.constant 56 : index
    %170 = vector.load %arg14[%c0_212, %c56_213] : memref<128x72xbf16, #tpu.memory_space<vmem>>, vector<128x8xbf16>
    tpu.vector_store %arg14[%c0_212, %c56_213], %169 {strides = array<i32>} : memref<128x72xbf16, #tpu.memory_space<vmem>>, vector<128x8xbf16>,
    %c0_214 = arith.constant 0 : index
    %c2_215 = arith.constant 2 : index
    %c2_216 = arith.constant 2 : index
    %c0_217 = arith.constant 0 : index
    %171 = vector.load %arg12[%c0_214, %c2_215, %c2_216, %c0_217] : memref<2x10x10x8xf32, #tpu.memory_space<vmem>>, vector<2x8x8x8xf32>
    %172 = vector.shape_cast %171 : vector<2x8x8x8xf32> to vector<128x8xf32>
    %173 = arith.truncf %172 : vector<128x8xf32> to vector<128x8xbf16>
    %c0_218 = arith.constant 0 : index
    %c64_219 = arith.constant 64 : index
    %174 = vector.load %arg14[%c0_218, %c64_219] : memref<128x72xbf16, #tpu.memory_space<vmem>>, vector<128x8xbf16>
    tpu.vector_store %arg14[%c0_218, %c64_219], %173 {strides = array<i32>} : memref<128x72xbf16, #tpu.memory_space<vmem>>, vector<128x8xbf16>,
    %c0_220 = arith.constant 0 : index
    %c0_221 = arith.constant 0 : index
    %175 = vector.load %arg14[%c0_220, %c0_221] : memref<128x72xbf16, #tpu.memory_space<vmem>>, vector<128x72xbf16>
    %c0_222 = arith.constant 0 : index
    %c0_223 = arith.constant 0 : index
    %176 = vector.load %arg3[%c0_222, %c0_223] : memref<72x8xbf16, #tpu.memory_space<vmem>>, vector<72x8xbf16>
    %cst_224 = arith.constant dense<0.000000e+00> : vector<128x8xf32>
    %177 = tpu.matmul %175, %176, %cst_224 {dimension_numbers = #tpu.dot_dimension_numbers<[1], [0], [0], [1], [0, 0, 1, 1], [], []>} : vector<128x72xbf16>, vector<72x8xbf16>, vector<128x8xf32> -> vector<128x8xf32>
    %c0_225 = arith.constant 0 : index
    %c0_226 = arith.constant 0 : index
    %178 = vector.load %arg8[%c0_225, %c0_226] : memref<1x8xf32, #tpu.memory_space<vmem>>, vector<1x8xf32>
    %179 = vector.broadcast %178 : vector<1x8xf32> to vector<128x8xf32>
    %180 = arith.mulf %177, %179 : vector<128x8xf32>
    %c0_227 = arith.constant 0 : index
    %c0_228 = arith.constant 0 : index
    %181 = vector.load %arg9[%c0_227, %c0_228] : memref<1x8xf32, #tpu.memory_space<vmem>>, vector<1x8xf32>
    %182 = vector.broadcast %181 : vector<1x8xf32> to vector<128x8xf32>
    %183 = arith.addf %180, %182 : vector<128x8xf32>
    %184 = vector.shape_cast %80 : vector<2x8x8x8xf32> to vector<128x8xf32>
    %185 = arith.addf %183, %184 : vector<128x8xf32>
    %c0_229 = arith.constant 0 : index
    %c0_230 = arith.constant 0 : index
    %186 = vector.load %arg10[%c0_229, %c0_230] : memref<128x8xf32, #tpu.memory_space<vmem>>, vector<128x8xf32>
    tpu.vector_store %arg10[%c0_229, %c0_230], %185 {strides = array<i32>} : memref<128x8xf32, #tpu.memory_space<vmem>>, vector<128x8xf32>,
    return
  }
  func.func @transform_0(%arg0: i32) -> (i32, i32, i32, i32, i32) {
    %c0_i32 = arith.constant 0 : i32
    %c0_i32_0 = arith.constant 0 : i32
    %c0_i32_1 = arith.constant 0 : i32
    %c0_i32_2 = arith.constant 0 : i32
    %c0_i32_3 = arith.constant 0 : i32
    return %c0_i32, %arg0, %c0_i32_0, %c0_i32_1, %c0_i32_2 : i32, i32, i32, i32, i32
  }
  func.func @transform_1(%arg0: i32) -> (i32, i32) {
    %c0_i32 = arith.constant 0 : i32
    %c0_i32_0 = arith.constant 0 : i32
    %c0_i32_1 = arith.constant 0 : i32
    return %c0_i32, %c0_i32_0 : i32, i32
  }
  func.func @transform_2(%arg0: i32) -> (i32, i32) {
    %c0_i32 = arith.constant 0 : i32
    %c0_i32_0 = arith.constant 0 : i32
    %c0_i32_1 = arith.constant 0 : i32
    return %c0_i32, %c0_i32_0 : i32, i32
  }
  func.func @transform_3(%arg0: i32) -> (i32, i32) {
    %c0_i32 = arith.constant 0 : i32
    %c0_i32_0 = arith.constant 0 : i32
    %c0_i32_1 = arith.constant 0 : i32
    return %c0_i32, %c0_i32_0 : i32, i32
  }
  func.func @transform_4(%arg0: i32) -> (i32, i32) {
    %c0_i32 = arith.constant 0 : i32
    %c0_i32_0 = arith.constant 0 : i32
    %c0_i32_1 = arith.constant 0 : i32
    return %c0_i32, %c0_i32_0 : i32, i32
  }
  func.func @transform_5(%arg0: i32) -> (i32, i32) {
    %c0_i32 = arith.constant 0 : i32
    %c0_i32_0 = arith.constant 0 : i32
    %c0_i32_1 = arith.constant 0 : i32
    return %c0_i32, %c0_i32_0 : i32, i32
  }
  func.func @transform_6(%arg0: i32) -> (i32, i32) {
    %c0_i32 = arith.constant 0 : i32
    %c0_i32_0 = arith.constant 0 : i32
    %c0_i32_1 = arith.constant 0 : i32
    return %c0_i32, %c0_i32_0 : i32, i32
  }
  func.func @transform_7(%arg0: i32) -> (i32, i32) {
    %c0_i32 = arith.constant 0 : i32
    %c0_i32_0 = arith.constant 0 : i32
    %c0_i32_1 = arith.constant 0 : i32
    return %c0_i32, %c0_i32_0 : i32, i32
  }
  func.func @transform_8(%arg0: i32) -> (i32, i32) {
    %c0_i32 = arith.constant 0 : i32
    %c0_i32_0 = arith.constant 0 : i32
    %c0_i32_1 = arith.constant 0 : i32
    return %c0_i32, %c0_i32_0 : i32, i32
  }
  func.func @transform_9(%arg0: i32) -> (i32, i32) {
    %c0_i32 = arith.constant 0 : i32
    %c0_i32_0 = arith.constant 0 : i32
    return %arg0, %c0_i32 : i32, i32
  }
}

</mosaic_0001>

<bundles_post_ra>
// kernel: tpu_custom_call.1
= control target key start
LH: loop header
LB: loop body
LE: loop exit
PB: predicated region body
PF: predicated region fallthrough
CT: control target
= control target key end

     0   :  { %14 = vsyncpa [#allocation7], 0  ;;  %s4212_s30 = smov [#allocation6]   ;;  %s5688_s0 = inlined_call_operand.hbm [shape: f32[4,2,8,8,8], index: 0, kind: input, shape index: {}]   ;;  %s5689_s1 = inlined_call_operand.vmem [shape: bf16[72,8], index: 1, kind: input, shape index: {}]   ;;  %s5690_s2 = inlined_call_operand.vmem [shape: bf16[72,8], index: 2, kind: input, shape index: {}]   ;;  %s5691_s3 = inlined_call_operand.vmem [shape: f32[1,8], index: 3, kind: input, shape index: {}]   ;;  %s5692_s4 = inlined_call_operand.vmem [shape: f32[1,8], index: 4, kind: input, shape index: {}]   ;;  %s5693_s5 = inlined_call_operand.vmem [shape: f32[1,8], index: 5, kind: input, shape index: {}]   ;;  %s5694_s6 = inlined_call_operand.vmem [shape: f32[1,8], index: 6, kind: input, shape index: {}]   ;;  %s5695_s7 = inlined_call_operand.vmem [shape: f32[1,8], index: 7, kind: input, shape index: {}]   ;;  %s5696_s8 = inlined_call_operand.vmem [shape: f32[1,8], index: 8, kind: input, shape index: {}]   ;;  %s5697_s9 = inlined_call_operand.vmem [shape: f32[128,8], index: 9, kind: output, shape index: {}]  }
   0x1   :  { %s20_s10 = sshll.u32 %s4212_s30, 4  ;;  %s21_s10 = int_to_ptr.vmem [resolvable:$true] %s20_s10 }
   0x2   :  { %s4198_s11 = scalar_lea.vmem %s21_s10, 8192  ;;  %p4203_p1 = scmp.lt.s32.totalorder %s21_s10, %s21_s10 }
   0x3   :  { %p4199_p0 = scmp.ne.s32.totalorder %s21_s10, %s4198_s11  ;;  %p4204_p2 = scmp.lt.s32.totalorder %s4198_s11, %s4198_s11 }
   0x5   :  { %p4205_p3 = por %p4204_p2, %p4203_p1 }
   0x7   :  { %p4206_p4 = pnand %p4205_p3, %p4199_p0 }
   0x9   :  { %4209 = shalt.err (!%p4206_p4)
}
   0xa   :  { %s4213_s12 = smov 128   ;;  %s4214_s13 = smov 8  }
   0xb   :  { %26 = dma.hbm_to_vmem [thread:$0]  %s5688_s0, 8192, %s21_s10, [#allocation7], %s4213_s12, %s4213_s12, %s4214_s13  }
   0xc   :  { %4210 = dma.done.wait [#allocation7], 8192  }
   0xd   :  { %4211 = vsyncadd [#allocation7], 4294959104  ;;  %vm47_vm0 = vcmask 64512   ;;  %vm53_vm1 = vcmask 57344   ;;  %vm49_vm2 = vcmask 58368   ;;  %v4215_v0 = vmov 0.0  }
   0xe   :  { %80 = vst.msk [vmem:[#allocation2 + $0x150] sm:$0x1] %vm53_vm1, %v4215_v0  ;;  %81 = vst.msk [vmem:[#allocation2 + $0x160] sm:$0x1] %vm53_vm1, %v4215_v0  ;;  %v4460_v1 = vld [vmem:[%s5691_s3] ss:$0 sm:$0xff] }
   0xf   :  { %82 = vst.msk [vmem:[#allocation2 + $0x170] sm:$0x1] %vm53_vm1, %v4215_v0  ;;  %83 = vst.msk [vmem:[#allocation2 + $0x180] sm:$0x1] %vm53_vm1, %v4215_v0  ;;  %v4465_v2 = vld [vmem:[%s5692_s4] ss:$0 sm:$0xff] }
  0x10   :  { %84 = vst.msk [vmem:[#allocation2 + $0x190] sm:$0x1] %vm53_vm1, %v4215_v0  ;;  %85 = vst.msk [vmem:[#allocation2 + $0x1a0] sm:$0x1] %vm53_vm1, %v4215_v0  ;;  %v361_v3 = vld [vmem:[#allocation6 + $0x108] sm:$0xff]  ;;  %v362_v7 = vld [vmem:[#allocation6 + $0x110] sm:$0xff] }
  0x11   :  { %86 = vst.msk [vmem:[#allocation2 + $0x1b0] sm:$0x1] %vm53_vm1, %v4215_v0  ;;  %87 = vst.msk [vmem:[#allocation2 + $0x1c0] sm:$0x1] %vm53_vm1, %v4215_v0  ;;  %v393_v5 = vmul.f32 %v4460_v1, %v361_v3  ;;  %v394_v10 = vmul.f32 %v4460_v1, %v362_v7  ;;  %v360_v11 = vld [vmem:[#allocation6 + $0x100] sm:$0xff]  ;;  %v444_v13 = vld [vmem:[#allocation6 + $0x190] sm:$0xff] }
  0x12   :  { %90 = vst.msk [vmem:[#allocation2 + $0x1f0] sm:$0x1] %vm53_vm1, %v4215_v0  ;;  %91 = vst.msk [vmem:[#allocation2 + $0x200] sm:$0x1] %vm53_vm1, %v4215_v0  ;;  %v442_v12 = vld [vmem:[#allocation6 + $0x180] sm:$0xff]  ;;  %v392_v15 = vmul.f32 %v4460_v1, %v360_v11  ;;  %v476_v17 = vmul.f32 %v4460_v1, %v444_v13  ;;  %v443_v18 = vld [vmem:[#allocation6 + $0x188] sm:$0xff] }
  0x13   :  { %92 = vst.msk [vmem:[#allocation2 + $0x210] sm:$0x1] %vm53_vm1, %v4215_v0  ;;  %93 = vst.msk [vmem:[#allocation2 + $0x220] sm:$0x1] %vm53_vm1, %v4215_v0  ;;  %v409_v14 = vadd.f32 %v4465_v2, %v393_v5  ;;  %v474_v16 = vmul.f32 %v4460_v1, %v442_v12  ;;  %v279_v19 = vld [vmem:[#allocation6 + $0x88] sm:$0xff]  ;;  %v278_v20 = vld [vmem:[#allocation6 + $0x80] sm:$0xff]  ;;  %v410_v21 = vadd.f32 %v4465_v2, %v394_v10 }
  0x14   :  { %94 = vst.msk [vmem:[#allocation2 + $0x230] sm:$0x1] %vm53_vm1, %v4215_v0  ;;  %95 = vst.msk [vmem:[#allocation2 + $0x240] sm:$0x1] %vm53_vm1, %v4215_v0  ;;  %v475_v22 = vmul.f32 %v4460_v1, %v443_v18  ;;  %v311_v23 = vmul.f32 %v4460_v1, %v279_v19  ;;  %v310_v24 = vmul.f32 %v4460_v1, %v278_v20  ;;  %v281_v25 = vld [vmem:[#allocation6 + $0x98] sm:$0xff]  ;;  %v280_v26 = vld [vmem:[#allocation6 + $0x90] sm:$0xff] }
  0x15   :  { %96 = vst.msk [vmem:[#allocation2 + $0x250] sm:$0x1] %vm53_vm1, %v4215_v0  ;;  %97 = vst.msk [vmem:[#allocation2 + $0x260] sm:$0x1] %vm53_vm1, %v4215_v0  ;;  %v201_v27 = vld [vmem:[#allocation6 + $0x8] sm:$0xff]  ;;  %v408_v28 = vadd.f32 %v4465_v2, %v392_v15  ;;  %v490_v29 = vadd.f32 %v4465_v2, %v474_v16  ;;  %v492_v30 = vadd.f32 %v4465_v2, %v476_v17  ;;  %v200_v32 = vld [vmem:[#allocation6] sm:$0xff] }
  0x16   :  { %100 = vst.msk [vmem:[#allocation2 + $0x280] sm:$0xff] %vm47_vm0, %v4215_v0  ;;  %102 = vst.msk [vmem:[#allocation2 + $0x320] sm:$0xff] %vm47_vm0, %v4215_v0  ;;  %v313_v31 = vmul.f32 %v4460_v1, %v281_v25  ;;  %v203_v33 = vld [vmem:[#allocation6 + $0x18] sm:$0xff]  ;;  %v202_v34 = vld [vmem:[#allocation6 + $0x10] sm:$0xff]  ;;  %v491_v35 = vadd.f32 %v4465_v2, %v475_v22  ;;  %v327_v36 = vadd.f32 %v4465_v2, %v311_v23  ;;  %s4216_s3 = smov 16   ;;  %vm619_vm3 = vcmask 60416  }
  0x17   :  { %125 = vst.msk [vmem:[#allocation2 + $0x3c0] sm:$0xff] %vm47_vm0, %v4215_v0  ;;  %127 = vst.msk [vmem:[#allocation2 + $0x460] sm:$0xff] %vm47_vm0, %v4215_v0  ;;  %v326_v37 = vadd.f32 %v4465_v2, %v310_v24  ;;  %v312_v38 = vmul.f32 %v4460_v1, %v280_v26  ;;  %v445_v39 = vld [vmem:[#allocation6 + $0x198] sm:$0xff]  ;;  %v364_v41 = vld [vmem:[#allocation6 + $0x120] sm:$0xff]  ;;  %v223_v43 = vmul.f32 %v4460_v1, %v201_v27  ;;  %s4217_s4 = smov 24   ;;  %s4218_s19 = smov 32  }
  0x18   :  { %130 = vst.msk [vmem:[#allocation2 + $0x3d0] sm:$0x1] %vm53_vm1, %v4215_v0  ;;  %131 = vst.msk [vmem:[#allocation2 + $0x3e0] sm:$0x1] %vm53_vm1, %v4215_v0  ;;  %v363_v40 = vld [vmem:[#allocation6 + $0x118] sm:$0xff]  ;;  %v329_v42 = vadd.f32 %v4465_v2, %v313_v31  ;;  %v222_v44 = vmul.f32 %v4460_v1, %v200_v32  ;;  %v225_v45 = vmul.f32 %v4460_v1, %v203_v33  ;;  %v366_v46 = vld [vmem:[#allocation6 + $0x130] sm:$0xff] }
  0x19   :  { %132 = vst.msk [vmem:[#allocation2 + $0x3f0] sm:$0x1] %vm53_vm1, %v4215_v0  ;;  %133 = vst.msk [vmem:[#allocation2 + $0x400] sm:$0x1] %vm53_vm1, %v4215_v0  ;;  %v328_v47 = vadd.f32 %v4465_v2, %v312_v38  ;;  %v224_v48 = vmul.f32 %v4460_v1, %v202_v34  ;;  %v477_v49 = vmul.f32 %v4460_v1, %v445_v39  ;;  %v365_v51 = vld [vmem:[#allocation6 + $0x128] sm:$0xff]  ;;  %v446_v52 = vld [vmem:[#allocation6 + $0x1a0] sm:$0xff] }
  0x1a   :  { %134 = vst.msk [vmem:[#allocation2 + $0x410] sm:$0x1] %vm53_vm1, %v4215_v0  ;;  %135 = vst.msk [vmem:[#allocation2 + $0x420] sm:$0x1] %vm53_vm1, %v4215_v0  ;;  %v395_v50 = vmul.f32 %v4460_v1, %v363_v40  ;;  %v448_v53 = vld [vmem:[#allocation6 + $0x1b0] sm:$0xff]  ;;  %v245_v54 = vadd.f32 %v4465_v2, %v223_v43  ;;  %v244_v55 = vadd.f32 %v4465_v2, %v222_v44  ;;  %v447_v58 = vld [vmem:[#allocation6 + $0x1a8] sm:$0xff] }
  0x1b   :  { %136 = vst.msk [vmem:[#allocation2 + $0x430] sm:$0x1] %vm53_vm1, %v4215_v0  ;;  %137 = vst.msk [vmem:[#allocation2 + $0x440] sm:$0x1] %vm53_vm1, %v4215_v0  ;;  %v247_v56 = vadd.f32 %v4465_v2, %v225_v45  ;;  %v396_v57 = vmul.f32 %v4460_v1, %v364_v41  ;;  %v283_v59 = vld [vmem:[#allocation6 + $0xa8] sm:$0xff]  ;;  %v282_v60 = vld [vmem:[#allocation6 + $0xa0] sm:$0xff]  ;;  %v246_v61 = vadd.f32 %v4465_v2, %v224_v48 }
  0x1c   :  { %140 = vst.msk [vmem:[#allocation2 + $0x470] sm:$0x1] %vm53_vm1, %v4215_v0  ;;  %141 = vst.msk [vmem:[#allocation2 + $0x480] sm:$0x1] %vm53_vm1, %v4215_v0  ;;  %v493_v62 = vadd.f32 %v4465_v2, %v477_v49  ;;  %v411_v63 = vadd.f32 %v4465_v2, %v395_v50  ;;  %v478_v5 = vmul.f32 %v4460_v1, %v446_v52  ;;  %v285_v12 = vld [vmem:[#allocation6 + $0xb8] sm:$0xff]  ;;  %v284_v18 = vld [vmem:[#allocation6 + $0xb0] sm:$0xff] }
  0x1d   :  { %142 = vst.msk [vmem:[#allocation2 + $0x490] sm:$0x1] %vm53_vm1, %v4215_v0  ;;  %143 = vst.msk [vmem:[#allocation2 + $0x4a0] sm:$0x1] %vm53_vm1, %v4215_v0  ;;  %v412_v3 = vadd.f32 %v4465_v2, %v396_v57  ;;  %v315_v10 = vmul.f32 %v4460_v1, %v283_v59  ;;  %v314_v11 = vmul.f32 %v4460_v1, %v282_v60  ;;  %v204_v32 = vld [vmem:[#allocation6 + $0x20] sm:$0xff]  ;;  %v207_v39 = vld [vmem:[#allocation6 + $0x38] sm:$0xff] }
  0x1e   :  { %144 = vst.msk [vmem:[#allocation2 + $0x4b0] sm:$0x1] %vm53_vm1, %v4215_v0  ;;  %145 = vst.msk [vmem:[#allocation2 + $0x4c0] sm:$0x1] %vm53_vm1, %v4215_v0  ;;  %v494_v16 = vadd.f32 %v4465_v2, %v478_v5  ;;  %v317_v26 = vmul.f32 %v4460_v1, %v285_v12  ;;  %v226_v45 = vmul.f32 %v4460_v1, %v204_v32  ;;  %v206_v50 = vld [vmem:[#allocation6 + $0x30] sm:$0xff]  ;;  %v367_v60 = vld [vmem:[#allocation6 + $0x138] sm:$0xff] }
  0x1f   :  { %146 = vst.msk [vmem:[#allocation2 + $0x4d0] sm:$0x1] %vm53_vm1, %v4215_v0  ;;  %147 = vst.msk [vmem:[#allocation2 + $0x4e0] sm:$0x1] %vm53_vm1, %v4215_v0  ;;  %v330_v22 = vadd.f32 %v4465_v2, %v314_v11  ;;  %v399_v12 = vmul.f32 %v4460_v1, %v367_v60  ;;  %v287_v32 = vld [vmem:[#allocation6 + $0xc8] sm:$0xff]  ;;  %v210_v60 = vld [vmem:[#allocation6 + $0x50] sm:$0xff] }
  0x20   :  { %149 = vst.msk [vmem:[#allocation3] sm:$0xff] %vm47_vm0, %v4215_v0  ;;  %151 = vst.msk [vmem:[#allocation3 + $0xa0] sm:$0xff] %vm47_vm0, %v4215_v0  ;;  %v333_v31 = vadd.f32 %v4465_v2, %v317_v26  ;;  %v248_v52 = vadd.f32 %v4465_v2, %v226_v45  ;;  %s4219_s20 = smov 40   ;;  %s4220_s21 = smov 48   ;;  %vm1785_vm4 = vcmask 1043456   ;;  %vm748_vm5 = vcmask 126016  }
  0x21   :  { %154 = vst.msk [vmem:[#allocation3 + $0x90] sm:$0xff] %vm47_vm0, %v4215_v0  ;;  %156 = vst.msk [vmem:[#allocation3 + $0x130] sm:$0xff] %vm47_vm0, %v4215_v0  ;;  %s4221_s24 = smov 56   ;;  %s4222_s29 = smov 64   ;;  %vm877_vm6 = vcmask 191616   ;;  %vm1006_vm7 = vcmask 257216  }
  0x22   :  { %159 = vst.msk [vmem:[#allocation3 + $0x10] sm:$0x1] %vm53_vm1, %v4215_v0  ;;  %160 = vst.msk [vmem:[#allocation3 + $0x20] sm:$0x1] %vm53_vm1, %v4215_v0  ;;  %vm1135_vm8 = vcmask 322816   ;;  %vm1264_vm9 = vcmask 388416  }
  0x23   :  { %161 = vst.msk [vmem:[#allocation3 + $0x30] sm:$0x1] %vm53_vm1, %v4215_v0  ;;  %162 = vst.msk [vmem:[#allocation3 + $0x40] sm:$0x1] %vm53_vm1, %v4215_v0  ;;  %vm1393_vm10 = vcmask 454016   ;;  %vm1522_vm11 = vcmask 519616  }
  0x24   :  { %163 = vst.msk [vmem:[#allocation3 + $0x50] sm:$0x1] %vm53_vm1, %v4215_v0  ;;  %164 = vst.msk [vmem:[#allocation3 + $0x60] sm:$0x1] %vm53_vm1, %v4215_v0  ;;  %vm1651_vm12 = vcmask 585216   ;;  %vm1760_vm13 = vcmask 588800  }
  0x25   :  { %165 = vst.msk [vmem:[#allocation3 + $0x70] sm:$0x1] %vm53_vm1, %v4215_v0  ;;  %166 = vst.msk [vmem:[#allocation3 + $0x80] sm:$0x1] %vm53_vm1, %v4215_v0 }
  0x26   :  { %169 = vst.msk [vmem:[#allocation3 + $0xb0] sm:$0x1] %vm53_vm1, %v4215_v0  ;;  %170 = vst.msk [vmem:[#allocation3 + $0xc0] sm:$0x1] %vm53_vm1, %v4215_v0 }
  0x27   :  { %171 = vst.msk [vmem:[#allocation3 + $0xd0] sm:$0x1] %vm53_vm1, %v4215_v0  ;;  %172 = vst.msk [vmem:[#allocation3 + $0xe0] sm:$0x1] %vm53_vm1, %v4215_v0 }
  0x28   :  { %173 = vst.msk [vmem:[#allocation3 + $0xf0] sm:$0x1] %vm53_vm1, %v4215_v0  ;;  %174 = vst.msk [vmem:[#allocation3 + $0x100] sm:$0x1] %vm53_vm1, %v4215_v0 }
  0x29   :  { %175 = vst.msk [vmem:[#allocation3 + $0x110] sm:$0x1] %vm53_vm1, %v4215_v0  ;;  %176 = vst.msk [vmem:[#allocation3 + $0x120] sm:$0x1] %vm53_vm1, %v4215_v0 }
  0x2a   :  { %179 = vst.msk [vmem:[#allocation3 + $0x19] sm:$0x1] %vm53_vm1, %v4215_v0  ;;  %180 = vst.msk [vmem:[#allocation3 + $0x29] sm:$0x1] %vm53_vm1, %v4215_v0 }
  0x2b   :  { %181 = vst.msk [vmem:[#allocation3 + $0x39] sm:$0x1] %vm53_vm1, %v4215_v0  ;;  %182 = vst.msk [vmem:[#allocation3 + $0x49] sm:$0x1] %vm53_vm1, %v4215_v0 }
  0x2c   :  { %183 = vst.msk [vmem:[#allocation3 + $0x59] sm:$0x1] %vm53_vm1, %v4215_v0  ;;  %184 = vst.msk [vmem:[#allocation3 + $0x69] sm:$0x1] %vm53_vm1, %v4215_v0 }
  0x2d   :  { %185 = vst.msk [vmem:[#allocation3 + $0x79] sm:$0x1] %vm53_vm1, %v4215_v0  ;;  %186 = vst.msk [vmem:[#allocation3 + $0x89] sm:$0x1] %vm53_vm1, %v4215_v0 }
  0x2e   :  { %189 = vst.msk [vmem:[#allocation3 + $0xb9] sm:$0x1] %vm53_vm1, %v4215_v0  ;;  %190 = vst.msk [vmem:[#allocation3 + $0xc9] sm:$0x1] %vm53_vm1, %v4215_v0 }
  0x2f   :  { %191 = vst.msk [vmem:[#allocation3 + $0xd9] sm:$0x1] %vm53_vm1, %v4215_v0  ;;  %192 = vst.msk [vmem:[#allocation3 + $0xe9] sm:$0x1] %vm53_vm1, %v4215_v0 }
  0x30   :  { %193 = vst.msk [vmem:[#allocation3 + $0xf9] sm:$0x1] %vm53_vm1, %v4215_v0  ;;  %194 = vst.msk [vmem:[#allocation3 + $0x109] sm:$0x1] %vm53_vm1, %v4215_v0 }
  0x31   :  { %195 = vst.msk [vmem:[#allocation3 + $0x119] sm:$0x1] %vm53_vm1, %v4215_v0  ;;  %196 = vst.msk [vmem:[#allocation3 + $0x129] sm:$0x1] %vm53_vm1, %v4215_v0 }
  0x32   :  { %101 = vst.msk [vmem:[#allocation2 + $0x288] sm:$0x3] %vm49_vm2, %v4215_v0  ;;  %103 = vst.msk [vmem:[#allocation2 + $0x328] sm:$0x3] %vm49_vm2, %v4215_v0 }
  0x33   :  { %126 = vst.msk [vmem:[#allocation2 + $0x3c8] sm:$0x3] %vm49_vm2, %v4215_v0  ;;  %128 = vst.msk [vmem:[#allocation2 + $0x468] sm:$0x3] %vm49_vm2, %v4215_v0 }
  0x34   :  { %150 = vst.msk [vmem:[#allocation3 + $0x8] sm:$0x3] %vm49_vm2, %v4215_v0  ;;  %152 = vst.msk [vmem:[#allocation3 + $0xa8] sm:$0x3] %vm49_vm2, %v4215_v0 }
  0x35   :  { %155 = vst.msk [vmem:[#allocation3 + $0x98] sm:$0x3] %vm49_vm2, %v4215_v0  ;;  %157 = vst.msk [vmem:[#allocation3 + $0x138] sm:$0x3] %vm49_vm2, %v4215_v0 }
  0x36   :  { %129 = vst.msk [vmem:[#allocation2 + $0x3c0] sm:$0x1] %vm53_vm1, %v4215_v0  ;;  %139 = vst.msk [vmem:[#allocation2 + $0x460] sm:$0x1] %vm53_vm1, %v4215_v0 }
  0x37   :  { %158 = vst.msk [vmem:[#allocation3] sm:$0x1] %vm53_vm1, %v4215_v0  ;;  %167 = vst.msk [vmem:[#allocation3 + $0x90] sm:$0x1] %vm53_vm1, %v4215_v0 }
  0x38   :  { %168 = vst.msk [vmem:[#allocation3 + $0xa0] sm:$0x1] %vm53_vm1, %v4215_v0  ;;  %177 = vst.msk [vmem:[#allocation3 + $0x130] sm:$0x1] %vm53_vm1, %v4215_v0 }
  0x39   :  { %178 = vst.msk [vmem:[#allocation3 + $0x9] sm:$0x1] %vm53_vm1, %v4215_v0  ;;  %187 = vst.msk [vmem:[#allocation3 + $0x99] sm:$0x1] %vm53_vm1, %v4215_v0  ;;  %v636_v4 = vld [vmem:[#allocation2 + $0x281] sm:$0xff] }
  0x3a   :  { %188 = vst.msk [vmem:[#allocation3 + $0xa9] sm:$0x1] %vm53_vm1, %v4215_v0  ;;  %197 = vst.msk [vmem:[#allocation3 + $0x139] sm:$0x1] %vm53_vm1, %v4215_v0  ;;  %v765_v6 = vld [vmem:[#allocation2 + $0x3c1] sm:$0xff]  ;;  %v3737_v8 = vpack.c.bf16 %v636_v4, %v636_v4  ;;  %v398_v0 = vmul.f32 %v4460_v1, %v366_v46  ;;  %v397_v4 = vmul.f32 %v4460_v1, %v365_v51 }
  0x3b   :  { %v3753_v9 = vpack.c.bf16 %v765_v6, %v765_v6  ;;  %426 = vst.msk [vmem:[#allocation2 + $0x2a1] sm:$0xff] %vm47_vm0, %v409_v14  ;;  %427 = vst.msk [vmem:[#allocation2 + $0x2b1] sm:$0xff] %vm47_vm0, %v410_v21  ;;  %v480_v6 = vmul.f32 %v4460_v1, %v448_v53  ;;  %v331_v21 = vadd.f32 %v4465_v2, %v315_v10 }
  0x3c   :  { %700 = vrot.lane.b32.xlu0 %v3737_v8, %s4214_s13  ;;  %425 = vst.msk [vmem:[#allocation2 + $0x291] sm:$0xff] %vm47_vm0, %v408_v28  ;;  %507 = vst.msk [vmem:[#allocation2 + $0x3d1] sm:$0xff] %vm47_vm0, %v490_v29  ;;  %v414_v8 = vadd.f32 %v4465_v2, %v398_v0  ;;  %v413_v15 = vadd.f32 %v4465_v2, %v397_v4  ;;  %v316_v28 = vmul.f32 %v4460_v1, %v284_v18  ;;  %v205_v29 = vld [vmem:[#allocation6 + $0x28] sm:$0xff] }
  0x3d   :  { %509 = vst.msk [vmem:[#allocation2 + $0x3f1] sm:$0xff] %vm47_vm0, %v492_v30  ;;  %508 = vst.msk [vmem:[#allocation2 + $0x3e1] sm:$0xff] %vm47_vm0, %v491_v35  ;;  %v496_v17 = vadd.f32 %v4465_v2, %v480_v6  ;;  %v227_v38 = vmul.f32 %v4460_v1, %v205_v29 }
  0x3e   :  { %344 = vst.msk [vmem:[#allocation2 + $0x161] sm:$0xff] %vm47_vm0, %v327_v36  ;;  %343 = vst.msk [vmem:[#allocation2 + $0x151] sm:$0xff] %vm47_vm0, %v326_v37  ;;  %v332_v34 = vadd.f32 %v4465_v2, %v316_v28 }
  0x3f   :  { %346 = vst.msk [vmem:[#allocation2 + $0x181] sm:$0xff] %vm47_vm0, %v329_v42  ;;  %345 = vst.msk [vmem:[#allocation2 + $0x171] sm:$0xff] %vm47_vm0, %v328_v47  ;;  %v249_v49 = vadd.f32 %v4465_v2, %v227_v38  ;;  %v289_v38 = vld [vmem:[#allocation6 + $0xd8] sm:$0xff] }
  0x40   :  { %829 = vrot.lane.b32.xlu0 %v3753_v9, %s4216_s3  ;;  %262 = vst.msk [vmem:[#allocation2 + $0x21] sm:$0xff] %vm47_vm0, %v245_v54  ;;  %261 = vst.msk [vmem:[#allocation2 + $0x11] sm:$0xff] %vm47_vm0, %v244_v55  ;;  %v479_v9 = vmul.f32 %v4460_v1, %v447_v58  ;;  %v229_v54 = vmul.f32 %v4460_v1, %v207_v39  ;;  %v449_v55 = vld [vmem:[#allocation6 + $0x1b8] sm:$0xff]  ;;  %v228_v58 = vmul.f32 %v4460_v1, %v206_v50  ;;  %v288_v39 = vld [vmem:[#allocation6 + $0xd0] sm:$0xff] }
  0x41   :  { %264 = vst.msk [vmem:[#allocation2 + $0x41] sm:$0xff] %vm47_vm0, %v247_v56  ;;  %263 = vst.msk [vmem:[#allocation2 + $0x31] sm:$0xff] %vm47_vm0, %v246_v61  ;;  %v539_v56 = vld [vmem:[#allocation2 + $0x3c0] sm:$0xff] }
  0x42   :  { %v638_v7 = vld [vmem:[#allocation2 + $0x2a1] sm:$0xff]  ;;  %510 = vst.msk [vmem:[#allocation2 + $0x401] sm:$0xff] %vm47_vm0, %v493_v62  ;;  %428 = vst.msk [vmem:[#allocation2 + $0x2c1] sm:$0xff] %vm47_vm0, %v411_v63  ;;  %v639_v14 = vld [vmem:[#allocation2 + $0x2b1] sm:$0xff]  ;;  %v495_v20 = vadd.f32 %v4465_v2, %v479_v9  ;;  %v251_v62 = vadd.f32 %v4465_v2, %v229_v54  ;;  %v250_v5 = vadd.f32 %v4465_v2, %v228_v58 }
  0x43   :  { %v4527_v13 = vpack.c.bf16 %v638_v7, %v638_v7  ;;  %429 = vst.msk [vmem:[#allocation2 + $0x2d1] sm:$0xff] %vm47_vm0, %v412_v3  ;;  %v637_v19 = vld [vmem:[#allocation2 + $0x291] sm:$0xff]  ;;  %431 = vst.msk [vmem:[#allocation2 + $0x2f1] sm:$0xff] %vm47_vm0, %v414_v8  ;;  %v4539_v23 = vpack.c.bf16 %v639_v14, %v639_v14  ;;  %v481_v7 = vmul.f32 %v4460_v1, %v449_v55  ;;  %v368_v9 = vld [vmem:[#allocation6 + $0x140] sm:$0xff] }
  0x44   :  { %v4541_v24 = vpack.c.bf16 %v637_v19, %v637_v19  ;;  %v767_v25 = vld [vmem:[#allocation2 + $0x3e1] sm:$0xff]  ;;  %430 = vst.msk [vmem:[#allocation2 + $0x2e1] sm:$0xff] %vm47_vm0, %v413_v15  ;;  %511 = vst.msk [vmem:[#allocation2 + $0x411] sm:$0xff] %vm47_vm0, %v494_v16  ;;  %v766_v27 = vld [vmem:[#allocation2 + $0x3d1] sm:$0xff]  ;;  %v3721_v11 = vpack.c.bf16 %v539_v56, %v539_v56  ;;  %v319_v55 = vmul.f32 %v4460_v1, %v287_v32 }
  0x45   :  { %704 = vrot.lane.b32.xlu1 %v4527_v13, %s4214_s13  ;;  %513 = vst.msk [vmem:[#allocation2 + $0x431] sm:$0xff] %vm47_vm0, %v496_v17  ;;  %512 = vst.msk [vmem:[#allocation2 + $0x421] sm:$0xff] %vm47_vm0, %v495_v20  ;;  %v4553_v30 = vpack.c.bf16 %v767_v25, %v767_v25  ;;  %v894_v33 = vld [vmem:[#allocation2 + $0x150] sm:$0xff]  ;;  %v4559_v35 = vpack.c.bf16 %v766_v27, %v766_v27  ;;  %v1282_v36 = vld [vmem:[#allocation2 + $0x3e0] sm:$0xff]  ;;  %v497_v18 = vadd.f32 %v4465_v2, %v481_v7 }
  0x46   :  { %348 = vst.msk [vmem:[#allocation2 + $0x1a1] sm:$0xff] %vm47_vm0, %v331_v21  ;;  %347 = vst.msk [vmem:[#allocation2 + $0x191] sm:$0xff] %vm47_vm0, %v330_v22  ;;  %702 = vrot.lane.b32.xlu0 %v4541_v24, %s4214_s13  ;;  %v1281_v37 = vld [vmem:[#allocation2 + $0x3d0] sm:$0xff]  ;;  %v4563_v41 = vpack.c.bf16 %v1282_v36, %v1282_v36  ;;  %v3769_v46 = vpack.c.bf16 %v894_v33, %v894_v33  ;;  %v895_v57 = vld [vmem:[#allocation2 + $0x160] sm:$0xff]  ;;  %v415_v22 = vadd.f32 %v4465_v2, %v399_v12 }
  0x47   :  { %350 = vst.msk [vmem:[#allocation2 + $0x1c1] sm:$0xff] %vm47_vm0, %v333_v31  ;;  %v768_v40 = vld [vmem:[#allocation2 + $0x3f1] sm:$0xff]  ;;  %v4565_v42 = vpack.c.bf16 %v1281_v37, %v1281_v37  ;;  %349 = vst.msk [vmem:[#allocation2 + $0x1b1] sm:$0xff] %vm47_vm0, %v332_v34  ;;  %v3770_v10 = vpack.c.bf16 %v895_v57, %v895_v57  ;;  %v369_v15 = vld [vmem:[#allocation6 + $0x148] sm:$0xff]  ;;  %v400_v25 = vmul.f32 %v4460_v1, %v368_v9 }
  0x48   :  { %v1283_v44 = vld [vmem:[#allocation2 + $0x3f0] sm:$0xff]  ;;  %622 = vst.msk [vmem:[#allocation4 + $0x8] sm:$0xf] %vm619_vm3, %v4563_v41  ;;  %v4583_v53 = vpack.c.bf16 %v768_v40, %v768_v40  ;;  %v450_v16 = vld [vmem:[#allocation6 + $0x1c0] sm:$0xff]  ;;  %620 = vst.msk [vmem:[#allocation4] sm:$0xf] %vm619_vm3, %v3721_v11  ;;  %v401_v28 = vmul.f32 %v4460_v1, %v369_v15  ;;  %v321_v57 = vmul.f32 %v4460_v1, %v289_v38 }
  0x49   :  { %706 = vrot.lane.b32.xlu1 %v4539_v23, %s4214_s13  ;;  %v1284_v43 = vld [vmem:[#allocation2 + $0x400] sm:$0xff]  ;;  %v4573_v48 = vpack.c.bf16 %v1283_v44, %v1283_v44  ;;  %v896_v51 = vld [vmem:[#allocation2 + $0x170] sm:$0xff]  ;;  %621 = vst.msk [vmem:[#allocation4 + $0x4] sm:$0xf] %vm619_vm3, %v4565_v42  ;;  %v482_v29 = vmul.f32 %v4460_v1, %v450_v16  ;;  %v451_v31 = vld [vmem:[#allocation6 + $0x1c8] sm:$0xff]  ;;  %v416_v36 = vadd.f32 %v4465_v2, %v400_v25 }
  0x4a   :  { %833 = vrot.lane.b32.xlu0 %v4553_v30, %s4216_s3  ;;  %v4571_v47 = vpack.c.bf16 %v1284_v43, %v1284_v43  ;;  %266 = vst.msk [vmem:[#allocation2 + $0x61] sm:$0xff] %vm47_vm0, %v249_v49  ;;  %265 = vst.msk [vmem:[#allocation2 + $0x51] sm:$0xff] %vm47_vm0, %v248_v52  ;;  %v3771_v61 = vpack.c.bf16 %v896_v51, %v896_v51  ;;  %v1023_v4 = vld [vmem:[#allocation2 + $0x11] sm:$0xff]  ;;  %v897_v17 = vld [vmem:[#allocation2 + $0x180] sm:$0xff]  ;;  %v483_v54 = vmul.f32 %v4460_v1, %v451_v31 }
  0x4b   :  { %623 = vst.msk [vmem:[#allocation4 + $0xc] sm:$0xf] %vm619_vm3, %v4573_v48  ;;  %v1285_v0 = vld [vmem:[#allocation2 + $0x410] sm:$0xff]  ;;  %v3785_v20 = vpack.c.bf16 %v1023_v4, %v1023_v4  ;;  %v1024_v26 = vld [vmem:[#allocation2 + $0x21] sm:$0xff]  ;;  %v3772_v34 = vpack.c.bf16 %v897_v17, %v897_v17  ;;  %v498_v49 = vadd.f32 %v4465_v2, %v482_v29  ;;  %v211_v51 = vld [vmem:[#allocation6 + $0x58] sm:$0xff]  ;;  %v320_v58 = vmul.f32 %v4460_v1, %v288_v39 }
  0x4c   :  { %624 = vst.msk [vmem:[#allocation4 + $0x10] sm:$0xf] %vm619_vm3, %v4571_v47  ;;  %v1286_v59 = vld [vmem:[#allocation2 + $0x420] sm:$0xff]  ;;  %v1287_v3 = vld [vmem:[#allocation2 + $0x430] sm:$0xff]  ;;  %v4598_v6 = vpack.c.bf16 %v1285_v0, %v1285_v0  ;;  %v209_v40 = vld [vmem:[#allocation6 + $0x48] sm:$0xff]  ;;  %v499_v0 = vadd.f32 %v4465_v2, %v483_v54  ;;  %v233_v12 = vmul.f32 %v4460_v1, %v211_v51 }
  0x4d   :  { %831 = vrot.lane.b32.xlu1 %v4559_v35, %s4216_s3  ;;  %v4595_v63 = vpack.c.bf16 %v1286_v59, %v1286_v59  ;;  %v4601_v8 = vpack.c.bf16 %v1287_v3, %v1287_v3  ;;  %268 = vst.msk [vmem:[#allocation2 + $0x81] sm:$0xff] %vm47_vm0, %v251_v62  ;;  %v370_v14 = vld [vmem:[#allocation6 + $0x150] sm:$0xff]  ;;  %267 = vst.msk [vmem:[#allocation2 + $0x71] sm:$0xff] %vm47_vm0, %v250_v5  ;;  %v286_v33 = vld [vmem:[#allocation6 + $0xc0] sm:$0xff]  ;;  %v231_v59 = vmul.f32 %v4460_v1, %v209_v40 }
  0x4e   :  { %958 = vrot.lane.b32.xlu0 %v3769_v46, %s4217_s4  ;;  %v452_v19 = vld [vmem:[#allocation6 + $0x1d0] sm:$0xff]  ;;  %625 = vst.msk [vmem:[#allocation4 + $0x14] sm:$0xf] %vm619_vm3, %v4598_v6  ;;  %v402_v27 = vmul.f32 %v4460_v1, %v370_v14  ;;  %v417_v46 = vadd.f32 %v4465_v2, %v401_v28  ;;  %v208_v50 = vld [vmem:[#allocation6 + $0x40] sm:$0xff]  ;;  %v318_v56 = vmul.f32 %v4460_v1, %v286_v33  ;;  %v371_v33 = vld [vmem:[#allocation6 + $0x158] sm:$0xff] }
  0x4f   :  { %626 = vst.msk [vmem:[#allocation4 + $0x18] sm:$0xf] %vm619_vm3, %v4595_v63  ;;  %627 = vst.msk [vmem:[#allocation4 + $0x1c] sm:$0xf] %vm619_vm3, %v4601_v8  ;;  %v1025_v21 = vld [vmem:[#allocation2 + $0x31] sm:$0xff]  ;;  %v484_v37 = vmul.f32 %v4460_v1, %v452_v19  ;;  %v1026_v62 = vld [vmem:[#allocation2 + $0x41] sm:$0xff]  ;;  %v335_v3 = vadd.f32 %v4465_v2, %v319_v55  ;;  %v337_v5 = vadd.f32 %v4465_v2, %v321_v57 }
  0x50   :  { %514 = vst.msk [vmem:[#allocation2 + $0x441] sm:$0xff] %vm47_vm0, %v497_v18  ;;  %432 = vst.msk [vmem:[#allocation2 + $0x301] sm:$0xff] %vm47_vm0, %v415_v22  ;;  %v3787_v43 = vpack.c.bf16 %v1025_v21, %v1025_v21  ;;  %v1152_v44 = vld [vmem:[#allocation2 + $0x151] sm:$0xff]  ;;  %v418_v45 = vadd.f32 %v4465_v2, %v402_v27  ;;  %v334_v4 = vadd.f32 %v4465_v2, %v318_v56  ;;  %v1153_v19 = vld [vmem:[#allocation2 + $0x161] sm:$0xff] }
  0x51   :  { %835 = vrot.lane.b32.xlu1 %v4583_v53, %s4216_s3  ;;  %433 = vst.msk [vmem:[#allocation2 + $0x331] sm:$0xff] %vm47_vm0, %v416_v36  ;;  %v500_v52 = vadd.f32 %v4465_v2, %v484_v37  ;;  %434 = vst.msk [vmem:[#allocation2 + $0x341] sm:$0xff] %vm47_vm0, %v417_v46  ;;  %v336_v7 = vadd.f32 %v4465_v2, %v320_v58  ;;  %v253_v9 = vadd.f32 %v4465_v2, %v231_v59  ;;  %v1154_v15 = vld [vmem:[#allocation2 + $0x171] sm:$0xff]  ;;  %v1155_v25 = vld [vmem:[#allocation2 + $0x181] sm:$0xff] }
  0x52   :  { %962 = vrot.lane.b32.xlu0 %v3771_v61, %s4217_s4  ;;  %435 = vst.msk [vmem:[#allocation2 + $0x351] sm:$0xff] %vm47_vm0, %v418_v45  ;;  %515 = vst.msk [vmem:[#allocation2 + $0x471] sm:$0xff] %vm47_vm0, %v498_v49  ;;  %v3786_v61 = vpack.c.bf16 %v1024_v26, %v1024_v26  ;;  %v230_v11 = vmul.f32 %v4460_v1, %v208_v50  ;;  %v232_v14 = vmul.f32 %v4460_v1, %v210_v60  ;;  %v453_v26 = vld [vmem:[#allocation6 + $0x1d8] sm:$0xff]  ;;  %v1413_v45 = vld [vmem:[#allocation2 + $0x2c1] sm:$0xff] }
  0x53   :  { %517 = vst.msk [vmem:[#allocation2 + $0x491] sm:$0xff] %vm47_vm0, %v500_v52  ;;  %516 = vst.msk [vmem:[#allocation2 + $0x481] sm:$0xff] %vm47_vm0, %v499_v0  ;;  %v3788_v16 = vpack.c.bf16 %v1026_v62, %v1026_v62  ;;  %v255_v18 = vadd.f32 %v4465_v2, %v233_v12  ;;  %v3803_v21 = vpack.c.bf16 %v1154_v15, %v1154_v15  ;;  %v4102_v46 = vld [vmem:[%s5689_s1 + $0x10] sm:$0xff]   ;;  %v373_v52 = vld [vmem:[#allocation6 + $0x168] sm:$0xff] }
  0x54   :  { %352 = vst.msk [vmem:[#allocation2 + $0x201] sm:$0xff] %vm47_vm0, %v335_v3  ;;  %351 = vst.msk [vmem:[#allocation2 + $0x1f1] sm:$0xff] %vm47_vm0, %v334_v4  ;;  %v252_v17 = vadd.f32 %v4465_v2, %v230_v11  ;;  %v3802_v22 = vpack.c.bf16 %v1153_v19, %v1153_v19  ;;  %v3804_v27 = vpack.c.bf16 %v1155_v25, %v1155_v25  ;;  %v641_v51 = vld [vmem:[#allocation2 + $0x2d1] sm:$0xff]  ;;  %v4105_v54 = vld [vmem:[%s5689_s1] sm:$0xff]  }
  0x55   :  { %960 = vrot.lane.b32.xlu1 %v3770_v10, %s4217_s4  ;;  %v3801_v10 = vpack.c.bf16 %v1152_v44, %v1152_v44  ;;  %354 = vst.msk [vmem:[#allocation2 + $0x221] sm:$0xff] %vm47_vm0, %v337_v5  ;;  %353 = vst.msk [vmem:[#allocation2 + $0x211] sm:$0xff] %vm47_vm0, %v336_v7  ;;  %v485_v28 = vmul.f32 %v4460_v1, %v453_v26  ;;  %v403_v37 = vmul.f32 %v4460_v1, %v371_v33  ;;  %v642_v56 = vld [vmem:[#allocation2 + $0x2e1] sm:$0xff]  ;;  %v643_v4 = vld [vmem:[#allocation2 + $0x2f1] sm:$0xff] }
  0x56   :  { %1087 = vrot.lane.b32.xlu0 %v3785_v20, %s4218_s19  ;;  %270 = vst.msk [vmem:[#allocation2 + $0xc1] sm:$0xff] %vm47_vm0, %v253_v9  ;;  %v254_v20 = vadd.f32 %v4465_v2, %v232_v14  ;;  %269 = vst.msk [vmem:[#allocation2 + $0xb1] sm:$0xff] %vm47_vm0, %v252_v17  ;;  %v405_v55 = vmul.f32 %v4460_v1, %v373_v52  ;;  %v4736_v57 = vpack.c.bf16 %v641_v51, %v641_v51  ;;  %v1542_v60 = vld [vmem:[#allocation2 + $0x401] sm:$0xff]  ;;  %v456_v5 = vld [vmem:[#allocation6 + $0x1f0] sm:$0xff] }
  0x57   :  { %272 = vst.msk [vmem:[#allocation2 + $0xe1] sm:$0xff] %vm47_vm0, %v255_v18  ;;  %v501_v29 = vadd.f32 %v4465_v2, %v485_v28  ;;  %v4742_v62 = vpack.c.bf16 %v642_v56, %v642_v56  ;;  %v3852_v0 = vpack.c.bf16 %v1542_v60, %v1542_v60  ;;  %v455_v7 = vld [vmem:[#allocation6 + $0x1e8] sm:$0xff]  ;;  %v4756_v11 = vpack.c.bf16 %v643_v4, %v643_v4  ;;  %v770_v15 = vld [vmem:[#allocation2 + $0x411] sm:$0xff]  ;;  %v290_v19 = vld [vmem:[#allocation6 + $0xe0] sm:$0xff] }
  0x58   :  { %271 = vst.msk [vmem:[#allocation2 + $0xd1] sm:$0xff] %vm47_vm0, %v254_v20  ;;  %v421_v59 = vadd.f32 %v4465_v2, %v405_v55  ;;  %v487_v9 = vmul.f32 %v4460_v1, %v455_v7  ;;  %v898_v20 = vld [vmem:[#allocation2 + $0x190] sm:$0xff]  ;;  %v293_v28 = vld [vmem:[#allocation6 + $0xf8] sm:$0xff]  ;;  %v1030_v4 = vld [vmem:[#allocation2 + $0x81] sm:$0xff] }
  0x59   :  { %964 = vrot.lane.b32.xlu1 %v3772_v34, %s4217_s4  ;;  %518 = vst.msk [vmem:[#allocation2 + $0x4a1] sm:$0xff] %vm47_vm0, %v501_v29  ;;  %v1289_v32 = vld [vmem:[#allocation2 + $0x470] sm:$0xff] }
  0x5a   :  { %1091 = vrot.lane.b32.xlu0 %v3787_v43, %s4218_s19  ;;  %v1290_v31 = vld [vmem:[#allocation2 + $0x480] sm:$0xff]  ;;  %v4681_v36 = vpack.c.bf16 %v1289_v32, %v1289_v32  ;;  %v1291_v39 = vld [vmem:[#allocation2 + $0x490] sm:$0xff]  ;;  %438 = vst.msk [vmem:[#allocation2 + $0x381] sm:$0xff] %vm47_vm0, %v421_v59  ;;  %v503_v14 = vadd.f32 %v4465_v2, %v487_v9  ;;  %v325_v32 = vmul.f32 %v4460_v1, %v293_v28 }
  0x5b   :  { %v4679_v34 = vpack.c.bf16 %v1290_v31, %v1290_v31  ;;  %v4698_v40 = vpack.c.bf16 %v1291_v39, %v1291_v39  ;;  %v772_v26 = vld [vmem:[#allocation2 + $0x431] sm:$0xff]  ;;  %v3773_v31 = vpack.c.bf16 %v898_v20, %v898_v20  ;;  %v899_v39 = vld [vmem:[#allocation2 + $0x1a0] sm:$0xff] }
  0x5c   :  { %629 = vst.msk [vmem:[#allocation4 + $0x24] sm:$0xf] %vm619_vm3, %v4681_v36  ;;  %v292_v29 = vld [vmem:[#allocation6 + $0xf0] sm:$0xff]  ;;  %v1157_v9 = vld [vmem:[#allocation2 + $0x1a1] sm:$0xff] }
  0x5d   :  { %1089 = vrot.lane.b32.xlu1 %v3786_v61, %s4218_s19  ;;  %630 = vst.msk [vmem:[#allocation4 + $0x28] sm:$0xf] %vm619_vm3, %v4679_v34  ;;  %631 = vst.msk [vmem:[#allocation4 + $0x2c] sm:$0xf] %vm619_vm3, %v4698_v40  ;;  %v454_v61 = vld [vmem:[#allocation6 + $0x1e0] sm:$0xff]  ;;  %v324_v33 = vmul.f32 %v4460_v1, %v292_v29  ;;  %v214_v52 = vld [vmem:[#allocation6 + $0x70] sm:$0xff] }
  0x5e   :  { %1216 = vrot.lane.b32.xlu0 %v3801_v10, %s4219_s20  ;;  %v771_v10 = vld [vmem:[#allocation2 + $0x421] sm:$0xff]  ;;  %520 = vst.msk [vmem:[#allocation2 + $0x4c1] sm:$0xff] %vm47_vm0, %v503_v14  ;;  %v236_v55 = vmul.f32 %v4460_v1, %v214_v52  ;;  %v1029_v56 = vld [vmem:[#allocation2 + $0x71] sm:$0xff] }
  0x5f   :  { %v4761_v17 = vpack.c.bf16 %v771_v10, %v771_v10  ;;  %v1158_v7 = vld [vmem:[#allocation2 + $0x1b1] sm:$0xff]  ;;  %v1159_v14 = vld [vmem:[#allocation2 + $0x1c1] sm:$0xff] }
  0x60   :  { %v1292_v43 = vld [vmem:[#allocation2 + $0x4a0] sm:$0xff]  ;;  %v258_v60 = vadd.f32 %v4465_v2, %v236_v55  ;;  %v3807_v10 = vpack.c.bf16 %v1158_v7, %v1158_v7 }
  0x61   :  { %1093 = vrot.lane.b32.xlu1 %v3788_v16, %s4218_s19  ;;  %v4706_v44 = vpack.c.bf16 %v1292_v43, %v1292_v43  ;;  %v291_v16 = vld [vmem:[#allocation6 + $0xe8] sm:$0xff]  ;;  %v1288_v20 = vld [vmem:[#allocation2 + $0x440] sm:$0xff] }
  0x62   :  { %1220 = vrot.lane.b32.xlu0 %v3803_v21, %s4219_s20  ;;  %v323_v18 = vmul.f32 %v4460_v1, %v291_v16  ;;  %v322_v21 = vmul.f32 %v4460_v1, %v290_v19  ;;  %275 = vst.msk [vmem:[#allocation2 + $0x111] sm:$0xff] %vm47_vm0, %v258_v60  ;;  %v903_v7 = vld [vmem:[#allocation2 + $0x200] sm:$0xff] }
  0x63   :  { %632 = vst.msk [vmem:[#allocation4 + $0x30] sm:$0xf] %vm619_vm3, %v4706_v44 }
  0x64   :  { %v339_v25 = vadd.f32 %v4465_v2, %v323_v18  ;;  %v3808_v18 = vpack.c.bf16 %v1159_v14, %v1159_v14 }
  0x65   :  { %1218 = vrot.lane.b32.xlu1 %v3802_v22, %s4219_s20  ;;  %v4769_v22 = vpack.c.bf16 %v770_v15, %v770_v15  ;;  %v457_v15 = vld [vmem:[#allocation6 + $0x1f8] sm:$0xff] }
  0x66   :  { %1345 = vrot.lane.b32.xlu0 %v4565_v42, %s4220_s21  ;;  %v4100_v42 = vld [vmem:[%s5689_s1 + $0x20] ss:$0 sps:$4 sm:$0xff]   ;;  %356 = vst.msk [vmem:[#allocation2 + $0x241] sm:$0xff] %vm47_vm0, %v339_v25  ;;  %v489_v16 = vmul.f32 %v4460_v1, %v457_v15 }
  0x67   :  { %4087 = vmatprep.subr.msk.bf16.mxu0 %vm1785_vm4, %v4100_v42  ;;  %v1787_v38 = vsel %vm1785_vm4, %v4100_v42, 0  ;;  %v900_v42 = vld [vmem:[#allocation2 + $0x1b0] sm:$0xff]  ;;  %v905_v15 = vld [vmem:[#allocation2 + $0x220] sm:$0xff] }
  0x68   :  { %4036 = vmatpush3.bf16.msra.mxu0 %v1787_v38  ;;  %v341_v38 = vadd.f32 %v4465_v2, %v325_v32  ;;  %v3775_v43 = vpack.c.bf16 %v900_v42, %v900_v42  ;;  %v505_v19 = vadd.f32 %v4465_v2, %v489_v16  ;;  %v1417_v42 = vld [vmem:[#allocation2 + $0x301] sm:$0xff] }
  0x69   :  { %1222 = vrot.lane.b32.xlu1 %v3804_v27, %s4219_s20  ;;  %v338_v27 = vadd.f32 %v4465_v2, %v322_v21  ;;  %v1294_v21 = vld [vmem:[#allocation2 + $0x4c0] sm:$0xff] }
  0x6a   :  { %1349 = vrot.lane.b32.xlu0 %v4573_v48, %s4220_s21  ;;  %v419_v48 = vadd.f32 %v4465_v2, %v403_v37  ;;  %v4781_v37 = vpack.c.bf16 %v772_v26, %v772_v26  ;;  %358 = vst.msk [vmem:[#allocation2 + $0x261] sm:$0xff] %vm47_vm0, %v341_v38  ;;  %522 = vst.msk [vmem:[#allocation2 + $0x4e1] sm:$0xff] %vm47_vm0, %v505_v19  ;;  %v375_v26 = vld [vmem:[#allocation6 + $0x178] sm:$0xff]  ;;  %v3840_v38 = vpack.c.bf16 %v1417_v42, %v1417_v42 }
  0x6b   :  { %355 = vst.msk [vmem:[#allocation2 + $0x231] sm:$0xff] %vm47_vm0, %v338_v27  ;;  %v4820_v27 = vpack.c.bf16 %v1294_v21, %v1294_v21  ;;  %v407_v29 = vmul.f32 %v4460_v1, %v375_v26  ;;  %v1033_v19 = vld [vmem:[#allocation2 + $0xd1] sm:$0xff] }
  0x6c   :  { %436 = vst.msk [vmem:[#allocation2 + $0x361] sm:$0xff] %vm47_vm0, %v419_v48  ;;  %v340_v48 = vadd.f32 %v4465_v2, %v324_v33  ;;  %v547_v33 = vld [vmem:[#allocation2 + $0x460] sm:$0xff] }
  0x6d   :  { %1347 = vrot.lane.b32.xlu1 %v4563_v41, %s4220_s21  ;;  %v4101_v41 = vld [vmem:[%s5689_s1 + $0x18] sm:$0xff]   ;;  %v423_v32 = vadd.f32 %v4465_v2, %v407_v29  ;;  %634 = vst.msk [vmem:[#allocation4 + $0x38] sm:$0xf] %vm619_vm3, %v4820_v27  ;;  %v3795_v29 = vpack.c.bf16 %v1033_v19, %v1033_v19 }
  0x6e   :  { %1474 = vrot.lane.b32.xlu0 %v4541_v24, %s4221_s24  ;;  %4037 = vmatprep.subr.bf16.mxu0 %v4101_v41  ;;  %v372_v24 = vld [vmem:[#allocation6 + $0x160] sm:$0xff]  ;;  %357 = vst.msk [vmem:[#allocation2 + $0x251] sm:$0xff] %vm47_vm0, %v340_v48 }
  0x6f   :  { %4038 = vmatpush3.bf16.msra.mxu0 %v4101_v41  ;;  %v404_v49 = vmul.f32 %v4460_v1, %v372_v24  ;;  %v213_v41 = vld [vmem:[#allocation6 + $0x68] sm:$0xff]  ;;  %v212_v24 = vld [vmem:[#allocation6 + $0x60] sm:$0xff]  ;;  %440 = vst.msk [vmem:[#allocation2 + $0x3a1] sm:$0xff] %vm47_vm0, %v423_v32 }
  0x70   :  { %4039 = vmatprep.subr.bf16.mxu0 %v4102_v46 }
  0x71   :  { %1351 = vrot.lane.b32.xlu1 %v4571_v47, %s4220_s21  ;;  %v3836_v47 = vpack.c.bf16 %v1413_v45, %v1413_v45  ;;  %v420_v50 = vadd.f32 %v4465_v2, %v404_v49  ;;  %v235_v45 = vmul.f32 %v4460_v1, %v213_v41  ;;  %v234_v49 = vmul.f32 %v4460_v1, %v212_v24  ;;  %v1546_v24 = vld [vmem:[#allocation2 + $0x441] sm:$0xff] }
  0x72   :  { %1478 = vrot.lane.b32.xlu0 %v4539_v23, %s4221_s24  ;;  %v4103_v23 = vld [vmem:[%s5689_s1 + $0x8] sm:$0xff]  }
  0x73   :  { %4040 = vmatpush3.bf16.msra.mxu0 %v4102_v46  ;;  %437 = vst.msk [vmem:[#allocation2 + $0x371] sm:$0xff] %vm47_vm0, %v420_v50  ;;  %v1027_v46 = vld [vmem:[#allocation2 + $0x51] sm:$0xff]  ;;  %v257_v50 = vadd.f32 %v4465_v2, %v235_v45  ;;  %v256_v51 = vadd.f32 %v4465_v2, %v234_v49 }
  0x74   :  { %4041 = vmatprep.subr.bf16.mxu0 %v4103_v23 }
  0x75   :  { %1476 = vrot.lane.b32.xlu1 %v4527_v13, %s4221_s24  ;;  %v374_v13 = vld [vmem:[#allocation6 + $0x170] sm:$0xff]  ;;  %274 = vst.msk [vmem:[#allocation2 + $0x101] sm:$0xff] %vm47_vm0, %v257_v50  ;;  %273 = vst.msk [vmem:[#allocation2 + $0xf1] sm:$0xff] %vm47_vm0, %v256_v51 }
  0x76   :  { %1603 = vrot.lane.b32.xlu0 %v4559_v35, %s4222_s29  ;;  %v406_v35 = vmul.f32 %v4460_v1, %v374_v13  ;;  %v215_v13 = vld [vmem:[#allocation6 + $0x78] sm:$0xff] }
  0x77   :  { %4042 = vmatpush3.bf16.msra.mxu0 %v4103_v23  ;;  %v901_v23 = vld [vmem:[#allocation2 + $0x1c0] sm:$0xff] }
  0x78   :  { %4043 = vmatprep.subr.bf16.mxu0 %v4105_v54  ;;  %v422_v58 = vadd.f32 %v4465_v2, %v406_v35  ;;  %v237_v35 = vmul.f32 %v4460_v1, %v215_v13 }
  0x79   :  { %1480 = vrot.lane.b32.xlu1 %v3836_v47, %s4221_s24 }
  0x7a   :  { %708 = vrot.lane.b32.xlu0 %v3836_v47, %s4214_s13  ;;  %439 = vst.msk [vmem:[#allocation2 + $0x391] sm:$0xff] %vm47_vm0, %v422_v58  ;;  %v3774_v47 = vpack.c.bf16 %v899_v39, %v899_v39  ;;  %v3776_v58 = vpack.c.bf16 %v901_v23, %v901_v23  ;;  %v259_v59 = vadd.f32 %v4465_v2, %v237_v35  ;;  %v647_v23 = vld [vmem:[#allocation2 + $0x351] sm:$0xff] }
  0x7b   :  { %4044 = vmatpush3.bf16.msra.mxu0 %v4105_v54  ;;  %v3789_v54 = vpack.c.bf16 %v1027_v46, %v1027_v46  ;;  %v4871_v52 = vpack.c.bf16 %v647_v23, %v647_v23  ;;  %v774_v35 = vld [vmem:[#allocation2 + $0x471] sm:$0xff] }
  0x7c   :  { %276 = vst.msk [vmem:[#allocation2 + $0x121] sm:$0xff] %vm47_vm0, %v259_v59  ;;  %v4880_v59 = vpack.c.bf16 %v774_v35, %v774_v35 }
  0x7d   :  { %1605 = vrot.lane.b32.xlu1 %v4553_v30, %s4222_s29  ;;  %v486_v30 = vmul.f32 %v4460_v1, %v454_v61  ;;  %v1028_v61 = vld [vmem:[#allocation2 + $0x61] sm:$0xff] }
  0x7e   :  { %1607 = vrot.lane.b32.xlu0 %v4583_v53, %s4222_s29  ;;  %v488_v53 = vmul.f32 %v4460_v1, %v456_v5 }
  0x7f   :  { %v502_v3 = vadd.f32 %v4465_v2, %v486_v30  ;;  %v3791_v30 = vpack.c.bf16 %v1029_v56, %v1029_v56 }
  0x80   :  { %v504_v12 = vadd.f32 %v4465_v2, %v488_v53  ;;  %v3792_v53 = vpack.c.bf16 %v1030_v4, %v1030_v4  ;;  %v3729_v2 = vpack.c.bf16 %v547_v33, %v547_v33 }
  0x81   :  { %710 = vrot.lane.b32.xlu1 %v4736_v57, %s4214_s13  ;;  %519 = vst.msk [vmem:[#allocation2 + $0x4b1] sm:$0xff] %vm47_vm0, %v502_v3  ;;  %v3790_v3 = vpack.c.bf16 %v1028_v61, %v1028_v61  ;;  %v776_v61 = vld [vmem:[#allocation2 + $0x491] sm:$0xff] }
  0x82   :  { %712 = vrot.lane.b32.xlu0 %v4742_v62, %s4214_s13  ;;  %521 = vst.msk [vmem:[#allocation2 + $0x4d1] sm:$0xff] %vm47_vm0, %v504_v12  ;;  %v3806_v12 = vpack.c.bf16 %v1157_v9, %v1157_v9  ;;  %v4888_v4 = vpack.c.bf16 %v776_v61, %v776_v61 }
  0x83   :  { %628 = vst.msk [vmem:[#allocation4 + $0x20] sm:$0xf] %vm619_vm3, %v3729_v2  ;;  %v1162_v2 = vld [vmem:[#allocation2 + $0x211] sm:$0xff] }
  0x85   :  { %1609 = vrot.lane.b32.xlu1 %v3852_v0, %s4222_s29 }
  0x86   :  { %837 = vrot.lane.b32.xlu0 %v3852_v0, %s4216_s3  ;;  %v1156_v0 = vld [vmem:[#allocation2 + $0x191] sm:$0xff] }
  0x87   :  { %v3805_v5 = vpack.c.bf16 %v1156_v0, %v1156_v0 }
  0x88   :  { %v1293_v25 = vld [vmem:[#allocation2 + $0x4b0] sm:$0xff] }
  0x89   :  { %714 = vrot.lane.b32.xlu1 %v4756_v11, %s4214_s13  ;;  %v4822_v28 = vpack.c.bf16 %v1293_v25, %v1293_v25  ;;  %v1032_v25 = vld [vmem:[#allocation2 + $0xc1] sm:$0xff] }
  0x8a   :  { %841 = vrot.lane.b32.xlu0 %v4761_v17, %s4216_s3 }
  0x8b   :  { %633 = vst.msk [vmem:[#allocation4 + $0x34] sm:$0xf] %vm619_vm3, %v4822_v28 }
  0x8d   :  { %839 = vrot.lane.b32.xlu1 %v4769_v22, %s4216_s3 }
  0x8e   :  { %966 = vrot.lane.b32.xlu0 %v3773_v31, %s4217_s4 }
  0x91   :  { %843 = vrot.lane.b32.xlu1 %v4781_v37, %s4216_s3 }
  0x92   :  { %970 = vrot.lane.b32.xlu0 %v3775_v43, %s4217_s4 }
  0x95   :  { %968 = vrot.lane.b32.xlu1 %v3774_v47, %s4217_s4  ;;  %v773_v47 = vld [vmem:[#allocation2 + $0x461] sm:$0xff] }
  0x96   :  { %1095 = vrot.lane.b32.xlu0 %v3789_v54, %s4218_s19  ;;  %v3761_v13 = vpack.c.bf16 %v773_v47, %v773_v47 }
  0x99   :  { %972 = vrot.lane.b32.xlu1 %v3776_v58, %s4217_s4  ;;  %v902_v58 = vld [vmem:[#allocation2 + $0x1f0] sm:$0xff] }
  0x9a   :  { %1099 = vrot.lane.b32.xlu0 %v3791_v30, %s4218_s19  ;;  %v3777_v0 = vpack.c.bf16 %v902_v58, %v902_v58  ;;  %v1550_v58 = vld [vmem:[#allocation2 + $0x4a1] sm:$0xff] }
  0x9d   :  { %1097 = vrot.lane.b32.xlu1 %v3790_v3, %s4218_s19  ;;  %v904_v3 = vld [vmem:[#allocation2 + $0x210] sm:$0xff] }
  0x9e   :  { %1224 = vrot.lane.b32.xlu0 %v3805_v5, %s4219_s20  ;;  %v3779_v9 = vpack.c.bf16 %v904_v3, %v904_v3 }
  0xa1   :  { %1101 = vrot.lane.b32.xlu1 %v3792_v53, %s4218_s19 }
  0xa2   :  { %1228 = vrot.lane.b32.xlu0 %v3807_v10, %s4219_s20  ;;  %v1031_v10 = vld [vmem:[#allocation2 + $0xb1] sm:$0xff] }
  0xa5   :  { %1226 = vrot.lane.b32.xlu1 %v3806_v12, %s4219_s20  ;;  %v3778_v12 = vpack.c.bf16 %v903_v7, %v903_v7 }
  0xa6   :  { %1353 = vrot.lane.b32.xlu0 %v4598_v6, %s4220_s21  ;;  %v3824_v6 = vpack.c.bf16 %v1288_v20, %v1288_v20  ;;  %v3780_v20 = vpack.c.bf16 %v905_v15, %v905_v15 }
  0xa9   :  { %1230 = vrot.lane.b32.xlu1 %v3808_v18, %s4219_s20  ;;  %v3793_v18 = vpack.c.bf16 %v1031_v10, %v1031_v10 }
  0xaa   :  { %1357 = vrot.lane.b32.xlu0 %v4601_v8, %s4220_s21  ;;  %v1295_v8 = vld [vmem:[#allocation2 + $0x4d0] sm:$0xff] }
  0xab   :  { %v4835_v1 = vpack.c.bf16 %v1295_v8, %v1295_v8  ;;  %v1034_v8 = vld [vmem:[#allocation2 + $0xe1] sm:$0xff] }
  0xac   :  { %v3796_v42 = vpack.c.bf16 %v1034_v8, %v1034_v8 }
  0xad   :  { %1355 = vrot.lane.b32.xlu1 %v4595_v63, %s4220_s21  ;;  %635 = vst.msk [vmem:[#allocation4 + $0x3c] sm:$0xf] %vm619_vm3, %v4835_v1 }
  0xae   :  { %v701_v31 = vpop.permute.xlu0 %700  ;;  %1482 = vrot.lane.b32.xlu0 %v4736_v57, %s4221_s24  ;;  %v644_v57 = vld [vmem:[#allocation2 + $0x321] sm:$0xff] }
  0xaf   :  { %749 = vst.msk [vmem:[#allocation4] sm:$0xf] %vm748_vm5, %v701_v31  ;;  %v3745_v39 = vpack.c.bf16 %v644_v57, %v644_v57  ;;  %v1160_v31 = vld [vmem:[#allocation2 + $0x1f1] sm:$0xff] }
  0xb0   :  { %v3809_v33 = vpack.c.bf16 %v1160_v31, %v1160_v31 }
  0xb1   :  { %1359 = vrot.lane.b32.xlu1 %v3824_v6, %s4220_s21  ;;  %v3794_v6 = vpack.c.bf16 %v1032_v25, %v1032_v25 }
  0xb2   :  { %v830_v63 = vpop.permute.xlu0 %829  ;;  %1486 = vrot.lane.b32.xlu0 %v4756_v11, %s4221_s24  ;;  %v645_v11 = vld [vmem:[#allocation2 + $0x331] sm:$0xff] }
  0xb3   :  { %878 = vst.msk [vmem:[#allocation4] sm:$0xf] %vm877_vm6, %v830_v63  ;;  %v4856_v45 = vpack.c.bf16 %v645_v11, %v645_v11 }
  0xb5   :  { %1484 = vrot.lane.b32.xlu1 %v4742_v62, %s4221_s24  ;;  %v646_v62 = vld [vmem:[#allocation2 + $0x341] sm:$0xff] }
  0xb6   :  { %1611 = vrot.lane.b32.xlu0 %v4769_v22, %s4222_s29  ;;  %v4861_v49 = vpack.c.bf16 %v646_v62, %v646_v62 }
  0xb7   :  { %v705_v48 = vpop.permute.xlu1 %704 }
  0xb8   :  { %751 = vst.msk [vmem:[#allocation4 + $0x8] sm:$0xf] %vm748_vm5, %v705_v48  ;;  %v703_v41 = vpop.permute.xlu0 %702 }
  0xb9   :  { %1488 = vrot.lane.b32.xlu1 %v3840_v38, %s4221_s24  ;;  %750 = vst.msk [vmem:[#allocation4 + $0x4] sm:$0xf] %vm748_vm5, %v703_v41  ;;  %v1161_v38 = vld [vmem:[#allocation2 + $0x201] sm:$0xff] }
  0xba   :  { %716 = vrot.lane.b32.xlu0 %v3745_v39, %s4214_s13  ;;  %v3811_v39 = vpack.c.bf16 %v1162_v2, %v1162_v2  ;;  %v3810_v41 = vpack.c.bf16 %v1161_v38, %v1161_v38 }
  0xbb   :  { %v707_v43 = vpop.permute.xlu1 %706 }
  0xbc   :  { %752 = vst.msk [vmem:[#allocation4 + $0xc] sm:$0xf] %vm748_vm5, %v707_v43  ;;  %v834_v22 = vpop.permute.xlu0 %833  ;;  %v1163_v43 = vld [vmem:[#allocation2 + $0x221] sm:$0xff] }
  0xbd   :  { %1613 = vrot.lane.b32.xlu1 %v4761_v17, %s4222_s29  ;;  %880 = vst.msk [vmem:[#allocation4 + $0x8] sm:$0xf] %vm877_vm6, %v834_v22  ;;  %v3856_v17 = vpack.c.bf16 %v1546_v24, %v1546_v24  ;;  %v3812_v22 = vpack.c.bf16 %v1163_v43, %v1163_v43 }
  0xbe   :  { %1615 = vrot.lane.b32.xlu0 %v4781_v37, %s4222_s29  ;;  %v775_v37 = vld [vmem:[#allocation2 + $0x481] sm:$0xff] }
  0xbf   :  { %v832_v46 = vpop.permute.xlu1 %831  ;;  %v4875_v56 = vpack.c.bf16 %v775_v37, %v775_v37 }
  0xc0   :  { %879 = vst.msk [vmem:[#allocation4 + $0x4] sm:$0xf] %vm877_vm6, %v832_v46  ;;  %v959_v50 = vpop.permute.xlu0 %958 }
  0xc1   :  { %718 = vrot.lane.b32.xlu1 %v4856_v45, %s4214_s13  ;;  %1007 = vst.msk [vmem:[#allocation4] sm:$0xf] %vm1006_vm7, %v959_v50 }
  0xc2   :  { %720 = vrot.lane.b32.xlu0 %v4861_v49, %s4214_s13 }
  0xc3   :  { %v836_v51 = vpop.permute.xlu1 %835 }
  0xc4   :  { %881 = vst.msk [vmem:[#allocation4 + $0xc] sm:$0xf] %vm877_vm6, %v836_v51  ;;  %v963_v54 = vpop.permute.xlu0 %962 }
  0xc5   :  { %1617 = vrot.lane.b32.xlu1 %v3856_v17, %s4222_s29  ;;  %1009 = vst.msk [vmem:[#allocation4 + $0x8] sm:$0xf] %vm1006_vm7, %v963_v54  ;;  %v650_v54 = vld [vmem:[#allocation2 + $0x381] sm:$0xff] }
  0xc6   :  { %845 = vrot.lane.b32.xlu0 %v3761_v13, %s4216_s3  ;;  %v4954_v61 = vpack.c.bf16 %v650_v54, %v650_v54  ;;  %v1296_v54 = vld [vmem:[#allocation2 + $0x4e0] sm:$0xff] }
  0xc7   :  { %v961_v55 = vpop.permute.xlu1 %960 }
  0xc8   :  { %1008 = vst.msk [vmem:[#allocation4 + $0x4] sm:$0xf] %vm1006_vm7, %v961_v55  ;;  %v1088_v60 = vpop.permute.xlu0 %1087 }
  0xc9   :  { %722 = vrot.lane.b32.xlu1 %v4871_v52, %s4214_s13  ;;  %1136 = vst.msk [vmem:[#allocation4] sm:$0xf] %vm1135_vm8, %v1088_v60 }
  0xca   :  { %849 = vrot.lane.b32.xlu0 %v4875_v56, %s4216_s3 }
  0xcb   :  { %v965_v30 = vpop.permute.xlu1 %964 }
  0xcc   :  { %1010 = vst.msk [vmem:[#allocation4 + $0xc] sm:$0xf] %vm1006_vm7, %v965_v30  ;;  %v1092_v5 = vpop.permute.xlu0 %1091 }
  0xcd   :  { %847 = vrot.lane.b32.xlu1 %v4880_v59, %s4216_s3  ;;  %1138 = vst.msk [vmem:[#allocation4 + $0x8] sm:$0xf] %vm1135_vm8, %v1092_v5 }
  0xce   :  { %974 = vrot.lane.b32.xlu0 %v3777_v0, %s4217_s4  ;;  %v651_v0 = vld [vmem:[#allocation2 + $0x391] sm:$0xff] }
  0xcf   :  { %v1090_v53 = vpop.permute.xlu1 %1089  ;;  %v4965_v5 = vpack.c.bf16 %v651_v0, %v651_v0 }
  0xd0   :  { %1137 = vst.msk [vmem:[#allocation4 + $0x4] sm:$0xf] %vm1135_vm8, %v1090_v53  ;;  %v1217_v14 = vpop.permute.xlu0 %1216  ;;  %v778_v53 = vld [vmem:[#allocation2 + $0x4b1] sm:$0xff] }
  0xd1   :  { %851 = vrot.lane.b32.xlu1 %v4888_v4, %s4216_s3  ;;  %1265 = vst.msk [vmem:[#allocation4] sm:$0xf] %vm1264_vm9, %v1217_v14  ;;  %v4974_v14 = vpack.c.bf16 %v778_v53, %v778_v53 }
  0xd2   :  { %978 = vrot.lane.b32.xlu0 %v3779_v9, %s4217_s4 }
  0xd3   :  { %v1094_v16 = vpop.permute.xlu1 %1093 }
  0xd4   :  { %1139 = vst.msk [vmem:[#allocation4 + $0xc] sm:$0xf] %vm1135_vm8, %v1094_v16  ;;  %v1221_v21 = vpop.permute.xlu0 %1220  ;;  %v780_v16 = vld [vmem:[#allocation2 + $0x4d1] sm:$0xff] }
  0xd5   :  { %976 = vrot.lane.b32.xlu1 %v3778_v12, %s4217_s4  ;;  %1267 = vst.msk [vmem:[#allocation4 + $0x8] sm:$0xf] %vm1264_vm9, %v1221_v21  ;;  %v906_v12 = vld [vmem:[#allocation2 + $0x230] sm:$0xff]  ;;  %v4982_v21 = vpack.c.bf16 %v780_v16, %v780_v16 }
  0xd6   :  { %1103 = vrot.lane.b32.xlu0 %v3793_v18, %s4218_s19  ;;  %v3781_v19 = vpack.c.bf16 %v906_v12, %v906_v12  ;;  %v2709_v16 = vld [vmem:[#allocation3 + $0x90] sm:$0xff] }
  0xd7   :  { %v1219_v26 = vpop.permute.xlu1 %1218 }
  0xd8   :  { %1266 = vst.msk [vmem:[#allocation4 + $0x4] sm:$0xf] %vm1264_vm9, %v1219_v26  ;;  %v1346_v32 = vpop.permute.xlu0 %1345  ;;  %v907_v26 = vld [vmem:[#allocation2 + $0x240] sm:$0xff] }
  0xd9   :  { %980 = vrot.lane.b32.xlu1 %v3780_v20, %s4217_s4  ;;  %1394 = vst.msk [vmem:[#allocation4] sm:$0xf] %vm1393_vm10, %v1346_v32  ;;  %v908_v20 = vld [vmem:[#allocation2 + $0x250] sm:$0xff]  ;;  %v3782_v32 = vpack.c.bf16 %v907_v26, %v907_v26 }
  0xda   :  { %1107 = vrot.lane.b32.xlu0 %v3795_v29, %s4218_s19  ;;  %v3783_v31 = vpack.c.bf16 %v908_v20, %v908_v20  ;;  %v2837_v26 = vld [vmem:[#allocation3 + $0x91] sm:$0xff] }
  0xdb   :  { %v1223_v63 = vpop.permute.xlu1 %1222 }
  0xdc   :  { %1268 = vst.msk [vmem:[#allocation4 + $0xc] sm:$0xf] %vm1264_vm9, %v1223_v63  ;;  %v1350_v57 = vpop.permute.xlu0 %1349  ;;  %v909_v63 = vld [vmem:[#allocation2 + $0x260] sm:$0xff] }
  0xdd   :  { %1105 = vrot.lane.b32.xlu1 %v3794_v6, %s4218_s19  ;;  %1396 = vst.msk [vmem:[#allocation4 + $0x8] sm:$0xf] %vm1393_vm10, %v1350_v57  ;;  %v1035_v6 = vld [vmem:[#allocation2 + $0xf1] sm:$0xff]  ;;  %v3784_v57 = vpack.c.bf16 %v909_v63, %v909_v63 }
  0xde   :  { %1232 = vrot.lane.b32.xlu0 %v3809_v33, %s4219_s20  ;;  %v3797_v2 = vpack.c.bf16 %v1035_v6, %v1035_v6 }
  0xdf   :  { %v1348_v48 = vpop.permute.xlu1 %1347 }
  0xe0   :  { %1395 = vst.msk [vmem:[#allocation4 + $0x4] sm:$0xf] %vm1393_vm10, %v1348_v48  ;;  %v1475_v11 = vpop.permute.xlu0 %1474  ;;  %v1036_v48 = vld [vmem:[#allocation2 + $0x101] sm:$0xff] }
  0xe1   :  { %1109 = vrot.lane.b32.xlu1 %v3796_v42, %s4218_s19  ;;  %1523 = vst.msk [vmem:[#allocation4] sm:$0xf] %vm1522_vm11, %v1475_v11  ;;  %v1037_v42 = vld [vmem:[#allocation2 + $0x111] sm:$0xff]  ;;  %v3798_v43 = vpack.c.bf16 %v1036_v48, %v1036_v48 }
  0xe2   :  { %1236 = vrot.lane.b32.xlu0 %v3811_v39, %s4219_s20  ;;  %v1164_v11 = vld [vmem:[#allocation2 + $0x231] sm:$0xff] }
  0xe3   :  { %v1352_v62 = vpop.permute.xlu1 %1351 }
  0xe4   :  { %1397 = vst.msk [vmem:[#allocation4 + $0xc] sm:$0xf] %vm1393_vm10, %v1352_v62  ;;  %v1479_v24 = vpop.permute.xlu0 %1478 }
  0xe5   :  { %1234 = vrot.lane.b32.xlu1 %v3810_v41, %s4219_s20  ;;  %1525 = vst.msk [vmem:[#allocation4 + $0x8] sm:$0xf] %vm1522_vm11, %v1479_v24  ;;  %v3799_v41 = vpack.c.bf16 %v1037_v42, %v1037_v42 }
  0xe6   :  { %1361 = vrot.lane.b32.xlu0 %v4681_v36, %s4220_s21 }
  0xe7   :  { %v1477_v46 = vpop.permute.xlu1 %1476 }
  0xe8   :  { %1524 = vst.msk [vmem:[#allocation4 + $0x4] sm:$0xf] %vm1522_vm11, %v1477_v46  ;;  %v1604_v47 = vpop.permute.xlu0 %1603  ;;  %v3813_v46 = vpack.c.bf16 %v1164_v11, %v1164_v11 }
  0xe9   :  { %1238 = vrot.lane.b32.xlu1 %v3812_v22, %s4219_s20  ;;  %1652 = vst.msk [vmem:[#allocation4] sm:$0xf] %vm1651_vm12, %v1604_v47  ;;  %v1038_v22 = vld [vmem:[#allocation2 + $0x121] sm:$0xff]  ;;  %v1166_v47 = vld [vmem:[#allocation2 + $0x251] sm:$0xff] }
  0xea   :  { %1365 = vrot.lane.b32.xlu0 %v4698_v40, %s4220_s21  ;;  %v1421_v40 = vld [vmem:[#allocation2 + $0x361] sm:$0xff] }
  0xeb   :  { %v1481_v17 = vpop.permute.xlu1 %1480 }
  0xec   :  { %1526 = vst.msk [vmem:[#allocation4 + $0xc] sm:$0xf] %vm1522_vm11, %v1481_v17  ;;  %v709_v50 = vpop.permute.xlu0 %708  ;;  %v3800_v17 = vpack.c.bf16 %v1038_v22, %v1038_v22 }
  0xed   :  { %1363 = vrot.lane.b32.xlu1 %v4679_v34, %s4220_s21  ;;  %753 = vst.msk [vmem:[#allocation4 + $0x10] sm:$0xf] %vm748_vm5, %v709_v50  ;;  %v3844_v34 = vpack.c.bf16 %v1421_v40, %v1421_v40  ;;  %v3815_v40 = vpack.c.bf16 %v1166_v47, %v1166_v47 }
  0xee   :  { %1490 = vrot.lane.b32.xlu0 %v4856_v45, %s4221_s24 }
  0xef   :  { %v1606_v36 = vpop.permute.xlu1 %1605 }
  0xf0   :  { %1653 = vst.msk [vmem:[#allocation4 + $0x4] sm:$0xf] %vm1651_vm12, %v1606_v36  ;;  %v1608_v23 = vpop.permute.xlu0 %1607  ;;  %v1165_v36 = vld [vmem:[#allocation2 + $0x241] sm:$0xff] }
  0xf1   :  { %1367 = vrot.lane.b32.xlu1 %v4706_v44, %s4220_s21  ;;  %1654 = vst.msk [vmem:[#allocation4 + $0x8] sm:$0xf] %vm1651_vm12, %v1608_v23 }
  0xf2   :  { %1494 = vrot.lane.b32.xlu0 %v4871_v52, %s4221_s24 }
  0xf3   :  { %v711_v51 = vpop.permute.xlu1 %710 }
  0xf4   :  { %754 = vst.msk [vmem:[#allocation4 + $0x14] sm:$0xf] %vm748_vm5, %v711_v51  ;;  %v713_v45 = vpop.permute.xlu0 %712  ;;  %v3814_v51 = vpack.c.bf16 %v1165_v36, %v1165_v36 }
  0xf5   :  { %1492 = vrot.lane.b32.xlu1 %v4861_v49, %s4221_s24  ;;  %755 = vst.msk [vmem:[#allocation4 + $0x18] sm:$0xf] %vm748_vm5, %v713_v45  ;;  %v649_v49 = vld [vmem:[#allocation2 + $0x371] sm:$0xff]  ;;  %v1167_v45 = vld [vmem:[#allocation2 + $0x261] sm:$0xff] }
  0xf6   :  { %1619 = vrot.lane.b32.xlu0 %v4880_v59, %s4222_s29  ;;  %v4949_v35 = vpack.c.bf16 %v649_v49, %v649_v49 }
  0xf7   :  { %v1610_v13 = vpop.permute.xlu1 %1609  ;;  %v4104_v44 = vld [vmem:[#allocation4] sm:$0xff]  }
  0xf8   :  { %1655 = vst.msk [vmem:[#allocation4 + $0xc] sm:$0xf] %vm1651_vm12, %v1610_v13  ;;  %4045 = vmatprep.mubr.msk.bf16.mxu0 %vm1760_vm13, %v4104_v44  ;;  %v838_v37 = vpop.permute.xlu0 %837  ;;  %v3816_v44 = vpack.c.bf16 %v1167_v45, %v1167_v45 }
  0xf9   :  { %1496 = vrot.lane.b32.xlu1 %v3844_v34, %s4221_s24  ;;  %882 = vst.msk [vmem:[#allocation4 + $0x10] sm:$0xf] %vm877_vm6, %v838_v37 }
  0xfa   :  { %724 = vrot.lane.b32.xlu0 %v3844_v34, %s4214_s13 }
  0xfb   :  { %v715_v52 = vpop.permute.xlu1 %714 }
  0xfc   :  { %756 = vst.msk [vmem:[#allocation4 + $0x1c] sm:$0xf] %vm748_vm5, %v715_v52  ;;  %v842_v55 = vpop.permute.xlu0 %841 }
  0xfd   :  { %1621 = vrot.lane.b32.xlu1 %v4875_v56, %s4222_s29  ;;  %884 = vst.msk [vmem:[#allocation4 + $0x18] sm:$0xf] %vm877_vm6, %v842_v55  ;;  %v3860_v56 = vpack.c.bf16 %v1550_v58, %v1550_v58  ;;  %v3832_v58 = vpack.c.bf16 %v1296_v54, %v1296_v54 }
  0xfe   :  { %1623 = vrot.lane.b32.xlu0 %v4888_v4, %s4222_s29  ;;  %v779_v4 = vld [vmem:[#allocation2 + $0x4c1] sm:$0xff] }
  0xff   :  { %v840_v59 = vpop.permute.xlu1 %839  ;;  %v4106_v60 = vld [vmem:[#allocation4 + $0x8] sm:$0xff]   ;;  %v4969_v10 = vpack.c.bf16 %v779_v4, %v779_v4 }
 0x100   :  { %883 = vst.msk [vmem:[#allocation4 + $0x14] sm:$0xf] %vm877_vm6, %v840_v59  ;;  %4046 = vmatmul.mubr.msk.bf16.vlgmr.msra.gmra.mxu0 %vm1760_vm13, %v4106_v60  ;;  %v967_v30 = vpop.permute.xlu0 %966  ;;  %v1554_v4 = vld [vmem:[#allocation2 + $0x4e1] sm:$0xff] }
 0x101   :  { %726 = vrot.lane.b32.xlu1 %v4949_v35, %s4214_s13  ;;  %1011 = vst.msk [vmem:[#allocation4 + $0x10] sm:$0xf] %vm1006_vm7, %v967_v30 }
 0x102   :  { %728 = vrot.lane.b32.xlu0 %v4954_v61, %s4214_s13 }
 0x103   :  { %v844_v3 = vpop.permute.xlu1 %843 }
 0x104   :  { %885 = vst.msk [vmem:[#allocation4 + $0x1c] sm:$0xf] %vm877_vm6, %v844_v3  ;;  %v971_v7 = vpop.permute.xlu0 %970 }
 0x105   :  { %1625 = vrot.lane.b32.xlu1 %v3860_v56, %s4222_s29  ;;  %1013 = vst.msk [vmem:[#allocation4 + $0x18] sm:$0xf] %vm1006_vm7, %v971_v7 }
 0x106   :  { %853 = vrot.lane.b32.xlu0 %v3860_v56, %s4216_s3 }
 0x107   :  { %v969_v9 = vpop.permute.xlu1 %968 }
 0x108   :  { %1012 = vst.msk [vmem:[#allocation4 + $0x14] sm:$0xf] %vm1006_vm7, %v969_v9  ;;  %v1096_v15 = vpop.permute.xlu0 %1095 }
 0x109   :  { %730 = vrot.lane.b32.xlu1 %v4965_v5, %s4214_s13  ;;  %1140 = vst.msk [vmem:[#allocation4 + $0x10] sm:$0xf] %vm1135_vm8, %v1096_v15 }
 0x10a   :  { %857 = vrot.lane.b32.xlu0 %v4969_v10, %s4216_s3 }
 0x10b   :  { %v973_v18 = vpop.permute.xlu1 %972 }
 0x10c   :  { %1014 = vst.msk [vmem:[#allocation4 + $0x1c] sm:$0xf] %vm1006_vm7, %v973_v18  ;;  %v1100_v25 = vpop.permute.xlu0 %1099  ;;  %v2061_v18 = vld [vmem:[#allocation3 + $0x1] sm:$0xff] }
 0x10d   :  { %855 = vrot.lane.b32.xlu1 %v4974_v14, %s4216_s3  ;;  %1142 = vst.msk [vmem:[#allocation4 + $0x18] sm:$0xf] %vm1135_vm8, %v1100_v25  ;;  %v3881_v20 = vpack.c.bf16 %v2061_v18, %v2061_v18 }
 0x10e   :  { %982 = vrot.lane.b32.xlu0 %v3781_v19, %s4217_s4  ;;  %v3968_v19 = vpack.c.bf16 %v2709_v16, %v2709_v16  ;;  %v1965_v16 = vld [vmem:[#allocation3] sm:$0xff] }
 0x10f   :  { %v1098_v29 = vpop.permute.xlu1 %1097 }
 0x110   :  { %1141 = vst.msk [vmem:[#allocation4 + $0x14] sm:$0xf] %vm1135_vm8, %v1098_v29  ;;  %v1225_v8 = vpop.permute.xlu0 %1224  ;;  %v2189_v29 = vld [vmem:[#allocation3 + $0x2] sm:$0xff] }
 0x111   :  { %859 = vrot.lane.b32.xlu1 %v4982_v21, %s4216_s3  ;;  %1269 = vst.msk [vmem:[#allocation4 + $0x10] sm:$0xf] %vm1264_vm9, %v1225_v8  ;;  %v3897_v6 = vpack.c.bf16 %v2189_v29, %v2189_v29  ;;  %v5122_v29 = vld [vmem:[%s5694_s6] ss:$0 sm:$0xff] }
 0x112   :  { %986 = vrot.lane.b32.xlu0 %v3783_v31, %s4217_s4  ;;  %v3984_v31 = vpack.c.bf16 %v2837_v26, %v2837_v26 }
 0x113   :  { %v1102_v33 = vpop.permute.xlu1 %1101 }
 0x114   :  { %1143 = vst.msk [vmem:[#allocation4 + $0x1c] sm:$0xf] %vm1135_vm8, %v1102_v33  ;;  %v1229_v38 = vpop.permute.xlu0 %1228 }
 0x115   :  { %984 = vrot.lane.b32.xlu1 %v3782_v32, %s4217_s4  ;;  %1271 = vst.msk [vmem:[#allocation4 + $0x18] sm:$0xf] %vm1264_vm9, %v1229_v38 }
 0x116   :  { %1111 = vrot.lane.b32.xlu0 %v3797_v2, %s4218_s19 }
 0x117   :  { %v1227_v39 = vpop.permute.xlu1 %1226 }
 0x118   :  { %1270 = vst.msk [vmem:[#allocation4 + $0x14] sm:$0xf] %vm1264_vm9, %v1227_v39  ;;  %v1354_v62 = vpop.permute.xlu0 %1353 }
 0x119   :  { %988 = vrot.lane.b32.xlu1 %v3784_v57, %s4217_s4  ;;  %1398 = vst.msk [vmem:[#allocation4 + $0x10] sm:$0xf] %vm1393_vm10, %v1354_v62 }
 0x11a   :  { %1115 = vrot.lane.b32.xlu0 %v3799_v41, %s4218_s19 }
 0x11b   :  { %v1231_v24 = vpop.permute.xlu1 %1230 }
 0x11c   :  { %1272 = vst.msk [vmem:[#allocation4 + $0x1c] sm:$0xf] %vm1264_vm9, %v1231_v24  ;;  %v1358_v50 = vpop.permute.xlu0 %1357 }
 0x11d   :  { %1113 = vrot.lane.b32.xlu1 %v3798_v43, %s4218_s19  ;;  %1400 = vst.msk [vmem:[#allocation4 + $0x18] sm:$0xf] %vm1393_vm10, %v1358_v50 }
 0x11e   :  { %1240 = vrot.lane.b32.xlu0 %v3813_v46, %s4219_s20 }
 0x11f   :  { %v1356_v23 = vpop.permute.xlu1 %1355 }
 0x120   :  { %1399 = vst.msk [vmem:[#allocation4 + $0x14] sm:$0xf] %vm1393_vm10, %v1356_v23  ;;  %v1483_v34 = vpop.permute.xlu0 %1482 }
 0x121   :  { %1117 = vrot.lane.b32.xlu1 %v3800_v17, %s4218_s19  ;;  %1527 = vst.msk [vmem:[#allocation4 + $0x10] sm:$0xf] %vm1522_vm11, %v1483_v34 }
 0x122   :  { %1244 = vrot.lane.b32.xlu0 %v3815_v40, %s4219_s20 }
 0x123   :  { %v1360_v13 = vpop.permute.xlu1 %1359 }
 0x124   :  { %1401 = vst.msk [vmem:[#allocation4 + $0x1c] sm:$0xf] %vm1393_vm10, %v1360_v13  ;;  %v1487_v37 = vpop.permute.xlu0 %1486 }
 0x125   :  { %1242 = vrot.lane.b32.xlu1 %v3814_v51, %s4219_s20  ;;  %1529 = vst.msk [vmem:[#allocation4 + $0x18] sm:$0xf] %vm1522_vm11, %v1487_v37 }
 0x126   :  { %1369 = vrot.lane.b32.xlu0 %v4822_v28, %s4220_s21 }
 0x127   :  { %v1485_v49 = vpop.permute.xlu1 %1484 }
 0x128   :  { %1528 = vst.msk [vmem:[#allocation4 + $0x14] sm:$0xf] %vm1522_vm11, %v1485_v49  ;;  %v1612_v52 = vpop.permute.xlu0 %1611 }
 0x129   :  { %1246 = vrot.lane.b32.xlu1 %v3816_v44, %s4219_s20  ;;  %1656 = vst.msk [vmem:[#allocation4 + $0x10] sm:$0xf] %vm1651_vm12, %v1612_v52 }
 0x12a   :  { %1373 = vrot.lane.b32.xlu0 %v4835_v1, %s4220_s21  ;;  %v1425_v1 = vld [vmem:[#allocation2 + $0x3a1] sm:$0xff] }
 0x12b   :  { %v1489_v55 = vpop.permute.xlu1 %1488 }
 0x12c   :  { %1530 = vst.msk [vmem:[#allocation4 + $0x1c] sm:$0xf] %vm1522_vm11, %v1489_v55  ;;  %v717_v59 = vpop.permute.xlu0 %716 }
 0x12d   :  { %1371 = vrot.lane.b32.xlu1 %v4820_v27, %s4220_s21  ;;  %757 = vst.msk [vmem:[#allocation4 + $0x20] sm:$0xf] %vm748_vm5, %v717_v59  ;;  %v3848_v27 = vpack.c.bf16 %v1425_v1, %v1425_v1 }
 0x12e   :  { %1498 = vrot.lane.b32.xlu0 %v4949_v35, %s4221_s24 }
 0x12f   :  { %v1614_v28 = vpop.permute.xlu1 %1613 }
 0x130   :  { %1657 = vst.msk [vmem:[#allocation4 + $0x14] sm:$0xf] %vm1651_vm12, %v1614_v28  ;;  %v1616_v60 = vpop.permute.xlu0 %1615 }
 0x131   :  { %1375 = vrot.lane.b32.xlu1 %v3832_v58, %s4220_s21  ;;  %1658 = vst.msk [vmem:[#allocation4 + $0x18] sm:$0xf] %vm1651_vm12, %v1616_v60 }
 0x132   :  { %1502 = vrot.lane.b32.xlu0 %v4965_v5, %s4221_s24  ;;  %v3864_v5 = vpack.c.bf16 %v1554_v4, %v1554_v4 }
 0x133   :  { %v719_v56 = vpop.permute.xlu1 %718 }
 0x134   :  { %758 = vst.msk [vmem:[#allocation4 + $0x24] sm:$0xf] %vm748_vm5, %v719_v56  ;;  %v721_v30 = vpop.permute.xlu0 %720 }
 0x135   :  { %1500 = vrot.lane.b32.xlu1 %v4954_v61, %s4221_s24  ;;  %759 = vst.msk [vmem:[#allocation4 + $0x28] sm:$0xf] %vm748_vm5, %v721_v30 }
 0x136   :  { %1627 = vrot.lane.b32.xlu0 %v4974_v14, %s4222_s29 }
 0x137   :  { %v1618_v35 = vpop.permute.xlu1 %1617  ;;  %v4107_v0 = vld [vmem:[#allocation4 + $0x10] sm:$0xff]  }
 0x138   :  { %1659 = vst.msk [vmem:[#allocation4 + $0x1c] sm:$0xf] %vm1651_vm12, %v1618_v35  ;;  %4049 = vmatprep.mubr.msk.bf16.mxu0 %vm1760_vm13, %v4107_v0  ;;  %v846_v3 = vpop.permute.xlu0 %845 }
 0x139   :  { %1504 = vrot.lane.b32.xlu1 %v3848_v27, %s4221_s24  ;;  %886 = vst.msk [vmem:[#allocation4 + $0x20] sm:$0xf] %vm877_vm6, %v846_v3 }
 0x13a   :  { %1631 = vrot.lane.b32.xlu0 %v4982_v21, %s4222_s29 }
 0x13b   :  { %v723_v61 = vpop.permute.xlu1 %722 }
 0x13c   :  { %760 = vst.msk [vmem:[#allocation4 + $0x2c] sm:$0xf] %vm748_vm5, %v723_v61  ;;  %v850_v7 = vpop.permute.xlu0 %849 }
 0x13d   :  { %1629 = vrot.lane.b32.xlu1 %v4969_v10, %s4222_s29  ;;  %888 = vst.msk [vmem:[#allocation4 + $0x28] sm:$0xf] %vm877_vm6, %v850_v7 }
 0x13e   :  { %2125 = vrot.lane.b32.xlu0 %v3881_v20, %s4214_s13 }
 0x13f   :  { %v848_v53 = vpop.permute.xlu1 %847  ;;  %v4108_v9 = vld [vmem:[#allocation4 + $0x18] sm:$0xff]  }
 0x140   :  { %887 = vst.msk [vmem:[#allocation4 + $0x24] sm:$0xf] %vm877_vm6, %v848_v53  ;;  %4050 = vmatmul.mubr.msk.bf16.gmra.mxu0 %vm1760_vm13, %v4108_v9  ;;  %v975_v12 = vpop.permute.xlu0 %974 }
 0x141   :  { %1633 = vrot.lane.b32.xlu1 %v3864_v5, %s4222_s29  ;;  %1015 = vst.msk [vmem:[#allocation4 + $0x20] sm:$0xf] %vm1006_vm7, %v975_v12 }
 0x142   :  { %2253 = vrot.lane.b32.xlu0 %v3897_v6, %s4216_s3 }
 0x143   :  { %v852_v14 = vpop.permute.xlu1 %851 }
 0x144   :  { %889 = vst.msk [vmem:[#allocation4 + $0x2c] sm:$0xf] %vm877_vm6, %v852_v14  ;;  %v979_v15 = vpop.permute.xlu0 %978 }
 0x145   :  { %1017 = vst.msk [vmem:[#allocation4 + $0x28] sm:$0xf] %vm1006_vm7, %v979_v15  ;;  %2780 = vrot.lane.b32.xlu1 %v3968_v19, %s4220_s21  ;;  %v3865_v19 = vpack.c.bf16 %v1965_v16, %v1965_v16 }
 0x147   :  { %v977_v10 = vpop.permute.xlu1 %976  ;;  %2045 = vst.msk [vmem:[#allocation5] sm:$0xf] %vm619_vm3, %v3865_v19 }
 0x148   :  { %1016 = vst.msk [vmem:[#allocation4 + $0x24] sm:$0xf] %vm1006_vm7, %v977_v10  ;;  %v1104_v21 = vpop.permute.xlu0 %1103 }
 0x149   :  { %1144 = vst.msk [vmem:[#allocation4 + $0x20] sm:$0xf] %vm1135_vm8, %v1104_v21  ;;  %2908 = vrot.lane.b32.xlu1 %v3984_v31, %s4221_s24  ;;  %v5117_v21 = vld [vmem:[%s5693_s5] ss:$0 sm:$0xff] }
 0x14b   :  { %v981_v25 = vpop.permute.xlu1 %980 }
 0x14c   :  { %1018 = vst.msk [vmem:[#allocation4 + $0x2c] sm:$0xf] %vm1006_vm7, %v981_v25  ;;  %v1108_v32 = vpop.permute.xlu0 %1107 }
 0x14d   :  { %1146 = vst.msk [vmem:[#allocation4 + $0x28] sm:$0xf] %vm1135_vm8, %v1108_v32 }
 0x14f   :  { %v1106_v8 = vpop.permute.xlu1 %1105 }
 0x150   :  { %1145 = vst.msk [vmem:[#allocation4 + $0x24] sm:$0xf] %vm1135_vm8, %v1106_v8  ;;  %v1233_v63 = vpop.permute.xlu0 %1232 }
 0x151   :  { %1273 = vst.msk [vmem:[#allocation4 + $0x20] sm:$0xf] %vm1264_vm9, %v1233_v63 }
 0x153   :  { %v1110_v33 = vpop.permute.xlu1 %1109 }
 0x154   :  { %1147 = vst.msk [vmem:[#allocation4 + $0x2c] sm:$0xf] %vm1135_vm8, %v1110_v33  ;;  %v1237_v2 = vpop.permute.xlu0 %1236 }
 0x155   :  { %1275 = vst.msk [vmem:[#allocation4 + $0x28] sm:$0xf] %vm1264_vm9, %v1237_v2 }
 0x157   :  { %v1235_v42 = vpop.permute.xlu1 %1234 }
 0x158   :  { %1274 = vst.msk [vmem:[#allocation4 + $0x24] sm:$0xf] %vm1264_vm9, %v1235_v42  ;;  %v1362_v57 = vpop.permute.xlu0 %1361 }
 0x159   :  { %1402 = vst.msk [vmem:[#allocation4 + $0x20] sm:$0xf] %vm1393_vm10, %v1362_v57 }
 0x15b   :  { %v1239_v38 = vpop.permute.xlu1 %1238 }
 0x15c   :  { %1276 = vst.msk [vmem:[#allocation4 + $0x2c] sm:$0xf] %vm1264_vm9, %v1239_v38  ;;  %v1366_v48 = vpop.permute.xlu0 %1365 }
 0x15d   :  { %1404 = vst.msk [vmem:[#allocation4 + $0x28] sm:$0xf] %vm1393_vm10, %v1366_v48 }
 0x15f   :  { %v1364_v39 = vpop.permute.xlu1 %1363 }
 0x160   :  { %1403 = vst.msk [vmem:[#allocation4 + $0x24] sm:$0xf] %vm1393_vm10, %v1364_v39  ;;  %v1491_v41 = vpop.permute.xlu0 %1490 }
 0x161   :  { %1531 = vst.msk [vmem:[#allocation4 + $0x20] sm:$0xf] %vm1522_vm11, %v1491_v41 }
 0x163   :  { %v1368_v11 = vpop.permute.xlu1 %1367 }
 0x164   :  { %1405 = vst.msk [vmem:[#allocation4 + $0x2c] sm:$0xf] %vm1393_vm10, %v1368_v11  ;;  %v1495_v43 = vpop.permute.xlu0 %1494 }
 0x165   :  { %1533 = vst.msk [vmem:[#allocation4 + $0x28] sm:$0xf] %vm1522_vm11, %v1495_v43 }
 0x167   :  { %v1493_v62 = vpop.permute.xlu1 %1492 }
 0x168   :  { %1532 = vst.msk [vmem:[#allocation4 + $0x24] sm:$0xf] %vm1522_vm11, %v1493_v62  ;;  %v1620_v22 = vpop.permute.xlu0 %1619 }
 0x169   :  { %1660 = vst.msk [vmem:[#allocation4 + $0x20] sm:$0xf] %vm1651_vm12, %v1620_v22 }
 0x16b   :  { %v1497_v24 = vpop.permute.xlu1 %1496 }
 0x16c   :  { %1534 = vst.msk [vmem:[#allocation4 + $0x2c] sm:$0xf] %vm1522_vm11, %v1497_v24  ;;  %v725_v46 = vpop.permute.xlu0 %724 }
 0x16d   :  { %761 = vst.msk [vmem:[#allocation4 + $0x30] sm:$0xf] %vm748_vm5, %v725_v46 }
 0x16f   :  { %v1622_v47 = vpop.permute.xlu1 %1621 }
 0x170   :  { %1661 = vst.msk [vmem:[#allocation4 + $0x24] sm:$0xf] %vm1651_vm12, %v1622_v47  ;;  %v1624_v17 = vpop.permute.xlu0 %1623 }
 0x171   :  { %1662 = vst.msk [vmem:[#allocation4 + $0x28] sm:$0xf] %vm1651_vm12, %v1624_v17 }
 0x173   :  { %v727_v50 = vpop.permute.xlu1 %726 }
 0x174   :  { %762 = vst.msk [vmem:[#allocation4 + $0x34] sm:$0xf] %vm748_vm5, %v727_v50  ;;  %v729_v36 = vpop.permute.xlu0 %728 }
 0x175   :  { %763 = vst.msk [vmem:[#allocation4 + $0x38] sm:$0xf] %vm748_vm5, %v729_v36 }
 0x177   :  { %v1626_v23 = vpop.permute.xlu1 %1625  ;;  %v4109_v40 = vld [vmem:[#allocation4 + $0x20] sm:$0xff]  }
 0x178   :  { %1663 = vst.msk [vmem:[#allocation4 + $0x2c] sm:$0xf] %vm1651_vm12, %v1626_v23  ;;  %4053 = vmatprep.mubr.msk.bf16.mxu0 %vm1760_vm13, %v4109_v40  ;;  %v854_v51 = vpop.permute.xlu0 %853 }
 0x179   :  { %890 = vst.msk [vmem:[#allocation4 + $0x30] sm:$0xf] %vm877_vm6, %v854_v51 }
 0x17b   :  { %v731_v34 = vpop.permute.xlu1 %730 }
 0x17c   :  { %764 = vst.msk [vmem:[#allocation4 + $0x3c] sm:$0xf] %vm748_vm5, %v731_v34  ;;  %v858_v45 = vpop.permute.xlu0 %857 }
 0x17d   :  { %892 = vst.msk [vmem:[#allocation4 + $0x38] sm:$0xf] %vm877_vm6, %v858_v45 }
 0x17f   :  { %v856_v13 = vpop.permute.xlu1 %855  ;;  %v4110_v44 = vld [vmem:[#allocation4 + $0x28] sm:$0xff]  }
 0x180   :  { %891 = vst.msk [vmem:[#allocation4 + $0x34] sm:$0xf] %vm877_vm6, %v856_v13  ;;  %4054 = vmatmul.mubr.msk.bf16.gmra.mxu0 %vm1760_vm13, %v4110_v44  ;;  %v983_v37 = vpop.permute.xlu0 %982 }
 0x181   :  { %1019 = vst.msk [vmem:[#allocation4 + $0x30] sm:$0xf] %vm1006_vm7, %v983_v37 }
 0x183   :  { %v860_v49 = vpop.permute.xlu1 %859 }
 0x184   :  { %893 = vst.msk [vmem:[#allocation4 + $0x3c] sm:$0xf] %vm877_vm6, %v860_v49  ;;  %v987_v52 = vpop.permute.xlu0 %986 }
 0x185   :  { %1021 = vst.msk [vmem:[#allocation4 + $0x38] sm:$0xf] %vm1006_vm7, %v987_v52 }
 0x187   :  { %v985_v54 = vpop.permute.xlu1 %984 }
 0x188   :  { %1020 = vst.msk [vmem:[#allocation4 + $0x34] sm:$0xf] %vm1006_vm7, %v985_v54  ;;  %v1112_v55 = vpop.permute.xlu0 %1111 }
 0x189   :  { %1148 = vst.msk [vmem:[#allocation4 + $0x30] sm:$0xf] %vm1135_vm8, %v1112_v55 }
 0x18b   :  { %v989_v58 = vpop.permute.xlu1 %988 }
 0x18c   :  { %1022 = vst.msk [vmem:[#allocation4 + $0x3c] sm:$0xf] %vm1006_vm7, %v989_v58  ;;  %v1116_v59 = vpop.permute.xlu0 %1115 }
 0x18d   :  { %1150 = vst.msk [vmem:[#allocation4 + $0x38] sm:$0xf] %vm1135_vm8, %v1116_v59 }
 0x18f   :  { %v1114_v28 = vpop.permute.xlu1 %1113 }
 0x190   :  { %1149 = vst.msk [vmem:[#allocation4 + $0x34] sm:$0xf] %vm1135_vm8, %v1114_v28  ;;  %v1241_v60 = vpop.permute.xlu0 %1240 }
 0x191   :  { %1277 = vst.msk [vmem:[#allocation4 + $0x30] sm:$0xf] %vm1264_vm9, %v1241_v60 }
 0x193   :  { %v1118_v1 = vpop.permute.xlu1 %1117 }
 0x194   :  { %1151 = vst.msk [vmem:[#allocation4 + $0x3c] sm:$0xf] %vm1135_vm8, %v1118_v1  ;;  %v1245_v56 = vpop.permute.xlu0 %1244 }
 0x195   :  { %1279 = vst.msk [vmem:[#allocation4 + $0x38] sm:$0xf] %vm1264_vm9, %v1245_v56 }
 0x197   :  { %v1243_v27 = vpop.permute.xlu1 %1242 }
 0x198   :  { %1278 = vst.msk [vmem:[#allocation4 + $0x34] sm:$0xf] %vm1264_vm9, %v1243_v27  ;;  %v1370_v30 = vpop.permute.xlu0 %1369 }
 0x199   :  { %1406 = vst.msk [vmem:[#allocation4 + $0x30] sm:$0xf] %vm1393_vm10, %v1370_v30 }
 0x19b   :  { %v1247_v35 = vpop.permute.xlu1 %1246 }
 0x19c   :  { %1280 = vst.msk [vmem:[#allocation4 + $0x3c] sm:$0xf] %vm1264_vm9, %v1247_v35  ;;  %v1374_v0 = vpop.permute.xlu0 %1373 }
 0x19d   :  { %1408 = vst.msk [vmem:[#allocation4 + $0x38] sm:$0xf] %vm1393_vm10, %v1374_v0 }
 0x19f   :  { %v1372_v3 = vpop.permute.xlu1 %1371 }
 0x1a0   :  { %1407 = vst.msk [vmem:[#allocation4 + $0x34] sm:$0xf] %vm1393_vm10, %v1372_v3  ;;  %v1499_v4 = vpop.permute.xlu0 %1498 }
 0x1a1   :  { %1535 = vst.msk [vmem:[#allocation4 + $0x30] sm:$0xf] %vm1522_vm11, %v1499_v4 }
 0x1a3   :  { %v1376_v61 = vpop.permute.xlu1 %1375 }
 0x1a4   :  { %1409 = vst.msk [vmem:[#allocation4 + $0x3c] sm:$0xf] %vm1393_vm10, %v1376_v61  ;;  %v1503_v5 = vpop.permute.xlu0 %1502 }
 0x1a5   :  { %1537 = vst.msk [vmem:[#allocation4 + $0x38] sm:$0xf] %vm1522_vm11, %v1503_v5 }
 0x1a7   :  { %v1501_v7 = vpop.permute.xlu1 %1500 }
 0x1a8   :  { %1536 = vst.msk [vmem:[#allocation4 + $0x34] sm:$0xf] %vm1522_vm11, %v1501_v7  ;;  %v1628_v53 = vpop.permute.xlu0 %1627 }
 0x1a9   :  { %1664 = vst.msk [vmem:[#allocation4 + $0x30] sm:$0xf] %vm1651_vm12, %v1628_v53 }
 0x1ab   :  { %v1505_v9 = vpop.permute.xlu1 %1504 }
 0x1ac   :  { %1538 = vst.msk [vmem:[#allocation4 + $0x3c] sm:$0xf] %vm1522_vm11, %v1505_v9  ;;  %v1632_v12 = vpop.permute.xlu0 %1631 }
 0x1ad   :  { %1666 = vst.msk [vmem:[#allocation4 + $0x38] sm:$0xf] %vm1651_vm12, %v1632_v12 }
 0x1af   :  { %v1630_v14 = vpop.permute.xlu1 %1629 }
 0x1b0   :  { %1665 = vst.msk [vmem:[#allocation4 + $0x34] sm:$0xf] %vm1651_vm12, %v1630_v14  ;;  %v2126_v20 = vpop.permute.xlu0 %2125 }
 0x1b1   :  { %2173 = vst.msk [vmem:[#allocation5] sm:$0xf] %vm748_vm5, %v2126_v20 }
 0x1b3   :  { %v1634_v15 = vpop.permute.xlu1 %1633 }
 0x1b4   :  { %1667 = vst.msk [vmem:[#allocation4 + $0x3c] sm:$0xf] %vm1651_vm12, %v1634_v15  ;;  %v2254_v25 = vpop.permute.xlu0 %2253 }
 0x1b5   :  { %2301 = vst.msk [vmem:[#allocation5] sm:$0xf] %vm877_vm6, %v2254_v25 }
 0x1b7   :  { %v4111_v10 = vld [vmem:[#allocation4 + $0x30] sm:$0xff]  }
 0x1b8   :  { %4057 = vmatprep.mubr.msk.bf16.mxu0 %vm1760_vm13, %v4111_v10 }
 0x1bb   :  { %v4112_v18 = vld [vmem:[#allocation4 + $0x38] sm:$0xff]  }
 0x1bc   :  { %4058 = vmatmul.mubr.msk.bf16.gmra.mxu0 %vm1760_vm13, %v4112_v18 }
 0x1c0   :  { %v4047_v26 = vpop.f32.mrf.mxu0 }
 0x1c1   :  { %v1895_v31 = vmul.f32 %v4047_v26, %v5117_v21 }
 0x1c2   :  { %v1823_v6 = vpop.f32.mrf.mxu0 }
 0x1c3   :  { %v1918_v32 = vadd.f32 %v5122_v29, %v1895_v31  ;;  %v1893_v8 = vmul.f32 %v5117_v21, %v1823_v6 }
 0x1c4   :  { %v4048_v63 = vpop.f32.mrf.mxu0 }
 0x1c5   :  { %v1934_v33 = vmax.f32 %v1918_v32, 0.0  ;;  %v1916_v2 = vadd.f32 %v5122_v29, %v1893_v8  ;;  %v1896_v42 = vmul.f32 %v4048_v63, %v5117_v21  ;;  %v4114_v8 = vld [vmem:[%s5690_s2 + $0x20] ss:$0 sps:$4 sm:$0xff]  }
 0x1c6   :  { %v1826_v57 = vpop.f32.mrf.mxu0  ;;  %v3203_v63 = vsel %vm1785_vm4, %v4114_v8, 0  ;;  %4088 = vmatprep.subr.msk.bf16.mxu1 %vm1785_vm4, %v4114_v8 }
 0x1c7   :  { %1951 = vst.msk [vmem:[#allocation3 + $0x31] sm:$0xff] %vm47_vm0, %v1934_v33  ;;  %v1932_v38 = vmax.f32 %v1916_v2, 0.0  ;;  %v1919_v48 = vadd.f32 %v5122_v29, %v1896_v42  ;;  %v1894_v39 = vmul.f32 %v5117_v21, %v1826_v57  ;;  %4062 = vmatpush3.bf16.msra.mxu1 %v3203_v63  ;;  %v4115_v33 = vld [vmem:[%s5690_s2 + $0x18] sm:$0xff]   ;;  %v4116_v57 = vld [vmem:[%s5690_s2 + $0x10] sm:$0xff]   ;;  %v2197_v63 = vld [vmem:[#allocation3 + $0xa2] sm:$0xff] }
 0x1c8   :  { %4063 = vmatprep.subr.bf16.mxu1 %v4115_v33 }
 0x1c9   :  { %1949 = vst.msk [vmem:[#allocation3 + $0x11] sm:$0xff] %vm47_vm0, %v1932_v38  ;;  %v1935_v41 = vmax.f32 %v1919_v48, 0.0  ;;  %v1917_v11 = vadd.f32 %v5122_v29, %v1894_v39  ;;  %v4117_v39 = vld [vmem:[%s5690_s2 + $0x8] sm:$0xff]  }
 0x1cb   :  { %1952 = vst.msk [vmem:[#allocation3 + $0x41] sm:$0xff] %vm47_vm0, %v1935_v41  ;;  %v1933_v43 = vmax.f32 %v1917_v11, 0.0  ;;  %4064 = vmatpush3.bf16.msra.mxu1 %v4115_v33 }
 0x1cc   :  { %4065 = vmatprep.subr.bf16.mxu1 %v4116_v57 }
 0x1cd   :  { %1950 = vst.msk [vmem:[#allocation3 + $0x21] sm:$0xff] %vm47_vm0, %v1933_v43  ;;  %v4118_v43 = vld [vmem:[%s5690_s2] sm:$0xff]  }
 0x1ce   :  { %v2064_v62 = vld [vmem:[#allocation3 + $0x31] sm:$0xff] }
 0x1cf   :  { %v2319_v22 = vld [vmem:[#allocation3 + $0x30] sm:$0xff]  ;;  %v3884_v24 = vpack.c.bf16 %v2064_v62, %v2064_v62  ;;  %4066 = vmatpush3.bf16.msra.mxu1 %v4116_v57 }
 0x1d0   :  { %v3915_v46 = vpack.c.bf16 %v2319_v22, %v2319_v22  ;;  %v2192_v47 = vld [vmem:[#allocation3 + $0x32] sm:$0xff]  ;;  %4067 = vmatprep.subr.bf16.mxu1 %v4117_v39 }
 0x1d1   :  { %v2317_v17 = vld [vmem:[#allocation3 + $0x10] sm:$0xff]  ;;  %2131 = vrot.lane.b32.xlu1 %v3884_v24, %s4214_s13  ;;  %v3900_v23 = vpack.c.bf16 %v2192_v47, %v2192_v47 }
 0x1d2   :  { %2385 = vrot.lane.b32.xlu0 %v3915_v46, %s4217_s4  ;;  %v3913_v50 = vpack.c.bf16 %v2317_v17, %v2317_v17  ;;  %2048 = vst.msk [vmem:[#allocation5 + $0xc] sm:$0xf] %vm619_vm3, %v3915_v46  ;;  %v2704_v36 = vld [vmem:[#allocation3 + $0x40] sm:$0xff]  ;;  %v2445_v45 = vld [vmem:[#allocation3 + $0x11] sm:$0xff] }
 0x1d3   :  { %v3963_v40 = vpack.c.bf16 %v2704_v36, %v2704_v36  ;;  %v3929_v13 = vpack.c.bf16 %v2445_v45, %v2445_v45  ;;  %v2573_v44 = vld [vmem:[#allocation3 + $0x12] sm:$0xff]  ;;  %v2832_v49 = vld [vmem:[#allocation3 + $0x41] sm:$0xff]  ;;  %4068 = vmatpush3.bf16.msra.mxu1 %v4117_v39  ;;  %v3905_v39 = vpack.c.bf16 %v2197_v63, %v2197_v63 }
 0x1d4   :  { %2046 = vst.msk [vmem:[#allocation5 + $0x4] sm:$0xf] %vm619_vm3, %v3913_v50  ;;  %v2318_v51 = vld [vmem:[#allocation3 + $0x20] sm:$0xff]  ;;  %v3945_v37 = vpack.c.bf16 %v2573_v44, %v2573_v44  ;;  %v3979_v52 = vpack.c.bf16 %v2832_v49, %v2832_v49  ;;  %4069 = vmatprep.subr.bf16.mxu1 %v4118_v43 }
 0x1d5   :  { %2259 = vrot.lane.b32.xlu1 %v3900_v23, %s4216_s3  ;;  %v3914_v34 = vpack.c.bf16 %v2318_v51, %v2318_v51  ;;  %2049 = vst.msk [vmem:[#allocation5 + $0x10] sm:$0xf] %vm619_vm3, %v3963_v40  ;;  %v2576_v54 = vld [vmem:[#allocation3 + $0x42] sm:$0xff] }
 0x1d6   :  { %2513 = vrot.lane.b32.xlu0 %v3884_v24, %s4218_s19  ;;  %v3948_v55 = vpack.c.bf16 %v2576_v54, %v2576_v54  ;;  %v2446_v58 = vld [vmem:[#allocation3 + $0x21] sm:$0xff] }
 0x1d7   :  { %2047 = vst.msk [vmem:[#allocation5 + $0x8] sm:$0xf] %vm619_vm3, %v3914_v34  ;;  %v3930_v59 = vpack.c.bf16 %v2446_v58, %v2446_v58  ;;  %v2574_v28 = vld [vmem:[#allocation3 + $0x22] sm:$0xff]  ;;  %4070 = vmatpush3.bf16.msra.mxu1 %v4118_v43 }
 0x1d8   :  { %v3946_v60 = vpack.c.bf16 %v2574_v28, %v2574_v28  ;;  %v1973_v36 = vld [vmem:[#allocation3 + $0xa0] sm:$0xff] }
 0x1d9   :  { %2768 = vrot.lane.b32.xlu1 %v3915_v46, %s4220_s21 }
 0x1da   :  { %2641 = vrot.lane.b32.xlu0 %v3900_v23, %s4219_s20 }
 0x1dd   :  { %2896 = vrot.lane.b32.xlu1 %v3884_v24, %s4221_s24 }
 0x1de   :  { %2381 = vrot.lane.b32.xlu0 %v3913_v50, %s4217_s4  ;;  %v5225_v50 = vpop.permute.xlu1 %2780 }
 0x1e1   :  { %3024 = vrot.lane.b32.xlu1 %v3900_v23, %s4222_s29  ;;  %v3873_v23 = vpack.c.bf16 %v1973_v36, %v1973_v36 }
 0x1e2   :  { %2509 = vrot.lane.b32.xlu0 %v3929_v13, %s4218_s19  ;;  %v5233_v51 = vpop.permute.xlu1 %2908 }
 0x1e3   :  { %2053 = vst.msk [vmem:[#allocation5 + $0x20] sm:$0xf] %vm619_vm3, %v3873_v23 }
 0x1e5   :  { %2127 = vrot.lane.b32.xlu1 %v3929_v13, %s4214_s13 }
 0x1e6   :  { %2637 = vrot.lane.b32.xlu0 %v3945_v37, %s4219_s20 }
 0x1e9   :  { %2255 = vrot.lane.b32.xlu1 %v3945_v37, %s4216_s3 }
 0x1ea   :  { %2770 = vrot.lane.b32.xlu0 %v3963_v40, %s4220_s21 }
 0x1ed   :  { %2387 = vrot.lane.b32.xlu1 %v3963_v40, %s4217_s4 }
 0x1ee   :  { %2898 = vrot.lane.b32.xlu0 %v3979_v52, %s4221_s24 }
 0x1f1   :  { %2515 = vrot.lane.b32.xlu1 %v3979_v52, %s4218_s19 }
 0x1f2   :  { %2133 = vrot.lane.b32.xlu0 %v3979_v52, %s4214_s13 }
 0x1f5   :  { %2643 = vrot.lane.b32.xlu1 %v3948_v55, %s4219_s20 }
 0x1f6   :  { %3026 = vrot.lane.b32.xlu0 %v3948_v55, %s4222_s29 }
 0x1f9   :  { %2383 = vrot.lane.b32.xlu1 %v3914_v34, %s4217_s4 }
 0x1fa   :  { %2261 = vrot.lane.b32.xlu0 %v3948_v55, %s4216_s3 }
 0x1fd   :  { %2511 = vrot.lane.b32.xlu1 %v3930_v59, %s4218_s19 }
 0x1fe   :  { %2129 = vrot.lane.b32.xlu0 %v3930_v59, %s4214_s13 }
 0x200   :  { %v4051_v1 = vpop.f32.mrf.mxu0 }
 0x201   :  { %v1899_v56 = vmul.f32 %v4051_v1, %v5117_v21  ;;  %2639 = vrot.lane.b32.xlu1 %v3946_v60, %s4219_s20 }
 0x202   :  { %2257 = vrot.lane.b32.xlu0 %v3946_v60, %s4216_s3  ;;  %v1839_v27 = vpop.f32.mrf.mxu0 }
 0x203   :  { %v1922_v30 = vadd.f32 %v5122_v29, %v1899_v56  ;;  %v1897_v35 = vmul.f32 %v5117_v21, %v1839_v27 }
 0x204   :  { %v4052_v0 = vpop.f32.mrf.mxu0 }
 0x205   :  { %v1938_v3 = vmax.f32 %v1922_v30, 0.0  ;;  %v1920_v4 = vadd.f32 %v5122_v29, %v1897_v35  ;;  %v1900_v61 = vmul.f32 %v4052_v0, %v5117_v21 }
 0x206   :  { %2766 = vrot.lane.b32.xlu0 %v3914_v34, %s4220_s21  ;;  %v1842_v5 = vpop.f32.mrf.mxu0  ;;  %v2069_v34 = vld [vmem:[#allocation3 + $0xa1] sm:$0xff] }
 0x207   :  { %1955 = vst.msk [vmem:[#allocation3 + $0x71] sm:$0xff] %vm47_vm0, %v1938_v3  ;;  %v1936_v7 = vmax.f32 %v1920_v4, 0.0  ;;  %v1923_v53 = vadd.f32 %v5122_v29, %v1900_v61  ;;  %v1898_v9 = vmul.f32 %v5117_v21, %v1842_v5  ;;  %v3889_v37 = vpack.c.bf16 %v2069_v34, %v2069_v34 }
 0x209   :  { %1953 = vst.msk [vmem:[#allocation3 + $0x51] sm:$0xff] %vm47_vm0, %v1936_v7  ;;  %v1939_v12 = vmax.f32 %v1923_v53, 0.0  ;;  %v1921_v14 = vadd.f32 %v5122_v29, %v1898_v9 }
 0x20a   :  { %2894 = vrot.lane.b32.xlu0 %v3930_v59, %s4221_s24 }
 0x20b   :  { %1956 = vst.msk [vmem:[#allocation3 + $0x81] sm:$0xff] %vm47_vm0, %v1939_v12  ;;  %v1937_v15 = vmax.f32 %v1921_v14, 0.0 }
 0x20d   :  { %1954 = vst.msk [vmem:[#allocation3 + $0x61] sm:$0xff] %vm47_vm0, %v1937_v15 }
 0x20e   :  { %3022 = vrot.lane.b32.xlu0 %v3946_v60, %s4222_s29  ;;  %v2068_v10 = vld [vmem:[#allocation3 + $0x71] sm:$0xff] }
 0x20f   :  { %v2323_v16 = vld [vmem:[#allocation3 + $0x70] sm:$0xff]  ;;  %v3888_v18 = vpack.c.bf16 %v2068_v10, %v2068_v10 }
 0x210   :  { %v3919_v19 = vpack.c.bf16 %v2323_v16, %v2323_v16  ;;  %v2196_v20 = vld [vmem:[#allocation3 + $0x72] sm:$0xff] }
 0x211   :  { %v2321_v25 = vld [vmem:[#allocation3 + $0x50] sm:$0xff]  ;;  %2139 = vrot.lane.b32.xlu1 %v3888_v18, %s4214_s13  ;;  %v3904_v31 = vpack.c.bf16 %v2196_v20, %v2196_v20 }
 0x212   :  { %2393 = vrot.lane.b32.xlu0 %v3919_v19, %s4217_s4  ;;  %v3917_v26 = vpack.c.bf16 %v2321_v25, %v2321_v25  ;;  %2052 = vst.msk [vmem:[#allocation5 + $0x1c] sm:$0xf] %vm619_vm3, %v3919_v19  ;;  %v2449_v2 = vld [vmem:[#allocation3 + $0x51] sm:$0xff]  ;;  %v2708_v41 = vld [vmem:[#allocation3 + $0x80] sm:$0xff] }
 0x213   :  { %v3933_v42 = vpack.c.bf16 %v2449_v2, %v2449_v2  ;;  %v2577_v38 = vld [vmem:[#allocation3 + $0x52] sm:$0xff]  ;;  %v3967_v11 = vpack.c.bf16 %v2708_v41, %v2708_v41  ;;  %v2836_v62 = vld [vmem:[#allocation3 + $0x81] sm:$0xff] }
 0x214   :  { %2050 = vst.msk [vmem:[#allocation5 + $0x14] sm:$0xf] %vm619_vm3, %v3917_v26  ;;  %v2706_v6 = vld [vmem:[#allocation3 + $0x60] sm:$0xff]  ;;  %v3949_v48 = vpack.c.bf16 %v2577_v38, %v2577_v38  ;;  %v3983_v22 = vpack.c.bf16 %v2836_v62, %v2836_v62  ;;  %v2965_v16 = vld [vmem:[#allocation3 + $0x92] sm:$0xff] }
 0x215   :  { %2267 = vrot.lane.b32.xlu1 %v3904_v31, %s4216_s3  ;;  %v5188_v32 = vpack.c.bf16 %v2706_v6, %v2706_v6  ;;  %v2067_v24 = vld [vmem:[#allocation3 + $0x61] sm:$0xff]  ;;  %v4000_v6 = vpack.c.bf16 %v2965_v16, %v2965_v16 }
 0x216   :  { %2521 = vrot.lane.b32.xlu0 %v3888_v18, %s4218_s19  ;;  %v3887_v46 = vpack.c.bf16 %v2067_v24, %v2067_v24  ;;  %v2195_v47 = vld [vmem:[#allocation3 + $0x62] sm:$0xff] }
 0x217   :  { %2051 = vst.msk [vmem:[#allocation5 + $0x18] sm:$0xf] %vm619_vm3, %v5188_v32  ;;  %v3903_v17 = vpack.c.bf16 %v2195_v47, %v2195_v47  ;;  %v2580_v40 = vld [vmem:[#allocation3 + $0x82] sm:$0xff] }
 0x218   :  { %v3952_v45 = vpack.c.bf16 %v2580_v40, %v2580_v40 }
 0x219   :  { %2776 = vrot.lane.b32.xlu1 %v3919_v19, %s4220_s21 }
 0x21a   :  { %2649 = vrot.lane.b32.xlu0 %v3904_v31, %s4219_s20 }
 0x21d   :  { %2904 = vrot.lane.b32.xlu1 %v3888_v18, %s4221_s24 }
 0x21e   :  { %2389 = vrot.lane.b32.xlu0 %v3917_v26, %s4217_s4 }
 0x221   :  { %3032 = vrot.lane.b32.xlu1 %v3904_v31, %s4222_s29 }
 0x222   :  { %2517 = vrot.lane.b32.xlu0 %v3933_v42, %s4218_s19 }
 0x225   :  { %2772 = vrot.lane.b32.xlu1 %v3917_v26, %s4220_s21 }
 0x226   :  { %2645 = vrot.lane.b32.xlu0 %v3949_v48, %s4219_s20 }
 0x229   :  { %2900 = vrot.lane.b32.xlu1 %v3933_v42, %s4221_s24 }
 0x22a   :  { %2778 = vrot.lane.b32.xlu0 %v3967_v11, %s4220_s21 }
 0x22d   :  { %2135 = vrot.lane.b32.xlu1 %v3933_v42, %s4214_s13 }
 0x22e   :  { %2906 = vrot.lane.b32.xlu0 %v3983_v22, %s4221_s24 }
 0x231   :  { %3028 = vrot.lane.b32.xlu1 %v3949_v48, %s4222_s29 }
 0x232   :  { %2137 = vrot.lane.b32.xlu0 %v3887_v46, %s4214_s13 }
 0x235   :  { %2263 = vrot.lane.b32.xlu1 %v3949_v48, %s4216_s3 }
 0x236   :  { %2265 = vrot.lane.b32.xlu0 %v3903_v17, %s4216_s3 }
 0x239   :  { %2395 = vrot.lane.b32.xlu1 %v3967_v11, %s4217_s4 }
 0x23a   :  { %2774 = vrot.lane.b32.xlu0 %v5188_v32, %s4220_s21 }
 0x23d   :  { %2523 = vrot.lane.b32.xlu1 %v3983_v22, %s4218_s19 }
 0x23e   :  { %2902 = vrot.lane.b32.xlu0 %v3887_v46, %s4221_s24 }
 0x240   :  { %v4055_v13 = vpop.f32.mrf.mxu0 }
 0x241   :  { %v1903_v44 = vmul.f32 %v4055_v13, %v5117_v21  ;;  %2651 = vrot.lane.b32.xlu1 %v3952_v45, %s4219_s20 }
 0x242   :  { %3030 = vrot.lane.b32.xlu0 %v3903_v17, %s4222_s29  ;;  %v1855_v49 = vpop.f32.mrf.mxu0 }
 0x243   :  { %v1926_v52 = vadd.f32 %v5122_v29, %v1903_v44  ;;  %v1901_v54 = vmul.f32 %v5117_v21, %v1855_v49  ;;  %v2132_v55 = vpop.permute.xlu1 %2131 }
 0x244   :  { %v5240_v58 = vpop.permute.xlu0 %2385  ;;  %2176 = vst.msk [vmem:[#allocation5 + $0xc] sm:$0xf] %vm748_vm5, %v2132_v55  ;;  %v4056_v59 = vpop.f32.mrf.mxu0 }
 0x245   :  { %v1942_v28 = vmax.f32 %v1926_v52, 0.0  ;;  %v1924_v60 = vadd.f32 %v5122_v29, %v1901_v54  ;;  %v1904_v1 = vmul.f32 %v4056_v59, %v5117_v21  ;;  %2391 = vrot.lane.b32.xlu1 %v5188_v32, %s4217_s4 }
 0x246   :  { %2141 = vrot.lane.b32.xlu0 %v3889_v37, %s4214_s13  ;;  %v1858_v56 = vpop.f32.mrf.mxu0 }
 0x247   :  { %1959 = vst.msk [vmem:[#allocation3 + $0xd1] sm:$0xff] %vm47_vm0, %v1942_v28  ;;  %v1940_v27 = vmax.f32 %v1924_v60, 0.0  ;;  %v1927_v30 = vadd.f32 %v5122_v29, %v1904_v1  ;;  %v1902_v35 = vmul.f32 %v5117_v21, %v1858_v56  ;;  %v2260_v0 = vpop.permute.xlu1 %2259 }
 0x248   :  { %v5251_v3 = vpop.permute.xlu0 %2513  ;;  %2304 = vst.msk [vmem:[#allocation5 + $0xc] sm:$0xf] %vm877_vm6, %v2260_v0 }
 0x249   :  { %1957 = vst.msk [vmem:[#allocation3 + $0xb1] sm:$0xff] %vm47_vm0, %v1940_v27  ;;  %v1943_v4 = vmax.f32 %v1927_v30, 0.0  ;;  %v1925_v61 = vadd.f32 %v5122_v29, %v1902_v35  ;;  %2519 = vrot.lane.b32.xlu1 %v3887_v46, %s4218_s19 }
 0x24a   :  { %3034 = vrot.lane.b32.xlu0 %v3952_v45, %s4222_s29 }
 0x24b   :  { %1960 = vst.msk [vmem:[#allocation3 + $0xe1] sm:$0xff] %vm47_vm0, %v1943_v4  ;;  %v1941_v5 = vmax.f32 %v1925_v61, 0.0  ;;  %v5259_v7 = vpop.permute.xlu1 %2768 }
 0x24c   :  { %v5261_v53 = vpop.permute.xlu0 %2641 }
 0x24d   :  { %1958 = vst.msk [vmem:[#allocation3 + $0xc1] sm:$0xff] %vm47_vm0, %v1941_v5  ;;  %2647 = vrot.lane.b32.xlu1 %v3903_v17, %s4219_s20 }
 0x24e   :  { %v2327_v9 = vld [vmem:[#allocation3 + $0xd0] sm:$0xff] }
 0x24f   :  { %v5265_v12 = vpop.permute.xlu1 %2896  ;;  %v5267_v15 = vpack.c.bf16 %v2327_v9, %v2327_v9  ;;  %v2072_v57 = vld [vmem:[#allocation3 + $0xd1] sm:$0xff] }
 0x250   :  { %v2382_v14 = vpop.permute.xlu0 %2381  ;;  %v2070_v10 = vld [vmem:[#allocation3 + $0xb1] sm:$0xff]  ;;  %v5292_v41 = vpack.c.bf16 %v2072_v57, %v2072_v57 }
 0x251   :  { %2429 = vst.msk [vmem:[#allocation5] sm:$0xf] %vm1006_vm7, %v2382_v14  ;;  %v2325_v18 = vld [vmem:[#allocation3 + $0xb0] sm:$0xff]  ;;  %v3890_v19 = vpack.c.bf16 %v2070_v10, %v2070_v10 }
 0x252   :  { %v3921_v20 = vpack.c.bf16 %v2325_v18, %v2325_v18  ;;  %2056 = vst.msk [vmem:[#allocation5 + $0x2c] sm:$0xf] %vm619_vm3, %v5267_v15  ;;  %v2328_v25 = vld [vmem:[#allocation3 + $0xe0] sm:$0xff]  ;;  %v2198_v11 = vld [vmem:[#allocation3 + $0xb2] sm:$0xff] }
 0x253   :  { %v5272_v26 = vpop.permute.xlu1 %3024  ;;  %2143 = vrot.lane.b32.xlu1 %v3890_v19, %s4214_s13  ;;  %v5275_v32 = vpack.c.bf16 %v2328_v25, %v2328_v25  ;;  %v3906_v24 = vpack.c.bf16 %v2198_v11, %v2198_v11  ;;  %v2200_v47 = vld [vmem:[#allocation3 + $0xd2] sm:$0xff]  ;;  %v2456_v49 = vld [vmem:[#allocation3 + $0xe1] sm:$0xff] }
 0x254   :  { %v2510_v31 = vpop.permute.xlu0 %2509  ;;  %2054 = vst.msk [vmem:[#allocation5 + $0x24] sm:$0xf] %vm619_vm3, %v3921_v20  ;;  %v2071_v8 = vld [vmem:[#allocation3 + $0xc1] sm:$0xff]  ;;  %v5304_v23 = vpack.c.bf16 %v2200_v47, %v2200_v47  ;;  %v5327_v55 = vpack.c.bf16 %v2456_v49, %v2456_v49 }
 0x255   :  { %2557 = vst.msk [vmem:[#allocation5] sm:$0xf] %vm1135_vm8, %v2510_v31  ;;  %v2326_v33 = vld [vmem:[#allocation3 + $0xc0] sm:$0xff]  ;;  %v5279_v2 = vpack.c.bf16 %v2071_v8, %v2071_v8 }
 0x256   :  { %v5281_v42 = vpack.c.bf16 %v2326_v33, %v2326_v33  ;;  %2057 = vst.msk [vmem:[#allocation5 + $0x30] sm:$0xf] %vm619_vm3, %v5275_v32  ;;  %v2199_v43 = vld [vmem:[#allocation3 + $0xc2] sm:$0xff] }
 0x257   :  { %v2128_v38 = vpop.permute.xlu1 %2127  ;;  %3036 = vrot.lane.b32.xlu1 %v4000_v6, %s4222_s29  ;;  %2145 = vrot.lane.b32.xlu0 %v5279_v2, %s4214_s13  ;;  %v5298_v46 = vpack.c.bf16 %v2199_v43, %v2199_v43  ;;  %v2584_v60 = vld [vmem:[#allocation3 + $0xe2] sm:$0xff] }
 0x258   :  { %v2638_v48 = vpop.permute.xlu0 %2637  ;;  %2055 = vst.msk [vmem:[#allocation5 + $0x28] sm:$0xf] %vm619_vm3, %v5281_v42  ;;  %v5353_v1 = vpack.c.bf16 %v2584_v60, %v2584_v60 }
 0x259   :  { %2174 = vst.msk [vmem:[#allocation5 + $0x4] sm:$0xf] %vm748_vm5, %v2128_v38 }
 0x25a   :  { %2685 = vst.msk [vmem:[#allocation5] sm:$0xf] %vm1264_vm9, %v2638_v48 }
 0x25b   :  { %v2256_v62 = vpop.permute.xlu1 %2255  ;;  %2147 = vrot.lane.b32.xlu1 %v5292_v41, %s4214_s13  ;;  %2269 = vrot.lane.b32.xlu0 %v3905_v39, %s4216_s3 }
 0x25c   :  { %v2771_v22 = vpop.permute.xlu0 %2770  ;;  %2302 = vst.msk [vmem:[#allocation5 + $0x4] sm:$0xf] %vm877_vm6, %v2256_v62 }
 0x25f   :  { %v2388_v17 = vpop.permute.xlu1 %2387  ;;  %2271 = vrot.lane.b32.xlu1 %v3906_v24, %s4216_s3  ;;  %2273 = vrot.lane.b32.xlu0 %v5298_v46, %s4216_s3 }
 0x260   :  { %v2899_v36 = vpop.permute.xlu0 %2898  ;;  %2432 = vst.msk [vmem:[#allocation5 + $0xc] sm:$0xf] %vm1006_vm7, %v2388_v17 }
 0x263   :  { %v2516_v40 = vpop.permute.xlu1 %2515  ;;  %2275 = vrot.lane.b32.xlu1 %v5304_v23, %s4216_s3  ;;  %2397 = vrot.lane.b32.xlu0 %v3921_v20, %s4217_s4 }
 0x264   :  { %v2134_v34 = vpop.permute.xlu0 %2133  ;;  %2560 = vst.msk [vmem:[#allocation5 + $0xc] sm:$0xf] %vm1135_vm8, %v2516_v40 }
 0x265   :  { %2177 = vst.msk [vmem:[#allocation5 + $0x10] sm:$0xf] %vm748_vm5, %v2134_v34 }
 0x267   :  { %v2644_v45 = vpop.permute.xlu1 %2643  ;;  %2399 = vrot.lane.b32.xlu1 %v5281_v42, %s4217_s4  ;;  %2401 = vrot.lane.b32.xlu0 %v5267_v15, %s4217_s4 }
 0x268   :  { %v3027_v13 = vpop.permute.xlu0 %3026  ;;  %2688 = vst.msk [vmem:[#allocation5 + $0xc] sm:$0xf] %vm1264_vm9, %v2644_v45 }
 0x26b   :  { %v2384_v44 = vpop.permute.xlu1 %2383  ;;  %2403 = vrot.lane.b32.xlu1 %v5275_v32, %s4217_s4  ;;  %2525 = vrot.lane.b32.xlu0 %v3890_v19, %s4218_s19 }
 0x26c   :  { %v2262_v37 = vpop.permute.xlu0 %2261  ;;  %2430 = vst.msk [vmem:[#allocation5 + $0x4] sm:$0xf] %vm1006_vm7, %v2384_v44 }
 0x26d   :  { %2305 = vst.msk [vmem:[#allocation5 + $0x10] sm:$0xf] %vm877_vm6, %v2262_v37 }
 0x26f   :  { %v2512_v52 = vpop.permute.xlu1 %2511  ;;  %2527 = vrot.lane.b32.xlu1 %v5279_v2, %s4218_s19  ;;  %2529 = vrot.lane.b32.xlu0 %v5292_v41, %s4218_s19 }
 0x270   :  { %v2130_v54 = vpop.permute.xlu0 %2129  ;;  %2558 = vst.msk [vmem:[#allocation5 + $0x4] sm:$0xf] %vm1135_vm8, %v2512_v52 }
 0x271   :  { %2175 = vst.msk [vmem:[#allocation5 + $0x8] sm:$0xf] %vm748_vm5, %v2130_v54 }
 0x273   :  { %v2640_v59 = vpop.permute.xlu1 %2639  ;;  %2531 = vrot.lane.b32.xlu1 %v5327_v55, %s4218_s19  ;;  %2653 = vrot.lane.b32.xlu0 %v3906_v24, %s4219_s20 }
 0x274   :  { %v2258_v28 = vpop.permute.xlu0 %2257  ;;  %2686 = vst.msk [vmem:[#allocation5 + $0x4] sm:$0xf] %vm1264_vm9, %v2640_v59 }
 0x275   :  { %2303 = vst.msk [vmem:[#allocation5 + $0x8] sm:$0xf] %vm877_vm6, %v2258_v28 }
 0x276   :  { %2815 = vst.msk [vmem:[#allocation5 + $0x4] sm:$0xf] %vm1393_vm10, %v5259_v7 }
 0x277   :  { %2431 = vst.msk [vmem:[#allocation5 + $0x8] sm:$0xf] %vm1006_vm7, %v5240_v58  ;;  %2655 = vrot.lane.b32.xlu1 %v5298_v46, %s4219_s20  ;;  %2657 = vrot.lane.b32.xlu0 %v5304_v23, %s4219_s20 }
 0x278   :  { %2943 = vst.msk [vmem:[#allocation5 + $0x4] sm:$0xf] %vm1522_vm11, %v5265_v12  ;;  %v2767_v58 = vpop.permute.xlu0 %2766 }
 0x279   :  { %2559 = vst.msk [vmem:[#allocation5 + $0x8] sm:$0xf] %vm1135_vm8, %v5251_v3 }
 0x27a   :  { %3071 = vst.msk [vmem:[#allocation5 + $0x4] sm:$0xf] %vm1651_vm12, %v5272_v26 }
 0x27b   :  { %2687 = vst.msk [vmem:[#allocation5 + $0x8] sm:$0xf] %vm1264_vm9, %v5261_v53  ;;  %2659 = vrot.lane.b32.xlu1 %v5353_v1, %s4219_s20  ;;  %2782 = vrot.lane.b32.xlu0 %v5281_v42, %s4220_s21 }
 0x27c   :  { %2816 = vst.msk [vmem:[#allocation5 + $0x8] sm:$0xf] %vm1393_vm10, %v2771_v22  ;;  %2814 = vst.msk [vmem:[#allocation5] sm:$0xf] %vm1393_vm10, %v2767_v58  ;;  %v2895_v56 = vpop.permute.xlu0 %2894  ;;  %v4059_v27 = vpop.f32.mrf.mxu0 }
 0x27d   :  { %2944 = vst.msk [vmem:[#allocation5 + $0x8] sm:$0xf] %vm1522_vm11, %v2899_v36  ;;  %2942 = vst.msk [vmem:[#allocation5] sm:$0xf] %vm1522_vm11, %v2895_v56  ;;  %v1907_v30 = vmul.f32 %v4059_v27, %v5117_v21 }
 0x27e   :  { %3072 = vst.msk [vmem:[#allocation5 + $0x8] sm:$0xf] %vm1651_vm12, %v3027_v13  ;;  %v1871_v35 = vpop.f32.mrf.mxu0 }
 0x27f   :  { %v1930_v0 = vadd.f32 %v5122_v29, %v1907_v30  ;;  %v1905_v3 = vmul.f32 %v5117_v21, %v1871_v35  ;;  %2784 = vrot.lane.b32.xlu1 %v5267_v15, %s4220_s21  ;;  %2786 = vrot.lane.b32.xlu0 %v5275_v32, %s4220_s21 }
 0x280   :  { %v3023_v4 = vpop.permute.xlu0 %3022  ;;  %v4060_v61 = vpop.f32.mrf.mxu0 }
 0x281   :  { %3070 = vst.msk [vmem:[#allocation5] sm:$0xf] %vm1651_vm12, %v3023_v4  ;;  %v1946_v5 = vmax.f32 %v1930_v0, 0.0  ;;  %v1928_v7 = vadd.f32 %v5122_v29, %v1905_v3  ;;  %v1908_v53 = vmul.f32 %v4060_v61, %v5117_v21 }
 0x282   :  { %v1874_v9 = vpop.f32.mrf.mxu0 }
 0x283   :  { %1963 = vst.msk [vmem:[#allocation3 + $0x111] sm:$0xff] %vm47_vm0, %v1946_v5  ;;  %v1944_v12 = vmax.f32 %v1928_v7, 0.0  ;;  %v1931_v14 = vadd.f32 %v5122_v29, %v1908_v53  ;;  %v1906_v15 = vmul.f32 %v5117_v21, %v1874_v9  ;;  %v2140_v10 = vpop.permute.xlu1 %2139  ;;  %2910 = vrot.lane.b32.xlu0 %v5279_v2, %s4221_s24 }
 0x284   :  { %v5376_v16 = vpop.permute.xlu0 %2393  ;;  %2180 = vst.msk [vmem:[#allocation5 + $0x1c] sm:$0xf] %vm748_vm5, %v2140_v10 }
 0x285   :  { %1961 = vst.msk [vmem:[#allocation3 + $0xf1] sm:$0xff] %vm47_vm0, %v1944_v12  ;;  %v1947_v18 = vmax.f32 %v1931_v14, 0.0  ;;  %v1929_v19 = vadd.f32 %v5122_v29, %v1906_v15  ;;  %v2717_v12 = vld [vmem:[#allocation3 + $0x130] sm:$0xff] }
 0x287   :  { %1964 = vst.msk [vmem:[#allocation3 + $0x121] sm:$0xff] %vm47_vm0, %v1947_v18  ;;  %v1945_v20 = vmax.f32 %v1929_v19, 0.0  ;;  %v2268_v25 = vpop.permute.xlu1 %2267  ;;  %2914 = vrot.lane.b32.xlu0 %v5327_v55, %s4221_s24 }
 0x288   :  { %v5384_v21 = vpop.permute.xlu0 %2521  ;;  %v4113_v26 = vld [vmem:[#allocation5] sm:$0xff]   ;;  %2308 = vst.msk [vmem:[#allocation5 + $0x1c] sm:$0xf] %vm877_vm6, %v2268_v25 }
 0x289   :  { %1962 = vst.msk [vmem:[#allocation3 + $0x101] sm:$0xff] %vm47_vm0, %v1945_v20  ;;  %4071 = vmatprep.mubr.msk.bf16.mxu1 %vm1760_vm13, %v4113_v26  ;;  %v2845_v20 = vld [vmem:[#allocation3 + $0x131] sm:$0xff] }
 0x28a   :  { %v2331_v31 = vld [vmem:[#allocation3 + $0x110] sm:$0xff] }
 0x28b   :  { %v5389_v6 = vpop.permute.xlu1 %2776  ;;  %3038 = vrot.lane.b32.xlu0 %v5298_v46, %s4222_s29  ;;  %v5393_v32 = vpack.c.bf16 %v2331_v31, %v2331_v31  ;;  %v2204_v54 = vld [vmem:[#allocation3 + $0x112] sm:$0xff]  ;;  %v3992_v31 = vpack.c.bf16 %v2845_v20, %v2845_v20 }
 0x28c   :  { %v2650_v29 = vpop.permute.xlu0 %2649  ;;  %v2713_v8 = vld [vmem:[#allocation3 + $0xf0] sm:$0xff]  ;;  %v5457_v60 = vpack.c.bf16 %v2204_v54, %v2204_v54 }
 0x28d   :  { %v3972_v63 = vpack.c.bf16 %v2713_v8, %v2713_v8  ;;  %2060 = vst.msk [vmem:[#allocation5 + $0x3c] sm:$0xf] %vm619_vm3, %v5393_v32  ;;  %v2841_v38 = vld [vmem:[#allocation3 + $0xf1] sm:$0xff] }
 0x28e   :  { %v3988_v43 = vpack.c.bf16 %v2841_v38, %v2841_v38  ;;  %v2969_v36 = vld [vmem:[#allocation3 + $0xf2] sm:$0xff]  ;;  %v2332_v56 = vld [vmem:[#allocation3 + $0x120] sm:$0xff] }
 0x28f   :  { %v5397_v33 = vpop.permute.xlu1 %2904  ;;  %2149 = vrot.lane.b32.xlu0 %v5327_v55, %s4214_s13  ;;  %2788 = vrot.lane.b32.xlu1 %v3972_v63, %s4220_s21  ;;  %2058 = vst.msk [vmem:[#allocation5 + $0x34] sm:$0xf] %vm619_vm3, %v3972_v63  ;;  %v4004_v45 = vpack.c.bf16 %v2969_v36, %v2969_v36  ;;  %v3928_v35 = vpack.c.bf16 %v2332_v56, %v2332_v56  ;;  %v2460_v4 = vld [vmem:[#allocation3 + $0x121] sm:$0xff] }
 0x290   :  { %v2390_v2 = vpop.permute.xlu0 %2389  ;;  %v2330_v42 = vld [vmem:[#allocation3 + $0x100] sm:$0xff] }
 0x291   :  { %2433 = vst.msk [vmem:[#allocation5 + $0x10] sm:$0xf] %vm1006_vm7, %v2390_v2  ;;  %v5404_v57 = vpack.c.bf16 %v2330_v42, %v2330_v42  ;;  %v2075_v48 = vld [vmem:[#allocation3 + $0x101] sm:$0xff] }
 0x292   :  { %v5415_v62 = vpack.c.bf16 %v2075_v48, %v2075_v48  ;;  %v2588_v7 = vld [vmem:[#allocation3 + $0x122] sm:$0xff] }
 0x293   :  { %v5406_v39 = vpop.permute.xlu1 %3032  ;;  %2912 = vrot.lane.b32.xlu1 %v5292_v41, %s4221_s24  ;;  %3042 = vrot.lane.b32.xlu0 %v5353_v1, %s4222_s29  ;;  %2059 = vst.msk [vmem:[#allocation5 + $0x38] sm:$0xf] %vm619_vm3, %v5404_v57  ;;  %v2203_v41 = vld [vmem:[#allocation3 + $0x102] sm:$0xff]  ;;  %v3960_v9 = vpack.c.bf16 %v2588_v7, %v2588_v7 }
 0x294   :  { %v2518_v11 = vpop.permute.xlu0 %2517  ;;  %v5427_v17 = vpack.c.bf16 %v2203_v41, %v2203_v41 }
 0x295   :  { %2561 = vst.msk [vmem:[#allocation5 + $0x10] sm:$0xf] %vm1135_vm8, %v2518_v11 }
 0x297   :  { %v2773_v22 = vpop.permute.xlu1 %2772  ;;  %2916 = vrot.lane.b32.xlu1 %v3988_v43, %s4221_s24  ;;  %2153 = vrot.lane.b32.xlu0 %v5415_v62, %s4214_s13 }
 0x298   :  { %v2646_v24 = vpop.permute.xlu0 %2645  ;;  %2817 = vst.msk [vmem:[#allocation5 + $0xc] sm:$0xf] %vm1393_vm10, %v2773_v22 }
 0x299   :  { %2689 = vst.msk [vmem:[#allocation5 + $0x10] sm:$0xf] %vm1264_vm9, %v2646_v24 }
 0x29b   :  { %v2901_v46 = vpop.permute.xlu1 %2900  ;;  %3040 = vrot.lane.b32.xlu1 %v5304_v23, %s4222_s29  ;;  %2277 = vrot.lane.b32.xlu0 %v5353_v1, %s4216_s3  ;;  %v2076_v23 = vld [vmem:[#allocation3 + $0x111] sm:$0xff] }
 0x29c   :  { %v2779_v47 = vpop.permute.xlu0 %2778  ;;  %2945 = vst.msk [vmem:[#allocation5 + $0xc] sm:$0xf] %vm1522_vm11, %v2901_v46  ;;  %v5437_v37 = vpack.c.bf16 %v2076_v23, %v2076_v23 }
 0x29f   :  { %v2136_v40 = vpop.permute.xlu1 %2135  ;;  %2151 = vrot.lane.b32.xlu1 %v3988_v43, %s4214_s13  ;;  %2281 = vrot.lane.b32.xlu0 %v5427_v17, %s4216_s3 }
 0x2a0   :  { %v2907_v34 = vpop.permute.xlu0 %2906  ;;  %2178 = vst.msk [vmem:[#allocation5 + $0x14] sm:$0xf] %vm748_vm5, %v2136_v40 }
 0x2a3   :  { %v3029_v13 = vpop.permute.xlu1 %3028  ;;  %3044 = vrot.lane.b32.xlu1 %v4004_v45, %s4222_s29  ;;  %2405 = vrot.lane.b32.xlu0 %v3972_v63, %s4217_s4 }
 0x2a4   :  { %v2138_v44 = vpop.permute.xlu0 %2137  ;;  %3073 = vst.msk [vmem:[#allocation5 + $0xc] sm:$0xf] %vm1651_vm12, %v3029_v13 }
 0x2a5   :  { %2179 = vst.msk [vmem:[#allocation5 + $0x18] sm:$0xf] %vm748_vm5, %v2138_v44 }
 0x2a7   :  { %v2264_v49 = vpop.permute.xlu1 %2263  ;;  %2155 = vrot.lane.b32.xlu1 %v5437_v37, %s4214_s13  ;;  %2409 = vrot.lane.b32.xlu0 %v5393_v32, %s4217_s4 }
 0x2a8   :  { %v2266_v52 = vpop.permute.xlu0 %2265  ;;  %2306 = vst.msk [vmem:[#allocation5 + $0x14] sm:$0xf] %vm877_vm6, %v2264_v49 }
 0x2a9   :  { %2307 = vst.msk [vmem:[#allocation5 + $0x18] sm:$0xf] %vm877_vm6, %v2266_v52 }
 0x2aa   :  { %2435 = vst.msk [vmem:[#allocation5 + $0x18] sm:$0xf] %vm1006_vm7, %v5376_v16  ;;  %v3976_v16 = vpack.c.bf16 %v2717_v12, %v2717_v12 }
 0x2ab   :  { %2563 = vst.msk [vmem:[#allocation5 + $0x18] sm:$0xf] %vm1135_vm8, %v5384_v21  ;;  %v2396_v55 = vpop.permute.xlu1 %2395  ;;  %2279 = vrot.lane.b32.xlu1 %v4004_v45, %s4216_s3  ;;  %2533 = vrot.lane.b32.xlu0 %v3988_v43, %s4218_s19  ;;  %v4119_v28 = vld [vmem:[#allocation5 + $0x8] sm:$0xff]  }
 0x2ac   :  { %2691 = vst.msk [vmem:[#allocation5 + $0x18] sm:$0xf] %vm1264_vm9, %v2650_v29  ;;  %v2775_v59 = vpop.permute.xlu0 %2774  ;;  %4072 = vmatmul.mubr.msk.bf16.vlgmr.msra.gmra.mxu1 %vm1760_vm13, %v4119_v28 }
 0x2ad   :  { %2820 = vst.msk [vmem:[#allocation5 + $0x18] sm:$0xf] %vm1393_vm10, %v2779_v47  ;;  %2818 = vst.msk [vmem:[#allocation5 + $0x10] sm:$0xf] %vm1393_vm10, %v2775_v59 }
 0x2ae   :  { %2436 = vst.msk [vmem:[#allocation5 + $0x1c] sm:$0xf] %vm1006_vm7, %v2396_v55 }
 0x2af   :  { %2948 = vst.msk [vmem:[#allocation5 + $0x18] sm:$0xf] %vm1522_vm11, %v2907_v34  ;;  %v2524_v58 = vpop.permute.xlu1 %2523  ;;  %2283 = vrot.lane.b32.xlu1 %v5457_v60, %s4216_s3  ;;  %2537 = vrot.lane.b32.xlu0 %v5437_v37, %s4218_s19 }
 0x2b0   :  { %v2903_v1 = vpop.permute.xlu0 %2902  ;;  %2564 = vst.msk [vmem:[#allocation5 + $0x1c] sm:$0xf] %vm1135_vm8, %v2524_v58 }
 0x2b1   :  { %2946 = vst.msk [vmem:[#allocation5 + $0x10] sm:$0xf] %vm1522_vm11, %v2903_v1 }
 0x2b3   :  { %v2652_v27 = vpop.permute.xlu1 %2651  ;;  %2407 = vrot.lane.b32.xlu1 %v5404_v57, %s4217_s4  ;;  %2661 = vrot.lane.b32.xlu0 %v4004_v45, %s4219_s20 }
 0x2b4   :  { %v3031_v30 = vpop.permute.xlu0 %3030  ;;  %2692 = vst.msk [vmem:[#allocation5 + $0x1c] sm:$0xf] %vm1264_vm9, %v2652_v27 }
 0x2b5   :  { %3074 = vst.msk [vmem:[#allocation5 + $0x10] sm:$0xf] %vm1651_vm12, %v3031_v30 }
 0x2b6   :  { %2821 = vst.msk [vmem:[#allocation5 + $0x1c] sm:$0xf] %vm1393_vm10, %v5225_v50 }
 0x2b7   :  { %2949 = vst.msk [vmem:[#allocation5 + $0x1c] sm:$0xf] %vm1522_vm11, %v5233_v51  ;;  %v2392_v0 = vpop.permute.xlu1 %2391  ;;  %2411 = vrot.lane.b32.xlu1 %v3928_v35, %s4217_s4  ;;  %2665 = vrot.lane.b32.xlu0 %v5457_v60, %s4219_s20  ;;  %v3944_v51 = vpack.c.bf16 %v2460_v4, %v2460_v4 }
 0x2b8   :  { %v2142_v3 = vpop.permute.xlu0 %2141  ;;  %2434 = vst.msk [vmem:[#allocation5 + $0x14] sm:$0xf] %vm1006_vm7, %v2392_v0 }
 0x2b9   :  { %2181 = vst.msk [vmem:[#allocation5 + $0x20] sm:$0xf] %vm748_vm5, %v2142_v3 }
 0x2bb   :  { %v2520_v61 = vpop.permute.xlu1 %2519  ;;  %2535 = vrot.lane.b32.xlu1 %v5415_v62, %s4218_s19  ;;  %2790 = vrot.lane.b32.xlu0 %v5404_v57, %s4220_s21 }
 0x2bc   :  { %v3035_v50 = vpop.permute.xlu0 %3034  ;;  %2562 = vst.msk [vmem:[#allocation5 + $0x14] sm:$0xf] %vm1135_vm8, %v2520_v61 }
 0x2bd   :  { %3076 = vst.msk [vmem:[#allocation5 + $0x18] sm:$0xf] %vm1651_vm12, %v3035_v50 }
 0x2bf   :  { %v2648_v5 = vpop.permute.xlu1 %2647  ;;  %2539 = vrot.lane.b32.xlu1 %v3944_v51, %s4218_s19  ;;  %2794 = vrot.lane.b32.xlu0 %v3928_v35, %s4220_s21 }
 0x2c0   :  { %2690 = vst.msk [vmem:[#allocation5 + $0x14] sm:$0xf] %vm1264_vm9, %v2648_v5 }
 0x2c1   :  { %2819 = vst.msk [vmem:[#allocation5 + $0x14] sm:$0xf] %vm1393_vm10, %v5389_v6 }
 0x2c2   :  { %2947 = vst.msk [vmem:[#allocation5 + $0x14] sm:$0xf] %vm1522_vm11, %v5397_v33 }
 0x2c3   :  { %3075 = vst.msk [vmem:[#allocation5 + $0x14] sm:$0xf] %vm1651_vm12, %v5406_v39  ;;  %2663 = vrot.lane.b32.xlu1 %v5427_v17, %s4219_s20  ;;  %2918 = vrot.lane.b32.xlu0 %v5415_v62, %s4221_s24 }
 0x2c5   :  { %v2144_v53 = vpop.permute.xlu1 %2143 }
 0x2c6   :  { %2182 = vst.msk [vmem:[#allocation5 + $0x24] sm:$0xf] %vm748_vm5, %v2144_v53 }
 0x2c7   :  { %2667 = vrot.lane.b32.xlu1 %v3960_v9, %s4219_s20  ;;  %2922 = vrot.lane.b32.xlu0 %v3944_v51, %s4221_s24 }
 0x2c9   :  { %v3037_v14 = vpop.permute.xlu1 %3036  ;;  %v2146_v15 = vpop.permute.xlu0 %2145 }
 0x2ca   :  { %3077 = vst.msk [vmem:[#allocation5 + $0x1c] sm:$0xf] %vm1651_vm12, %v3037_v14  ;;  %v4120_v10 = vld [vmem:[#allocation5 + $0x10] sm:$0xff]  }
 0x2cb   :  { %2183 = vst.msk [vmem:[#allocation5 + $0x28] sm:$0xf] %vm748_vm5, %v2146_v15  ;;  %2792 = vrot.lane.b32.xlu1 %v5393_v32, %s4220_s21  ;;  %3046 = vrot.lane.b32.xlu0 %v5427_v17, %s4222_s29  ;;  %v2973_v32 = vld [vmem:[#allocation3 + $0x132] sm:$0xff] }
 0x2cc   :  { %4075 = vmatprep.mubr.msk.bf16.mxu1 %vm1760_vm13, %v4120_v10  ;;  %v4008_v33 = vpack.c.bf16 %v2973_v32, %v2973_v32  ;;  %v4128_v32 = vld [vmem:[#allocation6 + $0x80] sm:$0xff] }
 0x2cd   :  { %v2148_v18 = vpop.permute.xlu1 %2147  ;;  %v2270_v19 = vpop.permute.xlu0 %2269 }
 0x2ce   :  { %2184 = vst.msk [vmem:[#allocation5 + $0x2c] sm:$0xf] %vm748_vm5, %v2148_v18 }
 0x2cf   :  { %2309 = vst.msk [vmem:[#allocation5 + $0x20] sm:$0xf] %vm877_vm6, %v2270_v19  ;;  %2796 = vrot.lane.b32.xlu1 %v3976_v16, %s4220_s21  ;;  %3050 = vrot.lane.b32.xlu0 %v3960_v9, %s4222_s29 }
 0x2d1   :  { %v2272_v25 = vpop.permute.xlu1 %2271  ;;  %v2274_v21 = vpop.permute.xlu0 %2273  ;;  %v4121_v26 = vld [vmem:[#allocation5 + $0x18] sm:$0xff]  }
 0x2d2   :  { %2310 = vst.msk [vmem:[#allocation5 + $0x24] sm:$0xf] %vm877_vm6, %v2272_v25  ;;  %2311 = vst.msk [vmem:[#allocation5 + $0x28] sm:$0xf] %vm877_vm6, %v2274_v21  ;;  %4076 = vmatmul.mubr.msk.bf16.gmra.mxu1 %vm1760_vm13, %v4121_v26 }
 0x2d3   :  { %2920 = vrot.lane.b32.xlu1 %v5437_v37, %s4221_s24 }
 0x2d5   :  { %v2276_v6 = vpop.permute.xlu1 %2275  ;;  %v2398_v29 = vpop.permute.xlu0 %2397 }
 0x2d6   :  { %2312 = vst.msk [vmem:[#allocation5 + $0x2c] sm:$0xf] %vm877_vm6, %v2276_v6  ;;  %v4127_v6 = vld [vmem:[#allocation6 + $0x10] sm:$0xff] }
 0x2d7   :  { %2437 = vst.msk [vmem:[#allocation5 + $0x20] sm:$0xf] %vm1006_vm7, %v2398_v29  ;;  %2924 = vrot.lane.b32.xlu1 %v3992_v31, %s4221_s24  ;;  %v4126_v31 = vld [vmem:[#allocation6 + $0x90] sm:$0xff] }
 0x2d8   :  { %v296_v29 = vadd.f32 %v4127_v6, %v4126_v31  ;;  %v4151_v31 = vld [vmem:[#allocation6 + $0x28] sm:$0xff] }
 0x2d9   :  { %v2400_v8 = vpop.permute.xlu1 %2399  ;;  %v2402_v63 = vpop.permute.xlu0 %2401 }
 0x2da   :  { %2438 = vst.msk [vmem:[#allocation5 + $0x24] sm:$0xf] %vm1006_vm7, %v2400_v8  ;;  %2439 = vst.msk [vmem:[#allocation5 + $0x28] sm:$0xf] %vm1006_vm7, %v2402_v63  ;;  %v4129_v8 = vld [vmem:[#allocation6] sm:$0xff] }
 0x2db   :  { %3048 = vrot.lane.b32.xlu1 %v5457_v60, %s4222_s29  ;;  %v294_v63 = vadd.f32 %v4129_v8, %v4128_v32  ;;  %v4153_v8 = vld [vmem:[#allocation6 + $0x138] sm:$0xff] }
 0x2dd   :  { %v2404_v2 = vpop.permute.xlu1 %2403  ;;  %v2526_v42 = vpop.permute.xlu0 %2525 }
 0x2de   :  { %2440 = vst.msk [vmem:[#allocation5 + $0x2c] sm:$0xf] %vm1006_vm7, %v2404_v2 }
 0x2df   :  { %2565 = vst.msk [vmem:[#allocation5 + $0x20] sm:$0xf] %vm1135_vm8, %v2526_v42  ;;  %3052 = vrot.lane.b32.xlu1 %v4008_v33, %s4222_s29  ;;  %v4130_v33 = vld [vmem:[#allocation6 + $0x110] sm:$0xff]  ;;  %v4131_v42 = vld [vmem:[#allocation6 + $0x98] sm:$0xff] }
 0x2e0   :  { %v378_v2 = vadd.f32 %v4130_v33, %v296_v29  ;;  %v4152_v29 = vld [vmem:[#allocation6 + $0x1b0] sm:$0xff]  ;;  %v4154_v33 = vld [vmem:[#allocation6 + $0x1a0] sm:$0xff] }
 0x2e1   :  { %v2528_v57 = vpop.permute.xlu1 %2527  ;;  %v2530_v38 = vpop.permute.xlu0 %2529 }
 0x2e2   :  { %2566 = vst.msk [vmem:[#allocation5 + $0x24] sm:$0xf] %vm1135_vm8, %v2528_v57  ;;  %2567 = vst.msk [vmem:[#allocation5 + $0x28] sm:$0xf] %vm1135_vm8, %v2530_v38  ;;  %v4132_v57 = vld [vmem:[#allocation6 + $0x18] sm:$0xff] }
 0x2e3   :  { %v297_v38 = vadd.f32 %v4132_v57, %v4131_v42  ;;  %v4155_v42 = vld [vmem:[#allocation6 + $0x128] sm:$0xff] }
 0x2e5   :  { %v2532_v48 = vpop.permute.xlu1 %2531  ;;  %v2654_v39 = vpop.permute.xlu0 %2653 }
 0x2e6   :  { %2568 = vst.msk [vmem:[#allocation5 + $0x2c] sm:$0xf] %vm1135_vm8, %v2532_v48  ;;  %v4133_v48 = vld [vmem:[#allocation6 + $0x100] sm:$0xff] }
 0x2e7   :  { %2693 = vst.msk [vmem:[#allocation5 + $0x20] sm:$0xf] %vm1264_vm9, %v2654_v39  ;;  %v376_v39 = vadd.f32 %v4133_v48, %v294_v63 }
 0x2e9   :  { %v2656_v11 = vpop.permute.xlu1 %2655  ;;  %v2658_v43 = vpop.permute.xlu0 %2657 }
 0x2ea   :  { %2694 = vst.msk [vmem:[#allocation5 + $0x24] sm:$0xf] %vm1264_vm9, %v2656_v11  ;;  %2695 = vst.msk [vmem:[#allocation5 + $0x28] sm:$0xf] %vm1264_vm9, %v2658_v43  ;;  %v4134_v11 = vld [vmem:[#allocation6 + $0x88] sm:$0xff] }
 0x2eb   :  { %v4135_v43 = vld [vmem:[#allocation6 + $0x8] sm:$0xff] }
 0x2ed   :  { %v2660_v62 = vpop.permute.xlu1 %2659  ;;  %v2783_v22 = vpop.permute.xlu0 %2782 }
 0x2ee   :  { %2696 = vst.msk [vmem:[#allocation5 + $0x2c] sm:$0xf] %vm1264_vm9, %v2660_v62  ;;  %v295_v62 = vadd.f32 %v4135_v43, %v4134_v11  ;;  %v4156_v11 = vld [vmem:[#allocation6 + $0x1b8] sm:$0xff] }
 0x2ef   :  { %2822 = vst.msk [vmem:[#allocation5 + $0x20] sm:$0xf] %vm1393_vm10, %v2783_v22  ;;  %v4136_v22 = vld [vmem:[#allocation6 + $0x190] sm:$0xff] }
 0x2f1   :  { %v2785_v24 = vpop.permute.xlu1 %2784  ;;  %v2787_v41 = vpop.permute.xlu0 %2786 }
 0x2f2   :  { %2823 = vst.msk [vmem:[#allocation5 + $0x24] sm:$0xf] %vm1393_vm10, %v2785_v24  ;;  %2824 = vst.msk [vmem:[#allocation5 + $0x28] sm:$0xf] %vm1393_vm10, %v2787_v41  ;;  %v460_v24 = vadd.f32 %v4136_v22, %v378_v2  ;;  %v4137_v41 = vld [vmem:[#allocation6 + $0x118] sm:$0xff] }
 0x2f5   :  { %v2911_v46 = vpop.permute.xlu0 %2910 }
 0x2f6   :  { %2950 = vst.msk [vmem:[#allocation5 + $0x20] sm:$0xf] %vm1522_vm11, %v2911_v46  ;;  %v379_v46 = vadd.f32 %v4137_v41, %v297_v38 }
 0x2f9   :  { %v2915_v47 = vpop.permute.xlu0 %2914 }
 0x2fa   :  { %2952 = vst.msk [vmem:[#allocation5 + $0x28] sm:$0xf] %vm1522_vm11, %v2915_v47  ;;  %v5585_v47 = vld [vmem:[%s5695_s7] ss:$0 sm:$0xff] }
 0x2fd   :  { %v3039_v17 = vpop.permute.xlu0 %3038 }
 0x2fe   :  { %3078 = vst.msk [vmem:[#allocation5 + $0x20] sm:$0xf] %vm1651_vm12, %v3039_v17  ;;  %v4138_v17 = vld [vmem:[#allocation6 + $0x180] sm:$0xff] }
 0x301   :  { %v2789_v36 = vpop.permute.xlu1 %2788  ;;  %v2150_v40 = vpop.permute.xlu0 %2149 }
 0x302   :  { %2825 = vst.msk [vmem:[#allocation5 + $0x2c] sm:$0xf] %vm1393_vm10, %v2789_v36  ;;  %v458_v36 = vadd.f32 %v4138_v17, %v376_v39 }
 0x303   :  { %2185 = vst.msk [vmem:[#allocation5 + $0x30] sm:$0xf] %vm748_vm5, %v2150_v40  ;;  %v4139_v40 = vld [vmem:[#allocation6 + $0x108] sm:$0xff] }
 0x305   :  { %v2913_v34 = vpop.permute.xlu1 %2912  ;;  %v3043_v45 = vpop.permute.xlu0 %3042 }
 0x306   :  { %2951 = vst.msk [vmem:[#allocation5 + $0x24] sm:$0xf] %vm1522_vm11, %v2913_v34  ;;  %v377_v34 = vadd.f32 %v4139_v40, %v295_v62 }
 0x307   :  { %3080 = vst.msk [vmem:[#allocation5 + $0x28] sm:$0xf] %vm1651_vm12, %v3043_v45 }
 0x309   :  { %v2917_v23 = vpop.permute.xlu1 %2916  ;;  %v2154_v13 = vpop.permute.xlu0 %2153 }
 0x30a   :  { %2953 = vst.msk [vmem:[#allocation5 + $0x2c] sm:$0xf] %vm1522_vm11, %v2917_v23  ;;  %v5590_v23 = vld [vmem:[%s5696_s8] ss:$0 sm:$0xff] }
 0x30b   :  { %2187 = vst.msk [vmem:[#allocation5 + $0x38] sm:$0xf] %vm748_vm5, %v2154_v13  ;;  %v525_v13 = vmul.f32 0.25, %v460_v24 }
 0x30d   :  { %v3041_v44 = vpop.permute.xlu1 %3040  ;;  %v2278_v37 = vpop.permute.xlu0 %2277 }
 0x30e   :  { %3079 = vst.msk [vmem:[#allocation5 + $0x24] sm:$0xf] %vm1651_vm12, %v3041_v44 }
 0x30f   :  { %2313 = vst.msk [vmem:[#allocation5 + $0x30] sm:$0xf] %vm877_vm6, %v2278_v37  ;;  %v4140_v37 = vld [vmem:[#allocation6 + $0x198] sm:$0xff] }
 0x311   :  { %v2152_v49 = vpop.permute.xlu1 %2151  ;;  %v2282_v52 = vpop.permute.xlu0 %2281 }
 0x312   :  { %2186 = vst.msk [vmem:[#allocation5 + $0x34] sm:$0xf] %vm748_vm5, %v2152_v49  ;;  %v461_v49 = vadd.f32 %v4140_v37, %v379_v46  ;;  %v4157_v46 = vld [vmem:[#allocation6 + $0x1a8] sm:$0xff] }
 0x313   :  { %2315 = vst.msk [vmem:[#allocation5 + $0x38] sm:$0xf] %vm877_vm6, %v2282_v52 }
 0x315   :  { %v3045_v54 = vpop.permute.xlu1 %3044  ;;  %v2406_v55 = vpop.permute.xlu0 %2405  ;;  %v4122_v59 = vld [vmem:[#allocation5 + $0x20] sm:$0xff]  }
 0x316   :  { %3081 = vst.msk [vmem:[#allocation5 + $0x2c] sm:$0xf] %vm1651_vm12, %v3045_v54  ;;  %4079 = vmatprep.mubr.msk.bf16.mxu1 %vm1760_vm13, %v4122_v59 }
 0x317   :  { %2441 = vst.msk [vmem:[#allocation5 + $0x30] sm:$0xf] %vm1006_vm7, %v2406_v55  ;;  %v523_v55 = vmul.f32 0.25, %v458_v36 }
 0x319   :  { %v2156_v28 = vpop.permute.xlu1 %2155  ;;  %v2410_v60 = vpop.permute.xlu0 %2409 }
 0x31a   :  { %2188 = vst.msk [vmem:[#allocation5 + $0x3c] sm:$0xf] %vm748_vm5, %v2156_v28  ;;  %v4141_v28 = vld [vmem:[#allocation6 + $0x188] sm:$0xff] }
 0x31b   :  { %2443 = vst.msk [vmem:[#allocation5 + $0x38] sm:$0xf] %vm1006_vm7, %v2410_v60  ;;  %v459_v60 = vadd.f32 %v4141_v28, %v377_v34 }
 0x31d   :  { %v2280_v58 = vpop.permute.xlu1 %2279  ;;  %v2534_v1 = vpop.permute.xlu0 %2533  ;;  %v4123_v56 = vld [vmem:[#allocation5 + $0x28] sm:$0xff]  }
 0x31e   :  { %2314 = vst.msk [vmem:[#allocation5 + $0x34] sm:$0xf] %vm877_vm6, %v2280_v58  ;;  %4080 = vmatmul.mubr.msk.bf16.gmra.mxu1 %vm1760_vm13, %v4123_v56 }
 0x31f   :  { %2569 = vst.msk [vmem:[#allocation5 + $0x30] sm:$0xf] %vm1135_vm8, %v2534_v1 }
 0x321   :  { %v2284_v27 = vpop.permute.xlu1 %2283  ;;  %v2538_v30 = vpop.permute.xlu0 %2537 }
 0x322   :  { %2316 = vst.msk [vmem:[#allocation5 + $0x3c] sm:$0xf] %vm877_vm6, %v2284_v27  ;;  %v526_v27 = vmul.f32 0.25, %v461_v49 }
 0x323   :  { %2571 = vst.msk [vmem:[#allocation5 + $0x38] sm:$0xf] %vm1135_vm8, %v2538_v30 }
 0x325   :  { %v2408_v35 = vpop.permute.xlu1 %2407  ;;  %v2662_v0 = vpop.permute.xlu0 %2661 }
 0x326   :  { %2442 = vst.msk [vmem:[#allocation5 + $0x34] sm:$0xf] %vm1006_vm7, %v2408_v35 }
 0x327   :  { %2697 = vst.msk [vmem:[#allocation5 + $0x30] sm:$0xf] %vm1264_vm9, %v2662_v0 }
 0x329   :  { %v2412_v3 = vpop.permute.xlu1 %2411  ;;  %v2666_v4 = vpop.permute.xlu0 %2665 }
 0x32a   :  { %2444 = vst.msk [vmem:[#allocation5 + $0x3c] sm:$0xf] %vm1006_vm7, %v2412_v3 }
 0x32b   :  { %2699 = vst.msk [vmem:[#allocation5 + $0x38] sm:$0xf] %vm1264_vm9, %v2666_v4  ;;  %v524_v4 = vmul.f32 0.25, %v459_v60  ;;  %v4158_v60 = vld [vmem:[#allocation6 + $0xd0] sm:$0xff] }
 0x32d   :  { %v2536_v61 = vpop.permute.xlu1 %2535  ;;  %v2791_v50 = vpop.permute.xlu0 %2790 }
 0x32e   :  { %2570 = vst.msk [vmem:[#allocation5 + $0x34] sm:$0xf] %vm1135_vm8, %v2536_v61 }
 0x32f   :  { %2826 = vst.msk [vmem:[#allocation5 + $0x30] sm:$0xf] %vm1393_vm10, %v2791_v50 }
 0x331   :  { %v2540_v51 = vpop.permute.xlu1 %2539  ;;  %v2795_v5 = vpop.permute.xlu0 %2794 }
 0x332   :  { %2572 = vst.msk [vmem:[#allocation5 + $0x3c] sm:$0xf] %vm1135_vm8, %v2540_v51 }
 0x333   :  { %2828 = vst.msk [vmem:[#allocation5 + $0x38] sm:$0xf] %vm1393_vm10, %v2795_v5 }
 0x335   :  { %v2664_v7 = vpop.permute.xlu1 %2663  ;;  %v2919_v53 = vpop.permute.xlu0 %2918 }
 0x336   :  { %2698 = vst.msk [vmem:[#allocation5 + $0x34] sm:$0xf] %vm1264_vm9, %v2664_v7  ;;  %v4142_v7 = vld [vmem:[#allocation6 + $0xb0] sm:$0xff] }
 0x337   :  { %2954 = vst.msk [vmem:[#allocation5 + $0x30] sm:$0xf] %vm1522_vm11, %v2919_v53  ;;  %v4143_v53 = vld [vmem:[#allocation6 + $0x30] sm:$0xff] }
 0x339   :  { %v2668_v9 = vpop.permute.xlu1 %2667  ;;  %v2923_v12 = vpop.permute.xlu0 %2922 }
 0x33a   :  { %2700 = vst.msk [vmem:[#allocation5 + $0x3c] sm:$0xf] %vm1264_vm9, %v2668_v9  ;;  %v300_v9 = vadd.f32 %v4143_v53, %v4142_v7  ;;  %v4167_v7 = vld [vmem:[#allocation6 + $0x48] sm:$0xff] }
 0x33b   :  { %2956 = vst.msk [vmem:[#allocation5 + $0x38] sm:$0xf] %vm1522_vm11, %v2923_v12  ;;  %v4144_v12 = vld [vmem:[#allocation6 + $0xa0] sm:$0xff] }
 0x33d   :  { %v2793_v14 = vpop.permute.xlu1 %2792  ;;  %v3047_v15 = vpop.permute.xlu0 %3046 }
 0x33e   :  { %2827 = vst.msk [vmem:[#allocation5 + $0x34] sm:$0xf] %vm1393_vm10, %v2793_v14  ;;  %v4145_v14 = vld [vmem:[#allocation6 + $0x20] sm:$0xff] }
 0x33f   :  { %3082 = vst.msk [vmem:[#allocation5 + $0x30] sm:$0xf] %vm1651_vm12, %v3047_v15  ;;  %v298_v15 = vadd.f32 %v4145_v14, %v4144_v12  ;;  %v4169_v14 = vld [vmem:[#allocation6 + $0x158] sm:$0xff] }
 0x341   :  { %v2797_v10 = vpop.permute.xlu1 %2796  ;;  %v3051_v16 = vpop.permute.xlu0 %3050 }
 0x342   :  { %2829 = vst.msk [vmem:[#allocation5 + $0x3c] sm:$0xf] %vm1393_vm10, %v2797_v10  ;;  %v4146_v10 = vld [vmem:[#allocation6 + $0x130] sm:$0xff] }
 0x343   :  { %3084 = vst.msk [vmem:[#allocation5 + $0x38] sm:$0xf] %vm1651_vm12, %v3051_v16  ;;  %v382_v16 = vadd.f32 %v4146_v10, %v300_v9  ;;  %v4168_v9 = vld [vmem:[#allocation6 + $0x1d0] sm:$0xff]  ;;  %v4170_v10 = vld [vmem:[#allocation6 + $0x1c0] sm:$0xff] }
 0x345   :  { %v2921_v18 = vpop.permute.xlu1 %2920  ;;  %v464_v32 = vadd.f32 %v4152_v29, %v382_v16 }
 0x346   :  { %2955 = vst.msk [vmem:[#allocation5 + $0x34] sm:$0xf] %vm1522_vm11, %v2921_v18  ;;  %v4147_v18 = vld [vmem:[#allocation6 + $0xb8] sm:$0xff] }
 0x347   :  { %v529_v48 = vmul.f32 0.25, %v464_v32 }
 0x349   :  { %v2925_v19 = vpop.permute.xlu1 %2924 }
 0x34a   :  { %2957 = vst.msk [vmem:[#allocation5 + $0x3c] sm:$0xf] %vm1522_vm11, %v2925_v19  ;;  %v4148_v19 = vld [vmem:[#allocation6 + $0x38] sm:$0xff] }
 0x34d   :  { %v3049_v20 = vpop.permute.xlu1 %3048 }
 0x34e   :  { %3083 = vst.msk [vmem:[#allocation5 + $0x34] sm:$0xf] %vm1651_vm12, %v3049_v20  ;;  %v301_v20 = vadd.f32 %v4148_v19, %v4147_v18  ;;  %v4171_v18 = vld [vmem:[#allocation6 + $0x148] sm:$0xff] }
 0x350   :  { %v383_v63 = vadd.f32 %v4153_v8, %v301_v20 }
 0x351   :  { %v3053_v25 = vpop.permute.xlu1 %3052 }
 0x352   :  { %3085 = vst.msk [vmem:[#allocation5 + $0x3c] sm:$0xf] %vm1651_vm12, %v3053_v25  ;;  %v4149_v25 = vld [vmem:[#allocation6 + $0x120] sm:$0xff]  ;;  %v465_v43 = vadd.f32 %v4156_v11, %v383_v63  ;;  %v4173_v63 = vld [vmem:[#allocation6 + $0x1c8] sm:$0xff] }
 0x355   :  { %v4124_v21 = vld [vmem:[#allocation5 + $0x30] sm:$0xff]  }
 0x356   :  { %4083 = vmatprep.mubr.msk.bf16.mxu1 %vm1760_vm13, %v4124_v21  ;;  %v380_v21 = vadd.f32 %v4149_v25, %v298_v15 }
 0x358   :  { %v462_v2 = vadd.f32 %v4154_v33, %v380_v21 }
 0x359   :  { %v4125_v26 = vld [vmem:[#allocation5 + $0x38] sm:$0xff]  }
 0x35a   :  { %4084 = vmatmul.mubr.msk.bf16.gmra.mxu1 %vm1760_vm13, %v4125_v26  ;;  %v4150_v26 = vld [vmem:[#allocation6 + $0xa8] sm:$0xff]  ;;  %v527_v24 = vmul.f32 0.25, %v462_v2 }
 0x35b   :  { %v299_v6 = vadd.f32 %v4151_v31, %v4150_v26  ;;  %v4172_v26 = vld [vmem:[#allocation6 + $0x1d8] sm:$0xff] }
 0x35d   :  { %v381_v57 = vadd.f32 %v4155_v42, %v299_v6 }
 0x35f   :  { %v463_v17 = vadd.f32 %v4157_v46, %v381_v57 }
 0x36c   :  { %v4073_v45 = vpop.f32.mrf.mxu1 }
 0x36d   :  { %v3311_v44 = vmul.f32 %v4073_v45, %v5585_v47  ;;  %v530_v45 = vmul.f32 0.25, %v465_v43 }
 0x36e   :  { %v3239_v52 = vpop.f32.mrf.mxu1 }
 0x36f   :  { %v3334_v54 = vadd.f32 %v5590_v23, %v3311_v44  ;;  %v3309_v59 = vmul.f32 %v5585_v47, %v3239_v52  ;;  %v528_v52 = vmul.f32 0.25, %v463_v17  ;;  %v4174_v17 = vld [vmem:[#allocation6 + $0xf0] sm:$0xff] }
 0x370   :  { %v4074_v58 = vpop.f32.mrf.mxu1 }
 0x371   :  { %v3350_v1 = vadd.f32 %v3334_v54, %v525_v13  ;;  %v3332_v56 = vadd.f32 %v5590_v23, %v3309_v59  ;;  %v3312_v30 = vmul.f32 %v4074_v58, %v5585_v47  ;;  %v4159_v58 = vld [vmem:[#allocation6 + $0x50] sm:$0xff] }
 0x372   :  { %v3242_v35 = vpop.f32.mrf.mxu1 }
 0x373   :  { %3366 = vst.msk [vmem:[%s5697_s9 + $0x10] sm:$0xff] %vm47_vm0, %v3350_v1  ;;  %v3348_v0 = vadd.f32 %v3332_v56, %v523_v55  ;;  %v3335_v3 = vadd.f32 %v5590_v23, %v3312_v30  ;;  %v3310_v61 = vmul.f32 %v5585_v47, %v3242_v35  ;;  %v304_v1 = vadd.f32 %v4159_v58, %v4158_v60  ;;  %v4160_v56 = vld [vmem:[#allocation6 + $0xc0] sm:$0xff]  ;;  %v4162_v35 = vld [vmem:[#allocation6 + $0x150] sm:$0xff]  ;;  %v4183_v60 = vld [vmem:[#allocation6 + $0x68] sm:$0xff] }
 0x375   :  { %3364 = vst.msk [vmem:[%s5697_s9] sm:$0xff] %vm47_vm0, %v3348_v0  ;;  %v3351_v50 = vadd.f32 %v3335_v3, %v526_v27  ;;  %v3333_v51 = vadd.f32 %v5590_v23, %v3310_v61  ;;  %v4161_v27 = vld [vmem:[#allocation6 + $0x40] sm:$0xff]  ;;  %v386_v0 = vadd.f32 %v4162_v35, %v304_v1  ;;  %v4163_v3 = vld [vmem:[#allocation6 + $0xd8] sm:$0xff]  ;;  %v4184_v1 = vld [vmem:[#allocation6 + $0x1f0] sm:$0xff] }
 0x376   :  { %v302_v30 = vadd.f32 %v4161_v27, %v4160_v56  ;;  %v4185_v27 = vld [vmem:[#allocation6 + $0x178] sm:$0xff]  ;;  %v4186_v35 = vld [vmem:[#allocation6 + $0x1e0] sm:$0xff] }
 0x377   :  { %3367 = vst.msk [vmem:[%s5697_s9 + $0x18] sm:$0xff] %vm47_vm0, %v3351_v50  ;;  %v3349_v5 = vadd.f32 %v3333_v51, %v524_v4  ;;  %v4164_v4 = vld [vmem:[#allocation6 + $0x58] sm:$0xff]  ;;  %v4165_v50 = vld [vmem:[#allocation6 + $0x140] sm:$0xff]  ;;  %v468_v12 = vadd.f32 %v4168_v9, %v386_v0 }
 0x378   :  { %v305_v61 = vadd.f32 %v4164_v4, %v4163_v3  ;;  %v384_v51 = vadd.f32 %v4165_v50, %v302_v30  ;;  %v4187_v3 = vld [vmem:[#allocation6 + $0x168] sm:$0xff] }
 0x379   :  { %3365 = vst.msk [vmem:[%s5697_s9 + $0x8] sm:$0xff] %vm47_vm0, %v3349_v5  ;;  %v4166_v5 = vld [vmem:[#allocation6 + $0xc8] sm:$0xff]  ;;  %v533_v25 = vmul.f32 0.25, %v468_v12 }
 0x37a   :  { %v303_v53 = vadd.f32 %v4167_v7, %v4166_v5  ;;  %v387_v15 = vadd.f32 %v4169_v14, %v305_v61  ;;  %v466_v16 = vadd.f32 %v4170_v10, %v384_v51  ;;  %v4188_v5 = vld [vmem:[#allocation6 + $0x1f8] sm:$0xff] }
 0x37c   :  { %v385_v19 = vadd.f32 %v4171_v18, %v303_v53  ;;  %v469_v31 = vadd.f32 %v4172_v26, %v387_v15  ;;  %v531_v32 = vmul.f32 0.25, %v466_v16  ;;  %v4189_v15 = vld [vmem:[#allocation6 + $0x1e8] sm:$0xff] }
 0x37e   :  { %v467_v33 = vadd.f32 %v4173_v63, %v385_v19 }
 0x392   :  { %v4077_v38 = vpop.f32.mrf.mxu1 }
 0x393   :  { %v3315_v39 = vmul.f32 %v4077_v38, %v5585_v47  ;;  %v534_v38 = vmul.f32 0.25, %v469_v31 }
 0x394   :  { %v3255_v62 = vpop.f32.mrf.mxu1 }
 0x395   :  { %v3338_v22 = vadd.f32 %v5590_v23, %v3315_v39  ;;  %v3313_v41 = vmul.f32 %v5585_v47, %v3255_v62  ;;  %v532_v62 = vmul.f32 0.25, %v467_v33 }
 0x396   :  { %v4078_v36 = vpop.f32.mrf.mxu1 }
 0x397   :  { %v3354_v40 = vadd.f32 %v3338_v22, %v529_v48  ;;  %v3336_v34 = vadd.f32 %v5590_v23, %v3313_v41  ;;  %v3316_v13 = vmul.f32 %v4078_v36, %v5585_v47  ;;  %v4175_v36 = vld [vmem:[#allocation6 + $0x70] sm:$0xff] }
 0x398   :  { %v3258_v44 = vpop.f32.mrf.mxu1 }
 0x399   :  { %3370 = vst.msk [vmem:[%s5697_s9 + $0x30] sm:$0xff] %vm47_vm0, %v3354_v40  ;;  %v3352_v37 = vadd.f32 %v3336_v34, %v527_v24  ;;  %v3339_v49 = vadd.f32 %v5590_v23, %v3316_v13  ;;  %v3314_v54 = vmul.f32 %v5585_v47, %v3258_v44  ;;  %v308_v40 = vadd.f32 %v4175_v36, %v4174_v17  ;;  %v4176_v34 = vld [vmem:[#allocation6 + $0xe0] sm:$0xff]  ;;  %v4178_v44 = vld [vmem:[#allocation6 + $0x170] sm:$0xff] }
 0x39b   :  { %3368 = vst.msk [vmem:[%s5697_s9 + $0x20] sm:$0xff] %vm47_vm0, %v3352_v37  ;;  %v3355_v55 = vadd.f32 %v3339_v49, %v530_v45  ;;  %v3337_v59 = vadd.f32 %v5590_v23, %v3314_v54  ;;  %v4177_v45 = vld [vmem:[#allocation6 + $0x60] sm:$0xff]  ;;  %v390_v37 = vadd.f32 %v4178_v44, %v308_v40  ;;  %v4179_v49 = vld [vmem:[#allocation6 + $0xf8] sm:$0xff] }
 0x39c   :  { %v306_v13 = vadd.f32 %v4177_v45, %v4176_v34 }
 0x39d   :  { %3371 = vst.msk [vmem:[%s5697_s9 + $0x38] sm:$0xff] %vm47_vm0, %v3355_v55  ;;  %v3353_v28 = vadd.f32 %v3337_v59, %v528_v52  ;;  %v4180_v52 = vld [vmem:[#allocation6 + $0x78] sm:$0xff]  ;;  %v4181_v55 = vld [vmem:[#allocation6 + $0x160] sm:$0xff]  ;;  %v472_v56 = vadd.f32 %v4184_v1, %v390_v37 }
 0x39e   :  { %v309_v54 = vadd.f32 %v4180_v52, %v4179_v49  ;;  %v388_v59 = vadd.f32 %v4181_v55, %v306_v13 }
 0x39f   :  { %3369 = vst.msk [vmem:[%s5697_s9 + $0x28] sm:$0xff] %vm47_vm0, %v3353_v28  ;;  %v4182_v28 = vld [vmem:[#allocation6 + $0xe8] sm:$0xff]  ;;  %v537_v50 = vmul.f32 0.25, %v472_v56 }
 0x3a0   :  { %v307_v58 = vadd.f32 %v4183_v60, %v4182_v28  ;;  %v391_v30 = vadd.f32 %v4185_v27, %v309_v54  ;;  %v470_v0 = vadd.f32 %v4186_v35, %v388_v59 }
 0x3a2   :  { %v389_v4 = vadd.f32 %v4187_v3, %v307_v58  ;;  %v473_v7 = vadd.f32 %v4188_v5, %v391_v30  ;;  %v535_v12 = vmul.f32 0.25, %v470_v0 }
 0x3a4   :  { %v471_v10 = vadd.f32 %v4189_v15, %v389_v4 }
 0x3de   :  { %v4081_v20 = vpop.f32.mrf.mxu1 }
 0x3df   :  { %v3319_v21 = vmul.f32 %v4081_v20, %v5585_v47  ;;  %v538_v20 = vmul.f32 0.25, %v473_v7 }
 0x3e0   :  { %v3271_v6 = vpop.f32.mrf.mxu1 }
 0x3e1   :  { %v3342_v29 = vadd.f32 %v5590_v23, %v3319_v21  ;;  %v3317_v8 = vmul.f32 %v5585_v47, %v3271_v6  ;;  %v536_v6 = vmul.f32 0.25, %v471_v10 }
 0x3e2   :  { %v4082_v2 = vpop.f32.mrf.mxu1 }
 0x3e3   :  { %v3358_v42 = vadd.f32 %v3342_v29, %v533_v25  ;;  %v3340_v57 = vadd.f32 %v5590_v23, %v3317_v8  ;;  %v3320_v48 = vmul.f32 %v4082_v2, %v5585_v47 }
 0x3e4   :  { %v3274_v39 = vpop.f32.mrf.mxu1 }
 0x3e5   :  { %3374 = vst.msk [vmem:[%s5697_s9 + $0x50] sm:$0xff] %vm47_vm0, %v3358_v42  ;;  %v3356_v11 = vadd.f32 %v3340_v57, %v531_v32  ;;  %v3343_v43 = vadd.f32 %v5590_v23, %v3320_v48  ;;  %v3318_v22 = vmul.f32 %v5585_v47, %v3274_v39 }
 0x3e7   :  { %3372 = vst.msk [vmem:[%s5697_s9 + $0x40] sm:$0xff] %vm47_vm0, %v3356_v11  ;;  %v3359_v24 = vadd.f32 %v3343_v43, %v534_v38  ;;  %v3341_v41 = vadd.f32 %v5590_v23, %v3318_v22 }
 0x3e9   :  { %3375 = vst.msk [vmem:[%s5697_s9 + $0x58] sm:$0xff] %vm47_vm0, %v3359_v24  ;;  %v3357_v46 = vadd.f32 %v3341_v41, %v532_v62 }
 0x3eb   :  { %3373 = vst.msk [vmem:[%s5697_s9 + $0x48] sm:$0xff] %vm47_vm0, %v3357_v46 }
 0x41a   :  { %v4085_v61 = vpop.f32.mrf.mxu1 }
 0x41b   :  { %v3323_v51 = vmul.f32 %v4085_v61, %v5585_v47 }
 0x41c   :  { %v3287_v53 = vpop.f32.mrf.mxu1 }
 0x41d   :  { %v3346_v9 = vadd.f32 %v5590_v23, %v3323_v51  ;;  %v3321_v14 = vmul.f32 %v5585_v47, %v3287_v53 }
 0x41e   :  { %v4086_v16 = vpop.f32.mrf.mxu1 }
 0x41f   :  { %v3362_v18 = vadd.f32 %v3346_v9, %v537_v50  ;;  %v3344_v19 = vadd.f32 %v5590_v23, %v3321_v14  ;;  %v3324_v25 = vmul.f32 %v4086_v16, %v5585_v47 }
 0x420   :  { %v3290_v21 = vpop.f32.mrf.mxu1 }
 0x421   :  { %3378 = vst.msk [vmem:[%s5697_s9 + $0x70] sm:$0xff] %vm47_vm0, %v3362_v18  ;;  %v3360_v26 = vadd.f32 %v3344_v19, %v535_v12  ;;  %v3347_v31 = vadd.f32 %v5590_v23, %v3324_v25  ;;  %v3322_v29 = vmul.f32 %v5585_v47, %v3290_v21 }
 0x423   :  { %3376 = vst.msk [vmem:[%s5697_s9 + $0x60] sm:$0xff] %vm47_vm0, %v3360_v26  ;;  %v3363_v32 = vadd.f32 %v3347_v31, %v538_v20  ;;  %v3345_v8 = vadd.f32 %v5590_v23, %v3322_v29 }
 0x425   :  { %3379 = vst.msk [vmem:[%s5697_s9 + $0x78] sm:$0xff] %vm47_vm0, %v3363_v32  ;;  %v3361_v63 = vadd.f32 %v3345_v8, %v536_v6 }
 0x427   :  { %3377 = vst.msk [vmem:[%s5697_s9 + $0x68] sm:$0xff] %vm47_vm0, %v3361_v63 }
 0x428   :  { %3384 = vsyncpa [#allocation7], 1 }

</bundles_post_ra>
